<compile_context>
chip_gen: v7x
topology: tpu7x:2x2x1
jax: 0.10.0
libtpu: 0.0.40
codegen_flags: <defaults>
</compile_context>

<pallas_src>
import functools

import jax
import jax.numpy as jnp
from jax.experimental import pallas as pl
from jax.experimental.pallas import tpu as pltpu


def _round_up(x, m):
    return (x + m - 1) // m * m


def _resnet_block_kernel(x_ref, w0_ref, b0_ref, w1_ref, b1_ref, o_ref, hpad_ref,
                         *, H, W, Wq, res_scale):
    """One grid step == one image.

    x_ref   : (1, (H+2)*Wq, Kp)     kx-folded, zero-padded, row-flattened input
                                    (lane j*Cin+c = channel c of {center,west,east}[j] tap)
    w0_ref  : (3, Kp, Cmidp)        conv0 weights, kx folded into rows, one slab per ky
    b0_ref  : (1, Cmidp)
    w1_ref  : (3, 3, Cmidp, Coutp)  conv1 weights (ky, kx, in, out)
    b1_ref  : (1, Coutp)
    o_ref   : (1, H*Wq, Coutp)      row-flattened output (columns >= W are junk)
    hpad_ref: ((H+3)*Wq, Cmidp)     VMEM scratch: zero-framed conv0 output
    """
    L = H * Wq
    Lh = (H + 3) * Wq
    Cmidp = hpad_ref.shape[-1]
    Coutp = o_ref.shape[-1]

    # ---- conv0: kx taps pre-folded into lanes -> 3 aligned matmuls + ReLU ----
    acc0 = jnp.zeros((L, Cmidp), jnp.float32)
    for ky in range(3):
        base = ky * Wq                                    # multiple of 8 -> aligned
        acc0 = acc0 + jnp.dot(x_ref[0, base:base + L, :], w0_ref[ky],
                              preferred_element_type=jnp.float32)
    h = jnp.maximum(acc0 + b0_ref[...], 0.0)              # CNA: act only after conv0

    # ---- re-pad intermediate for conv1 ---------------------------------------
    # Zero only the constant border strips (done every step: no reliance on
    # scratch persistence, so "parallel" megacore sharding stays correct).
    top = Wq + 1
    hpad_ref[0:top, :] = jnp.zeros((top, Cmidp), jnp.float32)
    bot = (H + 1) * Wq + 1
    hpad_ref[bot:Lh, :] = jnp.zeros((Lh - bot, Cmidp), jnp.float32)

    # Mask the junk right-pad columns (x >= W) so they act as conv1's zero
    # padding, then write the whole interior with ONE shifted bulk store.
    col = jax.lax.broadcasted_iota(jnp.int32, (L, 1), 0) % Wq
    hpad_ref[top:top + L, :] = jnp.where(col < W, h, 0.0)

    # ---- conv1: 9 shifted matmuls on the lane-dense (128) scratch -------------
    acc1 = jnp.zeros((L, Coutp), jnp.float32)
    for ky in range(3):
        for kx in range(3):
            base = ky * Wq + kx
            acc1 = acc1 + jnp.dot(hpad_ref[base:base + L, :], w1_ref[ky, kx],
                                  preferred_element_type=jnp.float32)
    res = acc1 + b1_ref[...]

    # ---- residual add with EDSR scaling ---------------------------------------
    # Center-tap channels of the folded input live at lanes [0, Cin) of the row
    # at offset +Wq, so the residual is a plain lane-aligned slab add.
    xc = x_ref[0, Wq:Wq + L, 0:Coutp].astype(jnp.float32)
    o_ref[0] = (xc + res_scale * res).astype(o_ref.dtype)


def resnet_block_pallas(x_nchw, w0, b0, w1, b1, res_scale=1.0):
    """Fused ResNetBlock forward.  x: (N,Cin,H,W) NCHW; weights: torch OIHW."""
    N, Cin, H, W = x_nchw.shape
    Cmid = w0.shape[0]
    Cout = w1.shape[0]
    dtype = x_nchw.dtype

    Wq = _round_up(W + 2, 8)             # row pitch: >= W+2, sublane aligned
    L = H * Wq                           # flattened output rows per image
    Lin = (H + 2) * Wq                   # flattened padded-input rows per image
    Lh = (H + 3) * Wq                    # scratch rows (1 top pad, 2 bottom slack)

    Kp = _round_up(3 * Cin, 128)         # folded contraction dim (lane dense)
    Cmidp = _round_up(Cmid, 128)
    Coutp = _round_up(Cout, 128)

    # ---- input: NCHW -> NHWC, fold the 3 kx taps into channels ---------------
    x_nhwc = jnp.transpose(x_nchw, (0, 2, 3, 1))                        # (N,H,W,Cin)
    xw = jnp.pad(x_nhwc, ((0, 0), (0, 0), (1, 1), (0, 0)))              # width pad 1
    xk = jnp.concatenate([xw[:, :, 1:W + 1], xw[:, :, 0:W], xw[:, :, 2:W + 2]],
                         axis=-1)                                       # [center,west,east]
    xkp = jnp.zeros((N, H + 2, Wq, Kp), dtype)
    xkp = xkp.at[:, 1:H + 1, :W, :3 * Cin].set(xk)                      # 1-row top/bot pad
    xflat = xkp.reshape(N, Lin, Kp)
    # TODO(synk): for large images add a row-strip grid axis (2-row halo) and move
    # this pad/fold into the kernel DMA so VMEM stays bounded and input isn't re-materialized.

    # ---- weights: torch OIHW -> lane-padded kernel layouts --------------------
    w0_hwio = jnp.transpose(w0, (2, 3, 1, 0))                           # (3,3,Cin,Cmid)
    w0_fold = w0_hwio[:, jnp.array([1, 0, 2]), :, :].reshape(3, 3 * Cin, Cmid)
    w0k = jnp.zeros((3, Kp, Cmidp), dtype).at[:, :3 * Cin, :Cmid].set(w0_fold)

    w1_hwio = jnp.transpose(w1, (2, 3, 1, 0))                           # (3,3,Cmid,Cout)
    w1k = jnp.zeros((3, 3, Cmidp, Coutp), dtype).at[:, :, :Cmid, :Cout].set(w1_hwio)

    b0k = jnp.zeros((1, Cmidp), dtype).at[0, :Cmid].set(b0)
    b1k = jnp.zeros((1, Coutp), dtype).at[0, :Cout].set(b1)

    kernel = functools.partial(_resnet_block_kernel, H=H, W=W, Wq=Wq,
                               res_scale=float(res_scale))

    # VMEM budget from actual block sizes (double-buffered in/out + scratch +
    # weights + f32 accumulators/temps), with headroom, capped for v7x.
    f32 = 4
    vmem_need = f32 * (2 * Lin * Kp + 2 * L * Coutp + Lh * Cmidp
                       + 2 * (3 * Kp * Cmidp + 9 * Cmidp * Coutp + Cmidp + Coutp)
                       + 4 * L * max(Cmidp, Coutp))
    vmem_limit = int(min(max(2 * vmem_need, 32 * 1024 * 1024), 64 * 1024 * 1024))

    out_flat = pl.pallas_call(
        kernel,
        out_shape=jax.ShapeDtypeStruct((N, L, Coutp), dtype),
        grid=(N,),
        in_specs=[
            pl.BlockSpec((1, Lin, Kp), lambda n: (n, 0, 0)),
            pl.BlockSpec((3, Kp, Cmidp), lambda n: (0, 0, 0)),
            pl.BlockSpec((1, Cmidp), lambda n: (0, 0)),
            pl.BlockSpec((3, 3, Cmidp, Coutp), lambda n: (0, 0, 0, 0)),
            pl.BlockSpec((1, Coutp), lambda n: (0, 0)),
        ],
        out_specs=pl.BlockSpec((1, L, Coutp), lambda n: (n, 0, 0)),
        scratch_shapes=[pltpu.VMEM((Lh, Cmidp), jnp.float32)],
        compiler_params=pltpu.CompilerParams(
            dimension_semantics=("parallel",),
            vmem_limit_bytes=vmem_limit),
    )(xflat, w0k, b0k, w1k, b1k)

    # drop junk columns / lane padding, back to NCHW
    out = out_flat.reshape(N, H, Wq, Coutp)[:, :, :W, :Cout]
    return jnp.transpose(out, (0, 3, 1, 2))


def resnet_block_ref(x, w0, b0, w1, b1, res_scale):
    """Plain-JAX reference mirroring the PyTorch ResNetBlock forward."""
    dn = ('NCHW', 'OIHW', 'NCHW')
    h = jax.lax.conv_general_dilated(x, w0, (1, 1), 'SAME', dimension_numbers=dn)
    h = jnp.maximum(h + b0.reshape(1, -1, 1, 1), 0.0)
    r = jax.lax.conv_general_dilated(h, w1, (1, 1), 'SAME', dimension_numbers=dn)
    r = r + b1.reshape(1, -1, 1, 1)
    return x + res_scale * r


if __name__ == "__main__":
    key = jax.random.PRNGKey(0)
    N, Cin, Cmid, Cout, H, W = 2, 4, 8, 4, 16, 16
    res_scale = 1.0

    k = jax.random.split(key, 5)
    x = jax.random.normal(k[0], (N, Cin, H, W), jnp.float32)
    # deterministic synthetic parameters (Conv2d(in, mid, 3) / Conv2d(mid, out, 3))
    w0 = jax.random.normal(k[1], (Cmid, Cin, 3, 3), jnp.float32) * 0.1
    b0 = jax.random.normal(k[2], (Cmid,), jnp.float32) * 0.1
    w1 = jax.random.normal(k[3], (Cout, Cmid, 3, 3), jnp.float32) * 0.1
    b1 = jax.random.normal(k[4], (Cout,), jnp.float32) * 0.1

    out = jax.block_until_ready(resnet_block_pallas(x, w0, b0, w1, b1, res_scale))
    ref = resnet_block_ref(x, w0, b0, w1, b1, res_scale)

    assert out.shape == (N, Cout, H, W), out.shape
    max_err = float(jnp.max(jnp.abs(out - ref)))
    assert jnp.allclose(out, ref, atol=1e-4, rtol=1e-4), max_err
    print("KERNEL_OK")
</pallas_src>

<mosaic_0001>
module attributes {stable_mosaic.version = 11 : i64} {
  func.func @_resnet_block_kernel(%arg0: i32, %arg1: memref<1x432x128xf32, #tpu.memory_space<vmem>>, %arg2: memref<3x128x128xf32, #tpu.memory_space<vmem>>, %arg3: memref<1x128xf32, #tpu.memory_space<vmem>>, %arg4: memref<3x3x128x128xf32, #tpu.memory_space<vmem>>, %arg5: memref<1x128xf32, #tpu.memory_space<vmem>>, %arg6: memref<1x384x128xf32, #tpu.memory_space<vmem>>, %arg7: memref<456x128xf32, #tpu.memory_space<vmem>>) attributes {dimension_semantics = [#tpu.dimension_semantics<parallel>], iteration_bounds = array<i64: 2>, scalar_prefetch = 0 : i64, scratch_operands = 1 : i64, tpu.core_type = #tpu.core_type<tc>, window_params = [{transform_indices = @transform_0, window_bounds = array<i64: 1, 432, 128>}, {pipeline_mode = #tpu.pipeline_mode<synchronous>, transform_indices = @transform_1, window_bounds = array<i64: 3, 128, 128>}, {pipeline_mode = #tpu.pipeline_mode<synchronous>, transform_indices = @transform_2, window_bounds = array<i64: 1, 128>}, {pipeline_mode = #tpu.pipeline_mode<synchronous>, transform_indices = @transform_3, window_bounds = array<i64: 3, 3, 128, 128>}, {pipeline_mode = #tpu.pipeline_mode<synchronous>, transform_indices = @transform_4, window_bounds = array<i64: 1, 128>}, {transform_indices = @transform_5, window_bounds = array<i64: 1, 384, 128>}]} {
    %cst = arith.constant 0.000000e+00 : f32
    %0 = vector.broadcast %cst : f32 to vector<384x128xf32>
    %c0 = arith.constant 0 : index
    %c0_0 = arith.constant 0 : index
    %c0_1 = arith.constant 0 : index
    %1 = vector.load %arg1[%c0, %c0_0, %c0_1] : memref<1x432x128xf32, #tpu.memory_space<vmem>>, vector<1x384x128xf32>
    %2 = vector.shape_cast %1 : vector<1x384x128xf32> to vector<384x128xf32>
    %c0_2 = arith.constant 0 : index
    %c0_3 = arith.constant 0 : index
    %c0_4 = arith.constant 0 : index
    %3 = vector.load %arg2[%c0_2, %c0_3, %c0_4] : memref<3x128x128xf32, #tpu.memory_space<vmem>>, vector<1x128x128xf32>
    %4 = vector.shape_cast %3 : vector<1x128x128xf32> to vector<128x128xf32>
    %cst_5 = arith.constant dense<0.000000e+00> : vector<384x128xf32>
    %5 = tpu.matmul %2, %4, %cst_5 {dimension_numbers = #tpu.dot_dimension_numbers<[1], [0], [0], [1], [0, 0, 1, 1], [], []>} : vector<384x128xf32>, vector<128x128xf32>, vector<384x128xf32> -> vector<384x128xf32>
    %6 = arith.addf %0, %5 : vector<384x128xf32>
    %c0_6 = arith.constant 0 : index
    %c24 = arith.constant 24 : index
    %c0_7 = arith.constant 0 : index
    %7 = vector.load %arg1[%c0_6, %c24, %c0_7] : memref<1x432x128xf32, #tpu.memory_space<vmem>>, vector<1x384x128xf32>
    %8 = vector.shape_cast %7 : vector<1x384x128xf32> to vector<384x128xf32>
    %c1 = arith.constant 1 : index
    %c0_8 = arith.constant 0 : index
    %c0_9 = arith.constant 0 : index
    %9 = vector.load %arg2[%c1, %c0_8, %c0_9] : memref<3x128x128xf32, #tpu.memory_space<vmem>>, vector<1x128x128xf32>
    %10 = vector.shape_cast %9 : vector<1x128x128xf32> to vector<128x128xf32>
    %cst_10 = arith.constant dense<0.000000e+00> : vector<384x128xf32>
    %11 = tpu.matmul %8, %10, %cst_10 {dimension_numbers = #tpu.dot_dimension_numbers<[1], [0], [0], [1], [0, 0, 1, 1], [], []>} : vector<384x128xf32>, vector<128x128xf32>, vector<384x128xf32> -> vector<384x128xf32>
    %12 = arith.addf %6, %11 : vector<384x128xf32>
    %c0_11 = arith.constant 0 : index
    %c48 = arith.constant 48 : index
    %c0_12 = arith.constant 0 : index
    %13 = vector.load %arg1[%c0_11, %c48, %c0_12] : memref<1x432x128xf32, #tpu.memory_space<vmem>>, vector<1x384x128xf32>
    %14 = vector.shape_cast %13 : vector<1x384x128xf32> to vector<384x128xf32>
    %c2 = arith.constant 2 : index
    %c0_13 = arith.constant 0 : index
    %c0_14 = arith.constant 0 : index
    %15 = vector.load %arg2[%c2, %c0_13, %c0_14] : memref<3x128x128xf32, #tpu.memory_space<vmem>>, vector<1x128x128xf32>
    %16 = vector.shape_cast %15 : vector<1x128x128xf32> to vector<128x128xf32>
    %cst_15 = arith.constant dense<0.000000e+00> : vector<384x128xf32>
    %17 = tpu.matmul %14, %16, %cst_15 {dimension_numbers = #tpu.dot_dimension_numbers<[1], [0], [0], [1], [0, 0, 1, 1], [], []>} : vector<384x128xf32>, vector<128x128xf32>, vector<384x128xf32> -> vector<384x128xf32>
    %18 = arith.addf %12, %17 : vector<384x128xf32>
    %c0_16 = arith.constant 0 : index
    %c0_17 = arith.constant 0 : index
    %19 = vector.load %arg3[%c0_16, %c0_17] : memref<1x128xf32, #tpu.memory_space<vmem>>, vector<1x128xf32>
    %20 = vector.broadcast %19 : vector<1x128xf32> to vector<384x128xf32>
    %21 = arith.addf %18, %20 : vector<384x128xf32>
    %cst_18 = arith.constant 0.000000e+00 : f32
    %22 = vector.broadcast %cst_18 : f32 to vector<384x128xf32>
    %23 = arith.maximumf %21, %22 : vector<384x128xf32>
    %cst_19 = arith.constant 0.000000e+00 : f32
    %24 = vector.broadcast %cst_19 : f32 to vector<25x128xf32>
    %c0_20 = arith.constant 0 : index
    %c0_21 = arith.constant 0 : index
    %25 = vector.load %arg7[%c0_20, %c0_21] : memref<456x128xf32, #tpu.memory_space<vmem>>, vector<25x128xf32>
    tpu.vector_store %arg7[%c0_20, %c0_21], %24 {strides = array<i32>} : memref<456x128xf32, #tpu.memory_space<vmem>>, vector<25x128xf32>,
    %cst_22 = arith.constant 0.000000e+00 : f32
    %26 = vector.broadcast %cst_22 : f32 to vector<47x128xf32>
    %c409 = arith.constant 409 : index
    %c0_23 = arith.constant 0 : index
    %27 = vector.load %arg7[%c409, %c0_23] : memref<456x128xf32, #tpu.memory_space<vmem>>, vector<47x128xf32>
    tpu.vector_store %arg7[%c409, %c0_23], %26 {strides = array<i32>} : memref<456x128xf32, #tpu.memory_space<vmem>>, vector<47x128xf32>,
    %28 = tpu.iota {dimensions = array<i32: 0>} : vector<384x1xi32>
    %c24_i32 = arith.constant 24 : i32
    %c0_i32 = arith.constant 0 : i32
    %29 = arith.cmpi eq, %c24_i32, %c0_i32 : i32
    %c1_i32 = arith.constant 1 : i32
    %30 = arith.select %29, %c1_i32, %c24_i32 : i32
    %31 = vector.broadcast %30 : i32 to vector<384x1xi32>
    %32 = arith.remsi %28, %31 : vector<384x1xi32>
    %c0_i32_24 = arith.constant 0 : i32
    %33 = vector.broadcast %c0_i32_24 : i32 to vector<384x1xi32>
    %34 = arith.cmpi ne, %32, %33 : vector<384x1xi32>
    %c0_i32_25 = arith.constant 0 : i32
    %35 = vector.broadcast %c0_i32_25 : i32 to vector<384x1xi32>
    %36 = arith.cmpi slt, %32, %35 : vector<384x1xi32>
    %c0_i32_26 = arith.constant 0 : i32
    %37 = arith.cmpi slt, %30, %c0_i32_26 : i32
    %38 = vector.broadcast %37 : i1 to vector<384x1xi1>
    %39 = vector.broadcast %38 : vector<384x1xi1> to vector<384x1xi1>
    %40 = arith.xori %36, %39 : vector<384x1xi1>
    %41 = arith.andi %40, %34 : vector<384x1xi1>
    %42 = vector.broadcast %30 : i32 to vector<384x1xi32>
    %43 = arith.addi %32, %42 : vector<384x1xi32>
    %44 = arith.select %41, %43, %32 : vector<384x1xi1>, vector<384x1xi32>
    %c16_i32 = arith.constant 16 : i32
    %45 = vector.broadcast %c16_i32 : i32 to vector<384x1xi32>
    %46 = arith.cmpi slt, %44, %45 : vector<384x1xi32>
    %cst_27 = arith.constant 0.000000e+00 : f32
    %47 = vector.shape_cast %46 : vector<384x1xi1> to vector<384x1xi1>
    %48 = vector.broadcast %47 : vector<384x1xi1> to vector<384x128xi1>
    %49 = vector.broadcast %cst_27 : f32 to vector<384x128xf32>
    %50 = arith.select %48, %23, %49 : vector<384x128xi1>, vector<384x128xf32>
    %c25 = arith.constant 25 : index
    %c0_28 = arith.constant 0 : index
    %51 = vector.load %arg7[%c25, %c0_28] : memref<456x128xf32, #tpu.memory_space<vmem>>, vector<384x128xf32>
    tpu.vector_store %arg7[%c25, %c0_28], %50 {strides = array<i32>} : memref<456x128xf32, #tpu.memory_space<vmem>>, vector<384x128xf32>,
    %cst_29 = arith.constant 0.000000e+00 : f32
    %52 = vector.broadcast %cst_29 : f32 to vector<384x128xf32>
    %c0_30 = arith.constant 0 : index
    %c0_31 = arith.constant 0 : index
    %53 = vector.load %arg7[%c0_30, %c0_31] : memref<456x128xf32, #tpu.memory_space<vmem>>, vector<384x128xf32>
    %c0_32 = arith.constant 0 : index
    %c0_33 = arith.constant 0 : index
    %c0_34 = arith.constant 0 : index
    %c0_35 = arith.constant 0 : index
    %54 = vector.load %arg4[%c0_32, %c0_33, %c0_34, %c0_35] : memref<3x3x128x128xf32, #tpu.memory_space<vmem>>, vector<1x1x128x128xf32>
    %55 = vector.shape_cast %54 : vector<1x1x128x128xf32> to vector<128x128xf32>
    %cst_36 = arith.constant dense<0.000000e+00> : vector<384x128xf32>
    %56 = tpu.matmul %53, %55, %cst_36 {dimension_numbers = #tpu.dot_dimension_numbers<[1], [0], [0], [1], [0, 0, 1, 1], [], []>} : vector<384x128xf32>, vector<128x128xf32>, vector<384x128xf32> -> vector<384x128xf32>
    %57 = arith.addf %52, %56 : vector<384x128xf32>
    %c1_37 = arith.constant 1 : index
    %c0_38 = arith.constant 0 : index
    %58 = vector.load %arg7[%c1_37, %c0_38] : memref<456x128xf32, #tpu.memory_space<vmem>>, vector<384x128xf32>
    %c0_39 = arith.constant 0 : index
    %c1_40 = arith.constant 1 : index
    %c0_41 = arith.constant 0 : index
    %c0_42 = arith.constant 0 : index
    %59 = vector.load %arg4[%c0_39, %c1_40, %c0_41, %c0_42] : memref<3x3x128x128xf32, #tpu.memory_space<vmem>>, vector<1x1x128x128xf32>
    %60 = vector.shape_cast %59 : vector<1x1x128x128xf32> to vector<128x128xf32>
    %cst_43 = arith.constant dense<0.000000e+00> : vector<384x128xf32>
    %61 = tpu.matmul %58, %60, %cst_43 {dimension_numbers = #tpu.dot_dimension_numbers<[1], [0], [0], [1], [0, 0, 1, 1], [], []>} : vector<384x128xf32>, vector<128x128xf32>, vector<384x128xf32> -> vector<384x128xf32>
    %62 = arith.addf %57, %61 : vector<384x128xf32>
    %c2_44 = arith.constant 2 : index
    %c0_45 = arith.constant 0 : index
    %63 = vector.load %arg7[%c2_44, %c0_45] : memref<456x128xf32, #tpu.memory_space<vmem>>, vector<384x128xf32>
    %c0_46 = arith.constant 0 : index
    %c2_47 = arith.constant 2 : index
    %c0_48 = arith.constant 0 : index
    %c0_49 = arith.constant 0 : index
    %64 = vector.load %arg4[%c0_46, %c2_47, %c0_48, %c0_49] : memref<3x3x128x128xf32, #tpu.memory_space<vmem>>, vector<1x1x128x128xf32>
    %65 = vector.shape_cast %64 : vector<1x1x128x128xf32> to vector<128x128xf32>
    %cst_50 = arith.constant dense<0.000000e+00> : vector<384x128xf32>
    %66 = tpu.matmul %63, %65, %cst_50 {dimension_numbers = #tpu.dot_dimension_numbers<[1], [0], [0], [1], [0, 0, 1, 1], [], []>} : vector<384x128xf32>, vector<128x128xf32>, vector<384x128xf32> -> vector<384x128xf32>
    %67 = arith.addf %62, %66 : vector<384x128xf32>
    %c24_51 = arith.constant 24 : index
    %c0_52 = arith.constant 0 : index
    %68 = vector.load %arg7[%c24_51, %c0_52] : memref<456x128xf32, #tpu.memory_space<vmem>>, vector<384x128xf32>
    %c1_53 = arith.constant 1 : index
    %c0_54 = arith.constant 0 : index
    %c0_55 = arith.constant 0 : index
    %c0_56 = arith.constant 0 : index
    %69 = vector.load %arg4[%c1_53, %c0_54, %c0_55, %c0_56] : memref<3x3x128x128xf32, #tpu.memory_space<vmem>>, vector<1x1x128x128xf32>
    %70 = vector.shape_cast %69 : vector<1x1x128x128xf32> to vector<128x128xf32>
    %cst_57 = arith.constant dense<0.000000e+00> : vector<384x128xf32>
    %71 = tpu.matmul %68, %70, %cst_57 {dimension_numbers = #tpu.dot_dimension_numbers<[1], [0], [0], [1], [0, 0, 1, 1], [], []>} : vector<384x128xf32>, vector<128x128xf32>, vector<384x128xf32> -> vector<384x128xf32>
    %72 = arith.addf %67, %71 : vector<384x128xf32>
    %c25_58 = arith.constant 25 : index
    %c0_59 = arith.constant 0 : index
    %73 = vector.load %arg7[%c25_58, %c0_59] : memref<456x128xf32, #tpu.memory_space<vmem>>, vector<384x128xf32>
    %c1_60 = arith.constant 1 : index
    %c1_61 = arith.constant 1 : index
    %c0_62 = arith.constant 0 : index
    %c0_63 = arith.constant 0 : index
    %74 = vector.load %arg4[%c1_60, %c1_61, %c0_62, %c0_63] : memref<3x3x128x128xf32, #tpu.memory_space<vmem>>, vector<1x1x128x128xf32>
    %75 = vector.shape_cast %74 : vector<1x1x128x128xf32> to vector<128x128xf32>
    %cst_64 = arith.constant dense<0.000000e+00> : vector<384x128xf32>
    %76 = tpu.matmul %73, %75, %cst_64 {dimension_numbers = #tpu.dot_dimension_numbers<[1], [0], [0], [1], [0, 0, 1, 1], [], []>} : vector<384x128xf32>, vector<128x128xf32>, vector<384x128xf32> -> vector<384x128xf32>
    %77 = arith.addf %72, %76 : vector<384x128xf32>
    %c26 = arith.constant 26 : index
    %c0_65 = arith.constant 0 : index
    %78 = vector.load %arg7[%c26, %c0_65] : memref<456x128xf32, #tpu.memory_space<vmem>>, vector<384x128xf32>
    %c1_66 = arith.constant 1 : index
    %c2_67 = arith.constant 2 : index
    %c0_68 = arith.constant 0 : index
    %c0_69 = arith.constant 0 : index
    %79 = vector.load %arg4[%c1_66, %c2_67, %c0_68, %c0_69] : memref<3x3x128x128xf32, #tpu.memory_space<vmem>>, vector<1x1x128x128xf32>
    %80 = vector.shape_cast %79 : vector<1x1x128x128xf32> to vector<128x128xf32>
    %cst_70 = arith.constant dense<0.000000e+00> : vector<384x128xf32>
    %81 = tpu.matmul %78, %80, %cst_70 {dimension_numbers = #tpu.dot_dimension_numbers<[1], [0], [0], [1], [0, 0, 1, 1], [], []>} : vector<384x128xf32>, vector<128x128xf32>, vector<384x128xf32> -> vector<384x128xf32>
    %82 = arith.addf %77, %81 : vector<384x128xf32>
    %c48_71 = arith.constant 48 : index
    %c0_72 = arith.constant 0 : index
    %83 = vector.load %arg7[%c48_71, %c0_72] : memref<456x128xf32, #tpu.memory_space<vmem>>, vector<384x128xf32>
    %c2_73 = arith.constant 2 : index
    %c0_74 = arith.constant 0 : index
    %c0_75 = arith.constant 0 : index
    %c0_76 = arith.constant 0 : index
    %84 = vector.load %arg4[%c2_73, %c0_74, %c0_75, %c0_76] : memref<3x3x128x128xf32, #tpu.memory_space<vmem>>, vector<1x1x128x128xf32>
    %85 = vector.shape_cast %84 : vector<1x1x128x128xf32> to vector<128x128xf32>
    %cst_77 = arith.constant dense<0.000000e+00> : vector<384x128xf32>
    %86 = tpu.matmul %83, %85, %cst_77 {dimension_numbers = #tpu.dot_dimension_numbers<[1], [0], [0], [1], [0, 0, 1, 1], [], []>} : vector<384x128xf32>, vector<128x128xf32>, vector<384x128xf32> -> vector<384x128xf32>
    %87 = arith.addf %82, %86 : vector<384x128xf32>
    %c49 = arith.constant 49 : index
    %c0_78 = arith.constant 0 : index
    %88 = vector.load %arg7[%c49, %c0_78] : memref<456x128xf32, #tpu.memory_space<vmem>>, vector<384x128xf32>
    %c2_79 = arith.constant 2 : index
    %c1_80 = arith.constant 1 : index
    %c0_81 = arith.constant 0 : index
    %c0_82 = arith.constant 0 : index
    %89 = vector.load %arg4[%c2_79, %c1_80, %c0_81, %c0_82] : memref<3x3x128x128xf32, #tpu.memory_space<vmem>>, vector<1x1x128x128xf32>
    %90 = vector.shape_cast %89 : vector<1x1x128x128xf32> to vector<128x128xf32>
    %cst_83 = arith.constant dense<0.000000e+00> : vector<384x128xf32>
    %91 = tpu.matmul %88, %90, %cst_83 {dimension_numbers = #tpu.dot_dimension_numbers<[1], [0], [0], [1], [0, 0, 1, 1], [], []>} : vector<384x128xf32>, vector<128x128xf32>, vector<384x128xf32> -> vector<384x128xf32>
    %92 = arith.addf %87, %91 : vector<384x128xf32>
    %c50 = arith.constant 50 : index
    %c0_84 = arith.constant 0 : index
    %93 = vector.load %arg7[%c50, %c0_84] : memref<456x128xf32, #tpu.memory_space<vmem>>, vector<384x128xf32>
    %c2_85 = arith.constant 2 : index
    %c2_86 = arith.constant 2 : index
    %c0_87 = arith.constant 0 : index
    %c0_88 = arith.constant 0 : index
    %94 = vector.load %arg4[%c2_85, %c2_86, %c0_87, %c0_88] : memref<3x3x128x128xf32, #tpu.memory_space<vmem>>, vector<1x1x128x128xf32>
    %95 = vector.shape_cast %94 : vector<1x1x128x128xf32> to vector<128x128xf32>
    %cst_89 = arith.constant dense<0.000000e+00> : vector<384x128xf32>
    %96 = tpu.matmul %93, %95, %cst_89 {dimension_numbers = #tpu.dot_dimension_numbers<[1], [0], [0], [1], [0, 0, 1, 1], [], []>} : vector<384x128xf32>, vector<128x128xf32>, vector<384x128xf32> -> vector<384x128xf32>
    %97 = arith.addf %92, %96 : vector<384x128xf32>
    %c0_90 = arith.constant 0 : index
    %c0_91 = arith.constant 0 : index
    %98 = vector.load %arg5[%c0_90, %c0_91] : memref<1x128xf32, #tpu.memory_space<vmem>>, vector<1x128xf32>
    %99 = vector.broadcast %98 : vector<1x128xf32> to vector<384x128xf32>
    %100 = arith.addf %97, %99 : vector<384x128xf32>
    %c0_92 = arith.constant 0 : index
    %c24_93 = arith.constant 24 : index
    %c0_94 = arith.constant 0 : index
    %101 = vector.load %arg1[%c0_92, %c24_93, %c0_94] : memref<1x432x128xf32, #tpu.memory_space<vmem>>, vector<1x384x128xf32>
    %102 = vector.shape_cast %101 : vector<1x384x128xf32> to vector<384x128xf32>
    %cst_95 = arith.constant 1.000000e+00 : f32
    %103 = vector.broadcast %cst_95 : f32 to vector<384x128xf32>
    %104 = arith.mulf %103, %100 : vector<384x128xf32>
    %105 = arith.addf %102, %104 : vector<384x128xf32>
    %c0_96 = arith.constant 0 : index
    %c0_97 = arith.constant 0 : index
    %c0_98 = arith.constant 0 : index
    %106 = vector.load %arg6[%c0_96, %c0_97, %c0_98] : memref<1x384x128xf32, #tpu.memory_space<vmem>>, vector<1x384x128xf32>
    %107 = vector.shape_cast %106 : vector<1x384x128xf32> to vector<384x128xf32>
    %108 = vector.shape_cast %105 : vector<384x128xf32> to vector<1x384x128xf32>
    tpu.vector_store %arg6[%c0_96, %c0_97, %c0_98], %108 {strides = array<i32>} : memref<1x384x128xf32, #tpu.memory_space<vmem>>, vector<1x384x128xf32>,
    return
  }
  func.func @transform_0(%arg0: i32) -> (i32, i32, i32) {
    %c0_i32 = arith.constant 0 : i32
    %c0_i32_0 = arith.constant 0 : i32
    %c0_i32_1 = arith.constant 0 : i32
    return %arg0, %c0_i32, %c0_i32_0 : i32, i32, i32
  }
  func.func @transform_1(%arg0: i32) -> (i32, i32, i32) {
    %c0_i32 = arith.constant 0 : i32
    %c0_i32_0 = arith.constant 0 : i32
    %c0_i32_1 = arith.constant 0 : i32
    %c0_i32_2 = arith.constant 0 : i32
    return %c0_i32, %c0_i32_0, %c0_i32_1 : i32, i32, i32
  }
  func.func @transform_2(%arg0: i32) -> (i32, i32) {
    %c0_i32 = arith.constant 0 : i32
    %c0_i32_0 = arith.constant 0 : i32
    %c0_i32_1 = arith.constant 0 : i32
    return %c0_i32, %c0_i32_0 : i32, i32
  }
  func.func @transform_3(%arg0: i32) -> (i32, i32, i32, i32) {
    %c0_i32 = arith.constant 0 : i32
    %c0_i32_0 = arith.constant 0 : i32
    %c0_i32_1 = arith.constant 0 : i32
    %c0_i32_2 = arith.constant 0 : i32
    %c0_i32_3 = arith.constant 0 : i32
    return %c0_i32, %c0_i32_0, %c0_i32_1, %c0_i32_2 : i32, i32, i32, i32
  }
  func.func @transform_4(%arg0: i32) -> (i32, i32) {
    %c0_i32 = arith.constant 0 : i32
    %c0_i32_0 = arith.constant 0 : i32
    %c0_i32_1 = arith.constant 0 : i32
    return %c0_i32, %c0_i32_0 : i32, i32
  }
  func.func @transform_5(%arg0: i32) -> (i32, i32, i32) {
    %c0_i32 = arith.constant 0 : i32
    %c0_i32_0 = arith.constant 0 : i32
    %c0_i32_1 = arith.constant 0 : i32
    return %arg0, %c0_i32, %c0_i32_0 : i32, i32, i32
  }
}

</mosaic_0001>

<bundles_post_ra>
// kernel: tpu_custom_call.1
= control target key start
LH: loop header
LB: loop body
LE: loop exit
PB: predicated region body
PF: predicated region fallthrough
CT: control target
= control target key end

     0   :  { %10 = vsyncpa [#allocation4], 0  ;;  %s13073_s0 = inlined_call_operand.hbm [shape: f32[2,432,128], index: 0, kind: input, shape index: {}]   ;;  %s13074_s1 = inlined_call_operand.hbm [shape: f32[3,128,128], index: 1, kind: input, shape index: {}]   ;;  %s13075_s2 = inlined_call_operand.vmem [shape: f32[1,128], index: 2, kind: input, shape index: {}]   ;;  %s13076_s3 = inlined_call_operand.hbm [shape: f32[3,3,128,128], index: 3, kind: input, shape index: {}]   ;;  %s13077_s4 = inlined_call_operand.vmem [shape: f32[1,128], index: 4, kind: input, shape index: {}]   ;;  %s13078_s5 = inlined_call_operand.hbm [shape: f32[2,384,128], index: 5, kind: output, shape index: {}]  }
   0x1   :  { %12 = vsyncpa [#allocation4 + $0x1], 0 }
   0x2   :  { %13 = vsyncpa [#allocation7], 0 }
   0x3   :  { %14 = vsyncpa [#allocation5], 0 }
   0x4   :  { %16 = vsyncpa [#allocation5 + $0x1], 0  ;;  %s9847_s18 = smov 0   ;;  %s9849_s19 = smov 0  }
   0x5   :  { %s9851_s20 = smov 0   ;;  %s9853_s21 = smov 0  }
   0x6 LB: > { %s9868_s22 = sadd.s32 4294967295, %s9806_s21   ;;  %s6524_s23 = sadd.s32 4294967294, %s9806_s21   ;;  %s9806_s21 = sphi %s9853_s21, %s13637_s21   ;;  %s9802_s20 = sphi %s9851_s20, %s13636_s20   ;;  %s9798_s19 = sphi %s9849_s19, %s13635_s19   ;;  %s9794_s18 = sphi %s9847_s18, %s13634_s18  }
   0x7   : > { %p42_p0 = scmp.ne.s32.totalorder %s9798_s19, %s9794_s18  ;;  %p13079_p1 = scmp.eq.s32.totalorder %s9868_s22, 0 }
   0x8   : > { %p156_p3 = scmp.eq.s32.totalorder %s6524_s23, 1  ;;  %p6525_p5 = scmp.ge.s32.totalorder %s9806_s21, 1 }
   0x9   : > { %p9877_p4 = por %p13079_p1, %p42_p0  ;;  %p163_p7 = scmp.lt.s32.totalorder %s9806_s21, 3 }
   0xa   : > { %p9882_p6 = por %p156_p3, %p42_p0  ;;  %s9808_s27 = smov [#allocation6]  }
   0xb   : > { %s13163_s24 = scalar_select %p9877_p4, 1, 0 }
   0xc   : > { %s13164_s25 = scalar_select %p9882_p6, 1, 0 }
   0xd   : > { %p9887_p8 = pnand %p6525_p5, %p163_p7  ;;  %s175_s28 = sshll.u32 %s9808_s27, 4  ;;  %s9891_s28 = int_to_ptr.vmem [resolvable:$true] %s175_s28 }
   0xe   : > { %s9809_s30 = smov [#allocation8]   ;;  %s9650_s9 = scalar_lea.hbm %s13074_s1, 6144 }
   0xf   : > { %p9531_p9 = pneg %p9887_p8  ;;  %s191_s6 = sshll.u32 %s9809_s30, 4  ;;  %s9902_s6 = int_to_ptr.vmem [resolvable:$true] %s191_s6 }
  0x10   : > { %p9651_p12 = scmp.ne.s32.totalorder %s13074_s1, %s9650_s9  ;;  %p9657_p5 = scmp.lt.u32.totalorder %s9650_s9, %s13074_s1 }
  0x11   : > { %p9898_p11 = pnand %p9531_p9, %p13079_p1 }
  0x13   : > { %p9652_p13 = pneg %p9898_p11 }
  0x15   : > { %p9653_p0 = pnand %p9652_p13, %p9651_p12 }
  0x17   : > { %p9654_p3 = pneg %p9653_p0 }
  0x19   : > { %p9659_p7 = pnand %p9657_p5, %p9654_p3 }
  0x1b   : > { %9662 = shalt.err (!%p9659_p7)
}
  0x1c   : > { %s9663_s14 = scalar_lea.vmem %s9891_s28, 6144  ;;  %p9671_p2 = scmp.lt.s32.totalorder %s9891_s28, %s9891_s28 }
  0x1d   : > { %p9664_p9 = scmp.ne.s32.totalorder %s9891_s28, %s9663_s14  ;;  %p9672_p12 = scmp.lt.s32.totalorder %s9663_s14, %s9663_s14 }
  0x1f   : > { %p9666_p10 = pnand %p9664_p9, %p9652_p13  ;;  %p9673_p0 = por %p9672_p12, %p9671_p2 }
  0x21   : > { %p9667_p1 = pneg %p9666_p10 }
  0x23   : > { %p9674_p6 = pnand %p9673_p0, %p9667_p1 }
  0x25   : > { %9677 = shalt.err (!%p9674_p6)
}
  0x26   : > { %s13080_s15 = smov 128   ;;  %s9811_s16 = smov 8  }
  0x27   : > { %9534 = dma.hbm_to_vmem [thread:$0]  (!%p9898_p11), %s13074_s1, 6144, %s9891_s28, [#allocation7], %s13080_s15, %s13080_s15, %s9811_s16  }
  0x28   : > { %s9678_s7 = scalar_lea.hbm %s13076_s3, 18432 }
  0x29   : > { %p9679_p1 = scmp.ne.s32.totalorder %s13076_s3, %s9678_s7  ;;  %p9685_p10 = scmp.lt.u32.totalorder %s9678_s7, %s13076_s3 }
  0x2b   : > { %p9681_p2 = pnand %p9679_p1, %p9652_p13 }
  0x2d   : > { %p9682_p6 = pneg %p9681_p2 }
  0x2f   : > { %p9687_p3 = pnand %p9685_p10, %p9682_p6 }
  0x31   : > { %9690 = shalt.err (!%p9687_p3)
}
  0x32   : > { %s9691_s28 = scalar_lea.vmem %s9902_s6, 18432  ;;  %p9699_p12 = scmp.lt.s32.totalorder %s9902_s6, %s9902_s6 }
  0x33   : > { %p9692_p5 = scmp.ne.s32.totalorder %s9902_s6, %s9691_s28  ;;  %p9700_p0 = scmp.lt.s32.totalorder %s9691_s28, %s9691_s28 }
  0x35   : > { %p9694_p7 = pnand %p9692_p5, %p9652_p13  ;;  %p9701_p1 = por %p9700_p0, %p9699_p12 }
  0x37   : > { %p9695_p9 = pneg %p9694_p7 }
  0x39   : > { %p9702_p2 = pnand %p9701_p1, %p9695_p9 }
  0x3b   : > { %9705 = shalt.err (!%p9702_p2)
}
  0x3c   : > { %9537 = dma.hbm_to_vmem [thread:$0]  (!%p9898_p11), %s13076_s3, 18432, %s9902_s6, [#allocation7], %s13080_s15, %s13080_s15, %s9811_s16  }
  0x3d   : > { %s9963_s29 = sadd.s32 1, %s9806_s21   ;;  %s29_s14 = sadd.s32 1, %s9802_s20 }
  0x3e   : > { %s26_s17 = ssub.s32 %s9806_s21, %s9963_s29  ;;  %p36_p13 = scmp.ne.s32.totalorder %s9802_s20, %s9798_s19 }
  0x3f   : > { %p27_p6 = scmp.eq.s32.totalorder %s26_s17, 0  ;;  %p37_p10 = scmp.eq.s32.totalorder %s9806_s21, 0 }
  0x40   : > { %p13167_p3 = scmp.eq.s32.totalorder %s9868_s22, 1  ;;  %p9548_p7 = scmp.lt.s32.totalorder %s9806_s21, 2 }
  0x41   : > { %s9979_s27 = scalar_select %p27_p6, %s9802_s20, %s29_s14  }
  0x42   : > { %p9973_p5 = por %p13167_p3, %p36_p13  ;;  %p38_p9 = por %p37_p10, %p36_p13 }
  0x43   : > { %s208_s30 = sand.u32 1, %s9802_s20   ;;  %s9419_s6 = smul.u32 6912, %s9806_s21 }
  0x44   : > { %s13168_s23 = scalar_select %p9973_p5, 1, 0 }
  0x45   : > { %s9418_s7 = smul.u32 432, %s208_s30  ;;  %p9983_p11 = pnand %p9548_p7, %p38_p9 }
  0x46   : > { %s9990_s11 = scalar_lea.hbm %s13073_s0, %s9419_s6  ;;  %s9994_s13 = scalar_lea.sflag [#allocation4], %s208_s30 }
  0x47   : > { %s212_s28 = scalar_lea.vmem [#allocation3], %s9418_s7  ;;  %s9706_s14 = scalar_lea.hbm %s9990_s11, 6912 }
  0x48   : > { %s219_s12 = sshll.u32 %s212_s28, 4  ;;  %p9707_p12 = scmp.ne.s32.totalorder %s9990_s11, %s9706_s14  ;;  %s9992_s12 = int_to_ptr.vmem [resolvable:$true] %s219_s12 }
  0x49   : > { %p9708_p0 = pneg %p9983_p11  ;;  %s9711_s9 = scalar_lea.hbm %s13073_s0, 13824 }
  0x4a   : > { %p9712_p13 = scmp.lt.u32.totalorder %s9990_s11, %s13073_s0  ;;  %p9713_p6 = scmp.lt.u32.totalorder %s9711_s9, %s9706_s14 }
  0x4b   : > { %p9709_p1 = pnand %p9708_p0, %p9707_p12  ;;  %p9715_p3 = scmp.lt.u32.totalorder %s9706_s14, %s9990_s11 }
  0x4c   : > { %p9714_p10 = por %p9713_p6, %p9712_p13 }
  0x4d   : > { %p9710_p2 = pneg %p9709_p1 }
  0x4e   : > { %p9716_p7 = por %p9715_p3, %p9714_p10 }
  0x50   : > { %p9717_p9 = pnand %p9716_p7, %p9710_p2 }
  0x52   : > { %9720 = shalt.err (!%p9717_p9)
}
  0x53   : > { %s9721_s30 = scalar_lea.vmem %s9992_s12, 6912  ;;  %s9812_s7 = smov [#allocation3]  }
  0x54   : > { %p9722_p12 = scmp.ne.s32.totalorder %s9992_s12, %s9721_s30  ;;  %s9726_s28 = sshll.u32 %s9812_s7, 4  ;;  %s9727_s28 = int_to_ptr.vmem [resolvable:$false] %s9726_s28 }
  0x55   : > { %s9728_s15 = scalar_lea.vmem %s9727_s28, 13824  ;;  %p9729_p4 = scmp.lt.s32.totalorder %s9992_s12, %s9727_s28 }
  0x56   : > { %p9724_p1 = pnand %p9722_p12, %p9708_p0  ;;  %p9730_p13 = scmp.lt.s32.totalorder %s9728_s15, %s9721_s30 }
  0x58   : > { %p9725_p5 = pneg %p9724_p1  ;;  %p9731_p6 = por %p9730_p13, %p9729_p4 }
  0x5a   : > { %p9732_p10 = pnand %p9731_p6, %p9725_p5 }
  0x5c   : > { %9735 = shalt.err (!%p9732_p10)
}
  0x5d   : > { %s13170_s14 = smov 128   ;;  %231 = sbr.rel (%p9887_p8) target bundleno = 1388 (0x56c), region = 40 }
  0x5e   : > { %9541 = dma.hbm_to_vmem [thread:$0]  (!%p9983_p11), %s9990_s11, 6912, %s9992_s12, %s9994_s13, %s13170_s14, %s13170_s14, %s9811_s16  }
  0x64   : > { %s10028_s17 = sand.u32 1, %s9798_s19   ;;  %p13171_p4 = scmp.ne.s32.totalorder %s13163_s24, 0 }
  0x65   : > { %s9420_s6 = smul.u32 432, %s10028_s17  ;;  %s234_s9 = scalar_lea.sflag [#allocation4], %s10028_s17 }
  0x67   : > { %s10032_s10 = scalar_lea.vmem [#allocation3], %s9420_s6 }
  0x68   : > { %9781 = dma.done.wait (%p13171_p4), %s234_s9, 6912  }
  0x69   : > { %9783 = vsyncadd (%p13171_p4), %s234_s9, 4294960384  ;;  %p13172_p5 = scmp.eq.s32.totalorder %s9868_s22, 0 }
  0x6b   : > { %9785 = dma.done.wait (%p13172_p5), [#allocation7], 24576   ;;  %p13173_p8 = pmov %p13172_p5 }
  0x6c   : > { %v340_v0 = vld [vmem:[#allocation6 + $0x80] sm:$0xff]  ;;  %v341_v1 = vld [vmem:[#allocation6 + $0x88] sm:$0xff]  ;;  %v342_v2 = vld [vmem:[#allocation6 + $0x90] sm:$0xff]  ;;  %s9421_s11 = smul.u32 384, %s10028_s17  ;;  %p13631_p0 = scmp.ne.s32.totalorder %s13168_s23, 0 }
  0x6d   : > { %9787 = vsyncadd (%p13173_p8), [#allocation7], 4294942720  ;;  %v8554_v3 = vpack.c.bf16 %v341_v1, %v340_v0  ;;  %v343_v4 = vld [vmem:[#allocation6 + $0x98] sm:$0xff]  ;;  %v344_v6 = vld [vmem:[#allocation6 + $0xa0] sm:$0xff]  ;;  %s9518_s7 = smul.u32 6144, %s9868_s22  ;;  %s6419_s22 = scalar_lea.sflag [#allocation5], %s10028_s17 }
  0x6e   : > { %v8558_v5 = vpack.c.bf16 %v343_v4, %v342_v2  ;;  %v345_v7 = vld [vmem:[#allocation6 + $0xa8] sm:$0xff]  ;;  %v346_v10 = vld [vmem:[#allocation6 + $0xb0] sm:$0xff]  ;;  %v347_v11 = vld [vmem:[#allocation6 + $0xb8] sm:$0xff]  ;;  %s12837_s30 = scalar_lea.vmem [#allocation9], %s9421_s11 }
  0x6f   : > { %8555 = vmatprep.subr.bf16.mxu0 %v8554_v3  ;;  %v8562_v8 = vpack.c.bf16 %v345_v7, %v344_v6  ;;  %v10043_v9 = vld [vmem:[%s10032_s10 + $0x18] sm:$0xff]  ;;  %v8566_v12 = vpack.c.bf16 %v347_v11, %v346_v10  ;;  %v348_v13 = vld [vmem:[#allocation6 + $0xc0] sm:$0xff]  ;;  %v350_v16 = vld [vmem:[#allocation6 + $0xd0] sm:$0xff]  ;;  %s6432_s28 = sshll.u32 %s12837_s30, 4  ;;  %s13025_s6 = scalar_lea.hbm %s13078_s5, %s9518_s7  ;;  %s13027_s28 = int_to_ptr.vmem [resolvable:$true] %s6432_s28 }
  0x70   : > { %8557 = vmatpush3.bf16.msra.mxu0 %v8554_v3  ;;  %7338 = vmatprep.mubr.f32.mxu0 %v10043_v9  ;;  %v349_v14 = vld [vmem:[#allocation6 + $0xc8] sm:$0xff]  ;;  %v351_v17 = vld [vmem:[#allocation6 + $0xd8] sm:$0xff]  ;;  %v352_v19 = vld [vmem:[#allocation6 + $0xe0] sm:$0xff]  ;;  %s9736_s9 = scalar_lea.vmem %s13027_s28, 6144 }
  0x71   : > { %8559 = vmatprep.subr.bf16.mxu0 %v8558_v5  ;;  %v8570_v15 = vpack.c.bf16 %v349_v14, %v348_v13  ;;  %v8574_v18 = vpack.c.bf16 %v351_v17, %v350_v16  ;;  %v353_v20 = vld [vmem:[#allocation6 + $0xe8] sm:$0xff]  ;;  %v354_v22 = vld [vmem:[#allocation6 + $0xf0] sm:$0xff]  ;;  %v355_v23 = vld [vmem:[#allocation6 + $0xf8] sm:$0xff]  ;;  %p9737_p11 = scmp.ne.s32.totalorder %s13027_s28, %s9736_s9 }
  0x72   : > { %v8578_v21 = vpack.c.bf16 %v353_v20, %v352_v19  ;;  %v8582_v24 = vpack.c.bf16 %v355_v23, %v354_v22  ;;  %v320_v25 = vld [vmem:[#allocation6] sm:$0xff]  ;;  %v321_v26 = vld [vmem:[#allocation6 + $0x8] sm:$0xff]  ;;  %v322_v28 = vld [vmem:[#allocation6 + $0x10] sm:$0xff] }
  0x73   : > { %v8586_v27 = vpack.c.bf16 %v321_v26, %v320_v25  ;;  %v323_v29 = vld [vmem:[#allocation6 + $0x18] sm:$0xff]  ;;  %v10047_v30 = vld [vmem:[%s10032_s10 + $0x20] sm:$0xff]  ;;  %v325_v34 = vld [vmem:[#allocation6 + $0x28] sm:$0xff]  ;;  %p9738_p2 = pnand %p9737_p11, %p13631_p0 }
  0x74   : > { %8561 = vmatpush3.bf16.msra.mxu0 %v8558_v5  ;;  %v10050_v31 = vld [vmem:[%s10032_s10 + $0x28] sm:$0xff]  ;;  %v8590_v32 = vpack.c.bf16 %v323_v29, %v322_v28  ;;  %v324_v33 = vld [vmem:[#allocation6 + $0x20] sm:$0xff]  ;;  %v10058_v36 = vld [vmem:[%s10032_s10 + $0x38] sm:$0xff] }
  0x75   : > { %8563 = vmatprep.subr.bf16.mxu0 %v8562_v8  ;;  %v10055_v35 = vld [vmem:[%s10032_s10 + $0x30] sm:$0xff]  ;;  %v8594_v37 = vpack.c.bf16 %v325_v34, %v324_v33  ;;  %v327_v39 = vld [vmem:[#allocation6 + $0x38] sm:$0xff]  ;;  %v10063_v40 = vld [vmem:[%s10032_s10 + $0x40] sm:$0xff]  ;;  %p9739_p3 = pneg %p9738_p2 }
  0x76   : > { %v326_v38 = vld [vmem:[#allocation6 + $0x30] sm:$0xff]  ;;  %v10066_v41 = vld [vmem:[%s10032_s10 + $0x48] sm:$0xff]  ;;  %v328_v43 = vld [vmem:[#allocation6 + $0x40] sm:$0xff] }
  0x77   : > { %v8598_v42 = vpack.c.bf16 %v327_v39, %v326_v38  ;;  %v329_v44 = vld [vmem:[#allocation6 + $0x48] sm:$0xff]  ;;  %v10071_v45 = vld [vmem:[%s10032_s10 + $0x50] sm:$0xff]  ;;  %v331_v49 = vld [vmem:[#allocation6 + $0x58] sm:$0xff] }
  0x78   : > { %8565 = vmatpush3.bf16.msra.mxu0 %v8562_v8  ;;  %v10074_v46 = vld [vmem:[%s10032_s10 + $0x58] sm:$0xff]  ;;  %v8602_v47 = vpack.c.bf16 %v329_v44, %v328_v43  ;;  %v330_v48 = vld [vmem:[#allocation6 + $0x50] sm:$0xff]  ;;  %v10082_v51 = vld [vmem:[%s10032_s10 + $0x68] sm:$0xff] }
  0x79   : > { %8567 = vmatprep.subr.bf16.mxu0 %v8566_v12  ;;  %v10079_v50 = vld [vmem:[%s10032_s10 + $0x60] sm:$0xff]  ;;  %v8606_v52 = vpack.c.bf16 %v331_v49, %v330_v48  ;;  %v333_v54 = vld [vmem:[#allocation6 + $0x68] sm:$0xff]  ;;  %v10087_v55 = vld [vmem:[%s10032_s10 + $0x70] sm:$0xff] }
  0x7a   : > { %v332_v53 = vld [vmem:[#allocation6 + $0x60] sm:$0xff]  ;;  %v10090_v56 = vld [vmem:[%s10032_s10 + $0x78] sm:$0xff]  ;;  %v334_v58 = vld [vmem:[#allocation6 + $0x70] sm:$0xff] }
  0x7b   : > { %v8610_v57 = vpack.c.bf16 %v333_v54, %v332_v53  ;;  %v335_v59 = vld [vmem:[#allocation6 + $0x78] sm:$0xff]  ;;  %v10095_v60 = vld [vmem:[%s10032_s10 + $0x80] sm:$0xff]  ;;  %v1016_v0 = vld [vmem:[#allocation6 + $0x108] sm:$0xff] }
  0x7c   : > { %8569 = vmatpush3.bf16.msra.mxu0 %v8566_v12  ;;  %v10098_v61 = vld [vmem:[%s10032_s10 + $0x88] sm:$0xff]  ;;  %v8614_v62 = vpack.c.bf16 %v335_v59, %v334_v58  ;;  %v1015_v63 = vld [vmem:[#allocation6 + $0x100] sm:$0xff]  ;;  %v10106_v2 = vld [vmem:[%s10032_s10 + $0x98] sm:$0xff] }
  0x7d   : > { %8571 = vmatprep.subr.bf16.mxu0 %v8570_v15  ;;  %v10103_v1 = vld [vmem:[%s10032_s10 + $0x90] sm:$0xff]  ;;  %v10108_v3 = vpack.c.bf16 %v1016_v0, %v1015_v63  ;;  %v10113_v4 = vld [vmem:[%s10032_s10 + $0xa0] sm:$0xff]  ;;  %v10116_v5 = vld [vmem:[%s10032_s10 + $0xa8] sm:$0xff] }
  0x7e   : > { %v10122_v6 = vld [vmem:[%s10032_s10 + $0xb0] sm:$0xff]  ;;  %v10125_v7 = vld [vmem:[%s10032_s10 + $0xb8] sm:$0xff]  ;;  %v10130_v8 = vld [vmem:[%s10032_s10 + $0xc0] sm:$0xff] }
  0x7f   : > { %v10133_v10 = vld [vmem:[%s10032_s10 + $0xc8] sm:$0xff]  ;;  %v10138_v11 = vld [vmem:[%s10032_s10 + $0xd0] sm:$0xff]  ;;  %v10141_v12 = vld [vmem:[%s10032_s10 + $0xd8] sm:$0xff] }
  0x80   : > { %8573 = vmatpush3.bf16.msra.mxu0 %v8570_v15  ;;  %v10146_v13 = vld [vmem:[%s10032_s10 + $0xe0] sm:$0xff]  ;;  %v10149_v14 = vld [vmem:[%s10032_s10 + $0xe8] sm:$0xff]  ;;  %v10154_v15 = vld [vmem:[%s10032_s10 + $0xf0] sm:$0xff] }
  0x81   : > { %8575 = vmatprep.subr.bf16.mxu0 %v8574_v18  ;;  %v10157_v16 = vld [vmem:[%s10032_s10 + $0xf8] sm:$0xff]  ;;  %v10162_v17 = vld [vmem:[%s10032_s10 + $0x100] sm:$0xff]  ;;  %v10170_v19 = vld [vmem:[%s10032_s10 + $0x110] sm:$0xff] }
  0x82   : > { %v10173_v20 = vld [vmem:[%s10032_s10 + $0x118] sm:$0xff]  ;;  %v10181_v22 = vld [vmem:[%s10032_s10 + $0x128] sm:$0xff]  ;;  %v10186_v23 = vld [vmem:[%s10032_s10 + $0x130] sm:$0xff] }
  0x83   : > { %v10194_v25 = vld [vmem:[%s10032_s10 + $0x140] sm:$0xff]  ;;  %v10197_v26 = vld [vmem:[%s10032_s10 + $0x148] sm:$0xff]  ;;  %v10205_v28 = vld [vmem:[%s10032_s10 + $0x158] sm:$0xff] }
  0x84   : > { %8577 = vmatpush3.bf16.msra.mxu0 %v8574_v18  ;;  %v10165_v18 = vld [vmem:[%s10032_s10 + $0x108] sm:$0xff]  ;;  %v10210_v29 = vld [vmem:[%s10032_s10 + $0x160] sm:$0xff]  ;;  %v10218_v33 = vld [vmem:[%s10032_s10 + $0x170] sm:$0xff] }
  0x85   : > { %8579 = vmatprep.subr.bf16.mxu0 %v8578_v21  ;;  %v10221_v34 = vld [vmem:[%s10032_s10 + $0x178] sm:$0xff]  ;;  %v10229_v38 = vld [vmem:[%s10032_s10 + $0x188] sm:$0xff]  ;;  %v10234_v39 = vld [vmem:[%s10032_s10 + $0x190] sm:$0xff] }
  0x86   : > { %v1017_v43 = vld [vmem:[#allocation6 + $0x110] sm:$0xff]  ;;  %v1018_v44 = vld [vmem:[#allocation6 + $0x118] sm:$0xff]  ;;  %v1020_v53 = vld [vmem:[#allocation6 + $0x128] sm:$0xff] }
  0x87   : > { %v274_v48 = vld [vmem:[%s10032_s10 + $0x10] sm:$0xff]  ;;  %v8622_v49 = vpack.c.bf16 %v1018_v44, %v1017_v43  ;;  %v1022_v58 = vld [vmem:[#allocation6 + $0x138] sm:$0xff]  ;;  %v1024_v63 = vld [vmem:[#allocation6 + $0x148] sm:$0xff] }
  0x88   : > { %8581 = vmatpush3.bf16.msra.mxu0 %v8578_v21  ;;  %v10178_v21 = vld [vmem:[%s10032_s10 + $0x120] sm:$0xff]  ;;  %v1028_v43 = vld [vmem:[#allocation6 + $0x168] sm:$0xff] }
  0x89   : > { %8583 = vmatprep.subr.bf16.mxu0 %v8582_v24  ;;  %v1029_v44 = vld [vmem:[#allocation6 + $0x170] sm:$0xff] }
  0x8c   : > { %8585 = vmatpush3.bf16.msra.mxu0 %v8582_v24  ;;  %v10189_v24 = vld [vmem:[%s10032_s10 + $0x138] sm:$0xff] }
  0x8d   : > { %8587 = vmatprep.subr.bf16.mxu0 %v8586_v27 }
  0x8f   : > { %7339 = vmatmul.mubr.f32.vlgmr.msra.gmra.mrb[0].mxu0 %v10047_v30 }
  0x90   : > { %8589 = vmatpush3.bf16.msra.mxu0 %v8586_v27  ;;  %7341 = vmatprep.mubr.f32.mxu0 %v10050_v31  ;;  %v10202_v27 = vld [vmem:[%s10032_s10 + $0x150] sm:$0xff] }
  0x91   : > { %8591 = vmatprep.subr.bf16.mxu0 %v8590_v32 }
  0x93   : > { %7342 = vmatmul.mubr.f32.gmra.mrb[2].mxu0 %v10055_v35 }
  0x94   : > { %7344 = vmatprep.mubr.f32.mxu0 %v10058_v36  ;;  %8593 = vmatpush3.bf16.msra.mxu0 %v8590_v32  ;;  %v10213_v32 = vld [vmem:[%s10032_s10 + $0x168] sm:$0xff] }
  0x95   : > { %8595 = vmatprep.subr.bf16.mxu0 %v8594_v37 }
  0x97   : > { %7345 = vmatmul.mubr.f32.gmra.mrb[4].mxu0 %v10063_v40 }
  0x98   : > { %7347 = vmatprep.mubr.f32.mxu0 %v10066_v41  ;;  %8597 = vmatpush3.bf16.msra.mxu0 %v8594_v37  ;;  %v10226_v37 = vld [vmem:[%s10032_s10 + $0x180] sm:$0xff] }
  0x99   : > { %8599 = vmatprep.subr.bf16.mxu0 %v8598_v42 }
  0x9b   : > { %7348 = vmatmul.mubr.f32.gmra.mrb[6].mxu0 %v10071_v45 }
  0x9c   : > { %7350 = vmatprep.mubr.f32.mxu0 %v10074_v46  ;;  %8601 = vmatpush3.bf16.msra.mxu0 %v8598_v42  ;;  %v272_v42 = vld [vmem:[%s10032_s10] sm:$0xff] }
  0x9d   : > { %8603 = vmatprep.subr.bf16.mxu0 %v8602_v47 }
  0x9f   : > { %7351 = vmatmul.mubr.f32.gmra.mrb[8].mxu0 %v10079_v50 }
  0xa0   : > { %7353 = vmatprep.mubr.f32.mxu0 %v10082_v51  ;;  %8605 = vmatpush3.bf16.msra.mxu0 %v8602_v47  ;;  %v273_v47 = vld [vmem:[%s10032_s10 + $0x8] sm:$0xff] }
  0xa1   : > { %8607 = vmatprep.subr.bf16.mxu0 %v8606_v52 }
  0xa3   : > { %7354 = vmatmul.mubr.f32.gmra.mrb[10].mxu0 %v10087_v55 }
  0xa4   : > { %7356 = vmatprep.mubr.f32.mxu0 %v10090_v56  ;;  %8609 = vmatpush3.bf16.msra.mxu0 %v8606_v52  ;;  %v1019_v52 = vld [vmem:[#allocation6 + $0x120] sm:$0xff] }
  0xa5   : > { %8611 = vmatprep.subr.bf16.mxu0 %v8610_v57  ;;  %v8626_v54 = vpack.c.bf16 %v1020_v53, %v1019_v52  ;;  %v2668_v52 = vld [vmem:[#allocation8 + $0x88] sm:$0xff] }
  0xa7   : > { %7357 = vmatmul.mubr.f32.gmra.mrb[12].mxu0 %v10095_v60 }
  0xa8   : > { %7359 = vmatprep.mubr.f32.mxu0 %v10098_v61  ;;  %8613 = vmatpush3.bf16.msra.mxu0 %v8610_v57  ;;  %v1021_v57 = vld [vmem:[#allocation6 + $0x130] sm:$0xff] }
  0xa9   : > { %8615 = vmatprep.subr.bf16.mxu0 %v8614_v62  ;;  %v8630_v59 = vpack.c.bf16 %v1022_v58, %v1021_v57  ;;  %v3761_v57 = vld [vmem:[#allocation8 + $0x188] sm:$0xff] }
  0xab   : > { %7360 = vmatmul.mubr.f32.gmra.mrb[14].mxu0 %v10103_v1 }
  0xac   : > { %7362 = vmatprep.mubr.f32.mxu0 %v10106_v2  ;;  %8617 = vmatpush3.bf16.msra.mxu0 %v8614_v62  ;;  %v1023_v62 = vld [vmem:[#allocation6 + $0x140] sm:$0xff] }
  0xad   : > { %8619 = vmatprep.subr.bf16.mxu0 %v10108_v3  ;;  %v8634_v0 = vpack.c.bf16 %v1024_v63, %v1023_v62  ;;  %v3763_v62 = vld [vmem:[#allocation8 + $0x198] sm:$0xff] }
  0xaf   : > { %7363 = vmatmul.mubr.f32.gmra.mrb[16].mxu0 %v10113_v4 }
  0xb0   : > { %7365 = vmatprep.mubr.f32.mxu0 %v10116_v5 }
  0xb3   : > { %7366 = vmatmul.mubr.f32.gmra.mrb[18].mxu0 %v10122_v6 }
  0xb4   : > { %7368 = vmatprep.mubr.f32.mxu0 %v10125_v7 }
  0xb7   : > { %7369 = vmatmul.mubr.f32.gmra.mrb[20].mxu0 %v10130_v8 }
  0xb8   : > { %7371 = vmatprep.mubr.f32.mxu0 %v10133_v10 }
  0xbb   : > { %7372 = vmatmul.mubr.f32.gmra.mrb[22].mxu0 %v10138_v11 }
  0xbc   : > { %7374 = vmatprep.mubr.f32.mxu0 %v10141_v12 }
  0xbf   : > { %7375 = vmatmul.mubr.f32.gmra.mrb[24].mxu0 %v10146_v13 }
  0xc0   : > { %7377 = vmatprep.mubr.f32.mxu0 %v10149_v14 }
  0xc3   : > { %7378 = vmatmul.mubr.f32.gmra.mrb[26].mxu0 %v10154_v15 }
  0xc4   : > { %7380 = vmatprep.mubr.f32.mxu0 %v10157_v16 }
  0xc7   : > { %7381 = vmatmul.mubr.f32.gmra.mrb[28].mxu0 %v10162_v17 }
  0xc8   : > { %7383 = vmatprep.mubr.f32.mxu0 %v10165_v18 }
  0xcb   : > { %7384 = vmatmul.mubr.f32.gmra.mrb[30].mxu0 %v10170_v19 }
  0xcc   : > { %7386 = vmatprep.mubr.f32.mxu0 %v10173_v20 }
  0xcf   : > { %7387 = vmatmul.mubr.f32.gmra.mrb[32].mxu0 %v10178_v21 }
  0xd0   : > { %7389 = vmatprep.mubr.f32.mxu0 %v10181_v22 }
  0xd3   : > { %7390 = vmatmul.mubr.f32.gmra.mrb[34].mxu0 %v10186_v23 }
  0xd4   : > { %7392 = vmatprep.mubr.f32.mxu0 %v10189_v24 }
  0xd7   : > { %7393 = vmatmul.mubr.f32.gmra.mrb[36].mxu0 %v10194_v25 }
  0xd8   : > { %7395 = vmatprep.mubr.f32.mxu0 %v10197_v26 }
  0xdb   : > { %7396 = vmatmul.mubr.f32.gmra.mrb[38].mxu0 %v10202_v27 }
  0xdc   : > { %7398 = vmatprep.mubr.f32.mxu0 %v10205_v28 }
  0xdf   : > { %7399 = vmatmul.mubr.f32.gmra.mrb[40].mxu0 %v10210_v29 }
  0xe0   : > { %7401 = vmatprep.mubr.f32.mxu0 %v10213_v32 }
  0xe3   : > { %7402 = vmatmul.mubr.f32.gmra.mrb[42].mxu0 %v10218_v33 }
  0xe4   : > { %7404 = vmatprep.mubr.f32.mxu0 %v10221_v34 }
  0xe7   : > { %7405 = vmatmul.mubr.f32.gmra.mrb[44].mxu0 %v10226_v37 }
  0xe8   : > { %7407 = vmatprep.mubr.f32.mxu0 %v10229_v38 }
  0xeb   : > { %7408 = vmatmul.mubr.f32.gmra.mrb[46].mxu0 %v10234_v39 }
  0xec   : > { %7442 = vmatprep.mubr.f32.mxu0 %v272_v42  ;;  %v1026_v42 = vld [vmem:[#allocation6 + $0x158] sm:$0xff] }
  0xef   : > { %7443 = vmatmul.mubr.f32.vlgmr.msra.gmra.mrb[0].mxu0 %v273_v47  ;;  %v1030_v47 = vld [vmem:[#allocation6 + $0x178] sm:$0xff] }
  0xf0   : > { %8621 = vmatpush3.bf16.msra.mxu0 %v10108_v3  ;;  %7445 = vmatprep.mubr.f32.mxu0 %v274_v48  ;;  %v1025_v3 = vld [vmem:[#allocation6 + $0x150] sm:$0xff]  ;;  %v8646_v48 = vpack.c.bf16 %v1030_v47, %v1029_v44  ;;  %v2670_v44 = vld [vmem:[#allocation8 + $0x98] sm:$0xff] }
  0xf1   : > { %8623 = vmatprep.subr.bf16.mxu0 %v8622_v49 }
  0xf3   : > { %7446 = vmatmul.mubr.f32.gmra.mrb[2].mxu0 %v10043_v9  ;;  %v8638_v9 = vpack.c.bf16 %v1026_v42, %v1025_v3  ;;  %v3765_v3 = vld [vmem:[#allocation8 + $0x1a8] sm:$0xff] }
  0xf4   : > { %7448 = vmatprep.mubr.f32.mxu0 %v10047_v30  ;;  %8625 = vmatpush3.bf16.msra.mxu0 %v8622_v49  ;;  %v1027_v30 = vld [vmem:[#allocation6 + $0x160] sm:$0xff] }
  0xf5   : > { %8627 = vmatprep.subr.bf16.mxu0 %v8626_v54  ;;  %v2667_v49 = vld [vmem:[#allocation8 + $0x80] sm:$0xff] }
  0xf6   : > { %v8650_v53 = vpack.c.bf16 %v2668_v52, %v2667_v49  ;;  %v2672_v49 = vld [vmem:[#allocation8 + $0xa8] sm:$0xff] }
  0xf7   : > { %7449 = vmatmul.mubr.f32.gmra.mrb[4].mxu0 %v10050_v31  ;;  %v8642_v31 = vpack.c.bf16 %v1028_v43, %v1027_v30  ;;  %v3767_v30 = vld [vmem:[#allocation8 + $0x1b8] sm:$0xff] }
  0xf8   : > { %7451 = vmatprep.mubr.f32.mxu0 %v10055_v35  ;;  %8629 = vmatpush3.bf16.msra.mxu0 %v8626_v54  ;;  %v3760_v54 = vld [vmem:[#allocation8 + $0x180] sm:$0xff] }
  0xf9   : > { %8631 = vmatprep.subr.bf16.mxu0 %v8630_v59  ;;  %v8746_v58 = vpack.c.bf16 %v3761_v57, %v3760_v54  ;;  %v2673_v54 = vld [vmem:[#allocation8 + $0xb0] sm:$0xff]  ;;  %v2674_v57 = vld [vmem:[#allocation8 + $0xb8] sm:$0xff] }
  0xfb   : > { %7452 = vmatmul.mubr.f32.gmra.mrb[6].mxu0 %v10058_v36  ;;  %8747 = vmatprep.subr.bf16.mxu1 %v8746_v58 }
  0xfc   : > { %7454 = vmatprep.mubr.f32.mxu0 %v10063_v40  ;;  %8633 = vmatpush3.bf16.msra.mxu0 %v8630_v59  ;;  %v3762_v59 = vld [vmem:[#allocation8 + $0x190] sm:$0xff] }
  0xfd   : > { %8635 = vmatprep.subr.bf16.mxu0 %v8634_v0  ;;  %v8750_v63 = vpack.c.bf16 %v3763_v62, %v3762_v59  ;;  %8749 = vmatpush3.bf16.msra.mxu1 %v8746_v58  ;;  %v8662_v58 = vpack.c.bf16 %v2674_v57, %v2673_v54  ;;  %v2676_v59 = vld [vmem:[#allocation8 + $0xc8] sm:$0xff] }
  0xff   : > { %7455 = vmatmul.mubr.f32.gmra.mrb[8].mxu0 %v10066_v41  ;;  %8751 = vmatprep.subr.bf16.mxu1 %v8750_v63 }
 0x100   : > { %7457 = vmatprep.mubr.f32.mxu0 %v10071_v45  ;;  %8637 = vmatpush3.bf16.msra.mxu0 %v8634_v0  ;;  %v3764_v0 = vld [vmem:[#allocation8 + $0x1a0] sm:$0xff] }
 0x101   : > { %8639 = vmatprep.subr.bf16.mxu0 %v8638_v9  ;;  %v8754_v42 = vpack.c.bf16 %v3765_v3, %v3764_v0  ;;  %8753 = vmatpush3.bf16.msra.mxu1 %v8750_v63 }
 0x103   : > { %7458 = vmatmul.mubr.f32.gmra.mrb[10].mxu0 %v10074_v46  ;;  %8755 = vmatprep.subr.bf16.mxu1 %v8754_v42 }
 0x104   : > { %7460 = vmatprep.mubr.f32.mxu0 %v10079_v50  ;;  %8641 = vmatpush3.bf16.msra.mxu0 %v8638_v9  ;;  %v3766_v9 = vld [vmem:[#allocation8 + $0x1b0] sm:$0xff] }
 0x105   : > { %8643 = vmatprep.subr.bf16.mxu0 %v8642_v31  ;;  %v8758_v43 = vpack.c.bf16 %v3767_v30, %v3766_v9  ;;  %8757 = vmatpush3.bf16.msra.mxu1 %v8754_v42 }
 0x107   : > { %7461 = vmatmul.mubr.f32.gmra.mrb[12].mxu0 %v10082_v51  ;;  %8759 = vmatprep.subr.bf16.mxu1 %v8758_v43 }
 0x108   : > { %7463 = vmatprep.mubr.f32.mxu0 %v10087_v55  ;;  %8645 = vmatpush3.bf16.msra.mxu0 %v8642_v31  ;;  %v2669_v31 = vld [vmem:[#allocation8 + $0x90] sm:$0xff] }
 0x109   : > { %8647 = vmatprep.subr.bf16.mxu0 %v8646_v48  ;;  %8761 = vmatpush3.bf16.msra.mxu1 %v8758_v43  ;;  %v8654_v47 = vpack.c.bf16 %v2670_v44, %v2669_v31 }
 0x10b   : > { %7464 = vmatmul.mubr.f32.gmra.mrb[14].mxu0 %v10090_v56 }
 0x10c   : > { %7466 = vmatprep.mubr.f32.mxu0 %v10095_v60  ;;  %8649 = vmatpush3.bf16.msra.mxu0 %v8646_v48  ;;  %v2671_v48 = vld [vmem:[#allocation8 + $0xa0] sm:$0xff] }
 0x10d   : > { %8651 = vmatprep.subr.bf16.mxu0 %v8650_v53  ;;  %v8658_v52 = vpack.c.bf16 %v2672_v49, %v2671_v48 }
 0x10f   : > { %7467 = vmatmul.mubr.f32.gmra.mrb[16].mxu0 %v10098_v61 }
 0x110   : > { %7469 = vmatprep.mubr.f32.mxu0 %v10103_v1 }
 0x113   : > { %7470 = vmatmul.mubr.f32.gmra.mrb[18].mxu0 %v10106_v2 }
 0x114   : > { %7472 = vmatprep.mubr.f32.mxu0 %v10113_v4 }
 0x117   : > { %7473 = vmatmul.mubr.f32.gmra.mrb[20].mxu0 %v10116_v5 }
 0x118   : > { %7475 = vmatprep.mubr.f32.mxu0 %v10122_v6 }
 0x11b   : > { %7476 = vmatmul.mubr.f32.gmra.mrb[22].mxu0 %v10125_v7 }
 0x11c   : > { %7478 = vmatprep.mubr.f32.mxu0 %v10130_v8 }
 0x11f   : > { %7479 = vmatmul.mubr.f32.gmra.mrb[24].mxu0 %v10133_v10 }
 0x120   : > { %7481 = vmatprep.mubr.f32.mxu0 %v10138_v11 }
 0x123   : > { %7482 = vmatmul.mubr.f32.gmra.mrb[26].mxu0 %v10141_v12 }
 0x124   : > { %7484 = vmatprep.mubr.f32.mxu0 %v10146_v13 }
 0x127   : > { %7485 = vmatmul.mubr.f32.gmra.mrb[28].mxu0 %v10149_v14 }
 0x128   : > { %7487 = vmatprep.mubr.f32.mxu0 %v10154_v15 }
 0x12b   : > { %7488 = vmatmul.mubr.f32.gmra.mrb[30].mxu0 %v10157_v16 }
 0x12c   : > { %7490 = vmatprep.mubr.f32.mxu0 %v10162_v17 }
 0x12f   : > { %7491 = vmatmul.mubr.f32.gmra.mrb[32].mxu0 %v10165_v18 }
 0x130   : > { %7493 = vmatprep.mubr.f32.mxu0 %v10170_v19 }
 0x133   : > { %7494 = vmatmul.mubr.f32.gmra.mrb[34].mxu0 %v10173_v20 }
 0x134   : > { %7496 = vmatprep.mubr.f32.mxu0 %v10178_v21 }
 0x137   : > { %7497 = vmatmul.mubr.f32.gmra.mrb[36].mxu0 %v10181_v22 }
 0x138   : > { %7499 = vmatprep.mubr.f32.mxu0 %v10186_v23 }
 0x13b   : > { %7500 = vmatmul.mubr.f32.gmra.mrb[38].mxu0 %v10189_v24 }
 0x13c   : > { %7502 = vmatprep.mubr.f32.mxu0 %v10194_v25 }
 0x13f   : > { %7503 = vmatmul.mubr.f32.gmra.mrb[40].mxu0 %v10197_v26 }
 0x140   : > { %7505 = vmatprep.mubr.f32.mxu0 %v10202_v27 }
 0x143   : > { %7506 = vmatmul.mubr.f32.gmra.mrb[42].mxu0 %v10205_v28 }
 0x144   : > { %7508 = vmatprep.mubr.f32.mxu0 %v10210_v29 }
 0x147   : > { %7509 = vmatmul.mubr.f32.gmra.mrb[44].mxu0 %v10213_v32 }
 0x148   : > { %7511 = vmatprep.mubr.f32.mxu0 %v10218_v33 }
 0x14b   : > { %7512 = vmatmul.mubr.f32.gmra.mrb[46].mxu0 %v10221_v34 }
 0x14c   : > { %7546 = vmatprep.mubr.f32.mxu0 %v10055_v35  ;;  %v2675_v35 = vld [vmem:[#allocation8 + $0xc0] sm:$0xff] }
 0x14f   : > { %7547 = vmatmul.mubr.f32.vlgmr.msra.gmra.mrb[0].mxu0 %v10058_v36  ;;  %v8666_v36 = vpack.c.bf16 %v2676_v59, %v2675_v35 }
 0x150   : > { %7549 = vmatprep.mubr.f32.mxu0 %v10063_v40  ;;  %8653 = vmatpush3.bf16.msra.mxu0 %v8650_v53  ;;  %v2677_v40 = vld [vmem:[#allocation8 + $0xd0] sm:$0xff]  ;;  %v2678_v53 = vld [vmem:[#allocation8 + $0xd8] sm:$0xff] }
 0x151   : > { %8655 = vmatprep.subr.bf16.mxu0 %v8654_v47 }
 0x153   : > { %7550 = vmatmul.mubr.f32.gmra.mrb[2].mxu0 %v10066_v41  ;;  %v8670_v41 = vpack.c.bf16 %v2678_v53, %v2677_v40 }
 0x154   : > { %7552 = vmatprep.mubr.f32.mxu0 %v10071_v45  ;;  %8657 = vmatpush3.bf16.msra.mxu0 %v8654_v47  ;;  %v2679_v45 = vld [vmem:[#allocation8 + $0xe0] sm:$0xff] }
 0x155   : > { %8659 = vmatprep.subr.bf16.mxu0 %v8658_v52 }
 0x157   : > { %7553 = vmatmul.mubr.f32.gmra.mrb[4].mxu0 %v10074_v46  ;;  %v2680_v46 = vld [vmem:[#allocation8 + $0xe8] sm:$0xff] }
 0x158   : > { %7555 = vmatprep.mubr.f32.mxu0 %v10079_v50  ;;  %8661 = vmatpush3.bf16.msra.mxu0 %v8658_v52  ;;  %v8674_v50 = vpack.c.bf16 %v2680_v46, %v2679_v45 }
 0x159   : > { %8663 = vmatprep.subr.bf16.mxu0 %v8662_v58 }
 0x15b   : > { %7556 = vmatmul.mubr.f32.gmra.mrb[6].mxu0 %v10082_v51  ;;  %v9813_v51 = vmov 0.0  }
 0x15c   : > { %7558 = vmatprep.mubr.f32.mxu0 %v10087_v55  ;;  %8665 = vmatpush3.bf16.msra.mxu0 %v8662_v58  ;;  %1487 = vst [vmem:[#allocation2] sm:$0xff] %v9813_v51  ;;  %1488 = vst [vmem:[#allocation2 + $0x8] sm:$0xff] %v9813_v51  ;;  %v2681_v55 = vld [vmem:[#allocation8 + $0xf0] sm:$0xff] }
 0x15d   : > { %8667 = vmatprep.subr.bf16.mxu0 %v8666_v36  ;;  %1489 = vst [vmem:[#allocation2 + $0x10] sm:$0xff] %v9813_v51  ;;  %1490 = vst [vmem:[#allocation2 + $0x18] sm:$0x1] %v9813_v51 }
 0x15e   : > { %1491 = vst [vmem:[#allocation2 + $0x199] sm:$0xff] %v9813_v51  ;;  %1492 = vst [vmem:[#allocation2 + $0x1a1] sm:$0xff] %v9813_v51 }
 0x15f   : > { %7559 = vmatmul.mubr.f32.gmra.mrb[8].mxu0 %v10090_v56  ;;  %1493 = vst [vmem:[#allocation2 + $0x1a9] sm:$0xff] %v9813_v51  ;;  %1494 = vst [vmem:[#allocation2 + $0x1b1] sm:$0xff] %v9813_v51  ;;  %v2682_v56 = vld [vmem:[#allocation8 + $0xf8] sm:$0xff] }
 0x160   : > { %7561 = vmatprep.mubr.f32.mxu0 %v10095_v60  ;;  %8669 = vmatpush3.bf16.msra.mxu0 %v8666_v36  ;;  %v3768_v60 = vld [vmem:[#allocation8 + $0x1c0] sm:$0xff] }
 0x161   : > { %8671 = vmatprep.subr.bf16.mxu0 %v8670_v41 }
 0x163   : > { %7562 = vmatmul.mubr.f32.gmra.mrb[10].mxu0 %v10098_v61  ;;  %v3769_v61 = vld [vmem:[#allocation8 + $0x1c8] sm:$0xff] }
 0x164   : > { %7564 = vmatprep.mubr.f32.mxu0 %v10103_v1  ;;  %8673 = vmatpush3.bf16.msra.mxu0 %v8670_v41  ;;  %v8678_v1 = vpack.c.bf16 %v2682_v56, %v2681_v55 }
 0x165   : > { %8675 = vmatprep.subr.bf16.mxu0 %v8674_v50 }
 0x167   : > { %7565 = vmatmul.mubr.f32.gmra.mrb[12].mxu0 %v10106_v2  ;;  %v8762_v2 = vpack.c.bf16 %v3769_v61, %v3768_v60 }
 0x168   : > { %7567 = vmatprep.mubr.f32.mxu0 %v10113_v4  ;;  %8677 = vmatpush3.bf16.msra.mxu0 %v8674_v50  ;;  %v3770_v4 = vld [vmem:[#allocation8 + $0x1d0] sm:$0xff] }
 0x169   : > { %8679 = vmatprep.subr.bf16.mxu0 %v8678_v1  ;;  %8763 = vmatprep.subr.bf16.mxu1 %v8762_v2 }
 0x16a   : > { %8765 = vmatpush3.bf16.msra.mxu1 %v8762_v2 }
 0x16b   : > { %7568 = vmatmul.mubr.f32.gmra.mrb[14].mxu0 %v10116_v5  ;;  %v3771_v5 = vld [vmem:[#allocation8 + $0x1d8] sm:$0xff] }
 0x16c   : > { %7570 = vmatprep.mubr.f32.mxu0 %v10122_v6  ;;  %8681 = vmatpush3.bf16.msra.mxu0 %v8678_v1  ;;  %v1011_v6 = vld [vmem:[%s10032_s10 + $0x198] sm:$0xff] }
 0x16f   : > { %7571 = vmatmul.mubr.f32.gmra.mrb[16].mxu0 %v10125_v7  ;;  %v8766_v7 = vpack.c.bf16 %v3771_v5, %v3770_v4 }
 0x170   : > { %7573 = vmatprep.mubr.f32.mxu0 %v10130_v8  ;;  %v1012_v8 = vld [vmem:[%s10032_s10 + $0x1a0] sm:$0xff] }
 0x171   : > { %8767 = vmatprep.subr.bf16.mxu1 %v8766_v7 }
 0x172   : > { %8769 = vmatpush3.bf16.msra.mxu1 %v8766_v7 }
 0x173   : > { %7574 = vmatmul.mubr.f32.gmra.mrb[18].mxu0 %v10133_v10  ;;  %v3772_v10 = vld [vmem:[#allocation8 + $0x1e0] sm:$0xff] }
 0x174   : > { %7576 = vmatprep.mubr.f32.mxu0 %v10138_v11  ;;  %v3773_v11 = vld [vmem:[#allocation8 + $0x1e8] sm:$0xff] }
 0x177   : > { %7577 = vmatmul.mubr.f32.gmra.mrb[20].mxu0 %v10141_v12  ;;  %v1013_v12 = vld [vmem:[%s10032_s10 + $0x1a8] sm:$0xff] }
 0x178   : > { %7579 = vmatprep.mubr.f32.mxu0 %v10146_v13  ;;  %v8770_v13 = vpack.c.bf16 %v3773_v11, %v3772_v10  ;;  %v2602_v10 = vld [vmem:[#allocation8] sm:$0xff]  ;;  %v2603_v11 = vld [vmem:[#allocation8 + $0x8] sm:$0xff] }
 0x17a   : > { %8771 = vmatprep.subr.bf16.mxu1 %v8770_v13 }
 0x17b   : > { %7580 = vmatmul.mubr.f32.gmra.mrb[22].mxu0 %v10149_v14  ;;  %v2618_v14 = vld [vmem:[#allocation2 + $0x1] sm:$0xff]  ;;  %8773 = vmatpush3.bf16.msra.mxu1 %v8770_v13 }
 0x17c   : > { %7582 = vmatprep.mubr.f32.mxu0 %v10154_v15  ;;  %v3774_v15 = vld [vmem:[#allocation8 + $0x1f0] sm:$0xff] }
 0x17f   : > { %7583 = vmatmul.mubr.f32.gmra.mrb[24].mxu0 %v10157_v16  ;;  %v3775_v16 = vld [vmem:[#allocation8 + $0x1f8] sm:$0xff] }
 0x180   : > { %7585 = vmatprep.mubr.f32.mxu0 %v10162_v17  ;;  %v2619_v17 = vld [vmem:[#allocation2 + $0x9] sm:$0xff] }
 0x183   : > { %7586 = vmatmul.mubr.f32.gmra.mrb[26].mxu0 %v10165_v18  ;;  %v8774_v18 = vpack.c.bf16 %v3775_v16, %v3774_v15 }
 0x184   : > { %7588 = vmatprep.mubr.f32.mxu0 %v10170_v19  ;;  %v2620_v19 = vld [vmem:[#allocation2 + $0x11] sm:$0xff] }
 0x185   : > { %8775 = vmatprep.subr.bf16.mxu1 %v8774_v18 }
 0x186   : > { %8777 = vmatpush3.bf16.msra.mxu1 %v8774_v18 }
 0x187   : > { %7589 = vmatmul.mubr.f32.gmra.mrb[28].mxu0 %v10173_v20  ;;  %v4178_v20 = vld [vmem:[#allocation8 + $0x200] sm:$0xff] }
 0x188   : > { %7591 = vmatprep.mubr.f32.mxu0 %v10178_v21  ;;  %v4179_v21 = vld [vmem:[#allocation8 + $0x208] sm:$0xff] }
 0x18b   : > { %7592 = vmatmul.mubr.f32.gmra.mrb[30].mxu0 %v10181_v22  ;;  %v10334_v22 = vpack.c.bf16 %v4179_v21, %v4178_v20  ;;  %v8682_v21 = vpack.c.bf16 %v2603_v11, %v2602_v10 }
 0x18c   : > { %7594 = vmatprep.mubr.f32.mxu0 %v10186_v23  ;;  %v1497_v23 = vlaneseq }
 0x18d   : > { %13174 = vst [vmem:[#allocation13_spill] sm:$0xff] %v10334_v22  ;;  %8779 = vmatprep.subr.bf16.mxu1 %v10334_v22  ;;  %8683 = vmatprep.subr.bf16.mxu0 %v8682_v21 }
 0x18f   : > { %7595 = vmatmul.mubr.f32.gmra.mrb[32].mxu0 %v10189_v24  ;;  %v10337_v24 = vshrl.u32 %v1497_v23, 7 }
 0x190   : > { %7597 = vmatprep.mubr.f32.mxu0 %v10194_v25 }
 0x191   : > { %v1499_v25 = vadd.s32 8, %v10337_v24  ;;  %v10362_v9 = vadd.s32 32, %v10337_v24  ;;  %v10365_v30 = vadd.s32 56, %v10337_v24  ;;  %v10368_v31 = vadd.s32 48, %v10337_v24 }
 0x192   : > { %v10391_v41 = vadd.s32 72, %v10337_v24  ;;  %v10394_v50 = vadd.s32 64, %v10337_v24  ;;  %v10402_v55 = vadd.s32 88, %v10337_v24  ;;  %v10431_v15 = vadd.s32 80, %v10337_v24 }
 0x193   : > { %7598 = vmatmul.mubr.f32.gmra.mrb[34].mxu0 %v10197_v26  ;;  %v10372_v48 = vmul.u32.u64.low 2863311531, %v10362_v9  ;;  %v10373_v49 = vmul.u32.u64.high 2863311531, %v10362_v9, %v10372_v48  ;;  %v10376_v52 = vmul.u32.u64.low 2863311531, %v10365_v30  ;;  %v10377_v54 = vmul.u32.u64.high 2863311531, %v10365_v30, %v10376_v52 }
 0x194   : > { %7600 = vmatprep.mubr.f32.mxu0 %v10202_v27  ;;  %v10340_v26 = vmul.u32.u64.low 2863311531, %v1499_v25  ;;  %v10341_v27 = vmul.u32.u64.high 2863311531, %v1499_v25, %v10340_v26  ;;  %v10384_v59 = vmul.u32.u64.low 2863311531, %v10368_v31  ;;  %v10385_v36 = vmul.u32.u64.high 2863311531, %v10368_v31, %v10384_v59 }
 0x195   : > { %v1596_v60 = vshrl.u32 %v10373_v49, 4  ;;  %v1629_v1 = vshrl.u32 %v10377_v54, 4  ;;  %v10414_v2 = vmul.u32.u64.low 2863311531, %v10391_v41  ;;  %v10415_v4 = vmul.u32.u64.high 2863311531, %v10391_v41, %v10414_v2 }
 0x196   : > { %v1563_v3 = vshrl.u32 %v10341_v27, 4  ;;  %v10442_v20 = vadd.s32 96, %v10337_v24  ;;  %v10570_v11 = vadd.s32 136, %v10337_v24 }
 0x197   : > { %7601 = vmatmul.mubr.f32.gmra.mrb[36].mxu0 %v10205_v28  ;;  %v1597_v16 = vmul.u32 24, %v1596_v60 }
 0x198   : > { %7603 = vmatprep.mubr.f32.mxu0 %v10210_v29  ;;  %v10344_v28 = vmul.u32.u64.low 2863311531, %v10337_v24  ;;  %v10345_v29 = vmul.u32.u64.high 2863311531, %v10337_v24, %v10344_v28  ;;  %v1564_v43 = vmul.u32 24, %v1563_v3  ;;  %v1651_v3 = vshrl.u32 %v10415_v4, 4 }
 0x19a   : > { %v1552_v42 = vshrl.u32 %v10345_v29, 4  ;;  %v10381_v35 = vsub.s32 %v1499_v25, %v1564_v43  ;;  %v10468_v28 = vmul.u32.u64.low 2863311531, %v10431_v15  ;;  %v10469_v29 = vmul.u32.u64.high 2863311531, %v10431_v15, %v10468_v28 }
 0x19b   : > { %7604 = vmatmul.mubr.f32.gmra.mrb[38].mxu0 %v10213_v32  ;;  %v1501_v32 = vadd.s32 24, %v10337_v24  ;;  %v1652_v59 = vmul.u32 24, %v1651_v3  ;;  %v2609_v28 = vld [vmem:[#allocation8 + $0x38] sm:$0xff] }
 0x19c   : > { %7606 = vmatprep.mubr.f32.mxu0 %v10218_v33  ;;  %v1500_v33 = vadd.s32 16, %v10337_v24  ;;  %v1553_v44 = vmul.u32 24, %v1552_v42  ;;  %vm2075_vm0 = vcmp.ne.s32.totalorder %v10381_v35, 0  ;;  %vm2123_vm1 = vcmp.lt.s32.totalorder %v10381_v35, 0 }
 0x19d   : > { %v10399_v51 = vadd.s32 24, %v10381_v35  ;;  %vm10448_vm6 = vmand %vm2123_vm1, %vm2075_vm0 }
 0x19e   : > { %v10388_v40 = vsub.s32 %v10337_v24, %v1553_v44 }
 0x19f   : > { %7607 = vmatmul.mubr.f32.gmra.mrb[40].mxu0 %v10221_v34  ;;  %v1503_v34 = vadd.s32 40, %v10337_v24 }
 0x1a0   : > { %7609 = vmatprep.mubr.f32.mxu0 %v10226_v37  ;;  %vm2074_vm2 = vcmp.ne.s32.totalorder %v10388_v40, 0  ;;  %vm2122_vm3 = vcmp.lt.s32.totalorder %v10388_v40, 0  ;;  %v10410_v61 = vadd.s32 24, %v10388_v40 }
 0x1a1   : > { %v10356_v63 = vmul.u32.u64.low 2863311531, %v1503_v34  ;;  %v10357_v0 = vmul.u32.u64.high 2863311531, %v1503_v34, %v10356_v63  ;;  %vm10462_vm10 = vmand %vm2122_vm3, %vm2074_vm2 }
 0x1a3   : > { %7610 = vmatmul.mubr.f32.gmra.mrb[42].mxu0 %v10229_v38  ;;  %v10350_v37 = vmul.u32.u64.low 2863311531, %v1501_v32  ;;  %v10351_v38 = vmul.u32.u64.high 2863311531, %v1501_v32, %v10350_v37  ;;  %v1607_v58 = vshrl.u32 %v10357_v0, 4 }
 0x1a4   : > { %7612 = vmatprep.mubr.f32.mxu0 %v10234_v39  ;;  %v10353_v39 = vmul.u32.u64.low 2863311531, %v1500_v33  ;;  %v10354_v62 = vmul.u32.u64.high 2863311531, %v1500_v33, %v10353_v39 }
 0x1a5   : > { %v1585_v47 = vshrl.u32 %v10351_v38, 4  ;;  %v1608_v46 = vmul.u32 24, %v1607_v58  ;;  %v10483_v38 = vsub.s32 %v10362_v9, %v1597_v16 }
 0x1a6   : > { %v1574_v57 = vshrl.u32 %v10354_v62, 4  ;;  %v10502_v42 = vmul.u32.u64.low 2863311531, %v10442_v20  ;;  %v10503_v9 = vmul.u32.u64.high 2863311531, %v10442_v20, %v10502_v42 }
 0x1a7   : > { %7613 = vmatmul.mubr.f32.gmra.mrb[44].mxu0 %v1011_v6  ;;  %v1586_v53 = vmul.u32 24, %v1585_v47  ;;  %v10419_v6 = vsub.s32 %v1503_v34, %v1608_v46  ;;  %vm2078_vm15 = vcmp.ne.s32.totalorder %v10483_v38, 0  ;;  %vm2126_vm0 = vcmp.lt.s32.totalorder %v10483_v38, 0 }
 0x1a8   : > { %7615 = vmatprep.mubr.f32.mxu0 %v1012_v8  ;;  %v1575_v45 = vmul.u32 24, %v1574_v57  ;;  %v10422_v7 = vmul.u32.u64.low 2863311531, %v10394_v50  ;;  %v10423_v8 = vmul.u32.u64.high 2863311531, %v10394_v50, %v10422_v7  ;;  %v10537_v58 = vadd.s32 24, %v10483_v38  ;;  %vm10558_vm3 = vmand %vm2126_vm0, %vm2078_vm15 }
 0x1a9   : > { %v10406_v56 = vsub.s32 %v1501_v32, %v1586_v53  ;;  %vm2079_vm9 = vcmp.ne.s32.totalorder %v10419_v6, 0  ;;  %vm2127_vm11 = vcmp.lt.s32.totalorder %v10419_v6, 0  ;;  %v2604_v32 = vld [vmem:[#allocation8 + $0x10] sm:$0xff]  ;;  %v10480_v37 = vadd.s32 24, %v10419_v6  ;;  %v2606_v53 = vld [vmem:[#allocation8 + $0x20] sm:$0xff] }
 0x1aa   : > { %v10417_v5 = vsub.s32 %v1500_v33, %v1575_v45  ;;  %v2605_v33 = vld [vmem:[#allocation8 + $0x18] sm:$0xff]  ;;  %vm10513_vm14 = vmand %vm2127_vm11, %vm2079_vm9  ;;  %v2607_v45 = vld [vmem:[#allocation8 + $0x28] sm:$0xff]  ;;  %v1662_v7 = vshrl.u32 %v10469_v29, 4  ;;  %v1684_v16 = vshrl.u32 %v10503_v9, 4  ;;  %v10607_v42 = vadd.s32 128, %v10337_v24 }
 0x1ab   : > { %7616 = vmatmul.mubr.f32.gmra.mrb[46].mxu0 %v1013_v12  ;;  %v1618_v12 = vshrl.u32 %v10385_v36, 4  ;;  %vm2077_vm4 = vcmp.ne.s32.totalorder %v10406_v56, 0  ;;  %vm2125_vm5 = vcmp.lt.s32.totalorder %v10406_v56, 0  ;;  %v10439_v18 = vadd.s32 24, %v10406_v56  ;;  %v2615_v29 = vld [vmem:[#allocation8 + $0x68] sm:$0xff] }
 0x1ac   : > { %7650 = vmatprep.mubr.f32.mxu0 %v2618_v14  ;;  %v10427_v13 = vmul.u32.u64.low 2863311531, %v10402_v55  ;;  %v10428_v14 = vmul.u32.u64.high 2863311531, %v10402_v55, %v10427_v13  ;;  %vm2076_vm7 = vcmp.ne.s32.totalorder %v10417_v5, 0  ;;  %vm2124_vm8 = vcmp.lt.s32.totalorder %v10417_v5, 0  ;;  %vm10475_vm12 = vmand %vm2125_vm5, %vm2077_vm4 }
 0x1ad   : > { %v10455_v25 = vadd.s32 24, %v10417_v5  ;;  %v1619_v27 = vmul.u32 24, %v1618_v12  ;;  %vm10493_vm13 = vmand %vm2124_vm8, %vm2076_vm7  ;;  %v8686_v47 = vpack.c.bf16 %v2605_v33, %v2604_v32  ;;  %v10545_v36 = vadd.s32 120, %v10337_v24 }
 0x1ae   : > { %v1673_v54 = vshrl.u32 %v10428_v14, 4  ;;  %v8690_v12 = vpack.c.bf16 %v2607_v45, %v2606_v53  ;;  %v10579_v14 = vsub.s32 %v10391_v41, %v1652_v59  ;;  %v13194_v32 = vmov 0 }
 0x1af   : > { %7651 = vmatmul.mubr.f32.vlgmr.msra.gmra.mrb[48].mxu0 %v2619_v17  ;;  %v10436_v17 = vadd.s32 104, %v10337_v24  ;;  %v10527_v52 = vsub.s32 %v10368_v31, %v1619_v27  ;;  %v2608_v27 = vld [vmem:[#allocation8 + $0x30] sm:$0xff]  ;;  %v1663_v3 = vmul.u32 24, %v1662_v7  ;;  %v10610_v9 = vadd.s32 152, %v10337_v24 }
 0x1b0   : > { %7653 = vmatprep.mubr.f32.mxu0 %v2620_v19  ;;  %v1630_v19 = vmul.u32 24, %v1629_v1  ;;  %8685 = vmatpush3.bf16.msra.mxu0 %v8682_v21  ;;  %v10552_v1 = vadd.s32 112, %v10337_v24  ;;  %v1674_v4 = vmul.u32 24, %v1673_v54  ;;  %13193 = vst [vmem:[#allocation18_spill] sm:$0xff] %v10579_v14  ;;  %v8694_v54 = vpack.c.bf16 %v2609_v28, %v2608_v27 }
 0x1b1   : > { %v10486_v39 = vmul.u32.u64.low 2863311531, %v10436_v17  ;;  %v10487_v62 = vmul.u32.u64.high 2863311531, %v10436_v17, %v10486_v39  ;;  %13186 = vst [vmem:[#allocation15_spill] sm:$0xff] %v10527_v52  ;;  %8687 = vmatprep.subr.bf16.mxu0 %v8686_v47  ;;  %vm2080_vm4 = vcmp.ne.s32.totalorder %v10527_v52, 0  ;;  %vm2128_vm5 = vcmp.lt.s32.totalorder %v10527_v52, 0 }
 0x1b2   : > { %v10498_v0 = vsub.s32 %v10365_v30, %v1630_v19  ;;  %v1640_v30 = vshrl.u32 %v10423_v8, 4  ;;  %v10566_v8 = vadd.s32 24, %v10527_v52  ;;  %vm10592_vm8 = vmand %vm2128_vm5, %vm2080_vm4  ;;  %vm2083_vm9 = vcmp.ne.s32.totalorder %v10579_v14, 0 }
 0x1b3   : > { %v1695_v10 = vshrl.u32 %v10487_v62, 4  ;;  %v10583_v19 = vmul.u32.u64.low 2863311531, %v10545_v36  ;;  %v10584_v21 = vmul.u32.u64.high 2863311531, %v10545_v36, %v10583_v19  ;;  %v13195_v32 = vsel %vm10592_vm8, 4294967295, %v13194_v32 }
 0x1b4   : > { %13183 = vst [vmem:[#allocation14_spill] sm:$0xff] %v10498_v0  ;;  %vm2081_vm1 = vcmp.ne.s32.totalorder %v10498_v0, 0  ;;  %8689 = vmatpush3.bf16.msra.mxu0 %v8686_v47  ;;  %vm2129_vm2 = vcmp.lt.s32.totalorder %v10498_v0, 0  ;;  %v10549_v46 = vadd.s32 24, %v10498_v0  ;;  %v1641_v60 = vmul.u32 24, %v1640_v30  ;;  %13190 = vst [vmem:[#allocation17_spill] sm:$0xff] %v10566_v8 }
 0x1b5   : > { %vm10574_vm7 = vmand %vm2129_vm2, %vm2081_vm1  ;;  %13196 = vst [vmem:[#allocation19_spill] sm:$0xff] %v13195_v32  ;;  %v10600_v33 = vmul.u32.u64.low 2863311531, %v10552_v1  ;;  %v10601_v39 = vmul.u32.u64.high 2863311531, %v10552_v1, %v10600_v33  ;;  %8691 = vmatprep.subr.bf16.mxu0 %v8690_v12  ;;  %v10604_v62 = vsub.s32 %v10402_v55, %v1674_v4  ;;  %v1696_v30 = vmul.u32 24, %v1695_v10  ;;  %v2611_v4 = vld [vmem:[#allocation8 + $0x48] sm:$0xff]  ;;  %v2614_v55 = vld [vmem:[#allocation8 + $0x60] sm:$0xff] }
 0x1b6   : > { %13187 = vst [vmem:[#allocation16_spill] sm:$0xff] %v10549_v46  ;;  %v10597_v41 = vsub.s32 %v10394_v50, %v1641_v60  ;;  %v10613_v50 = vmul.u32.u64.low 2863311531, %v10570_v11  ;;  %v10614_v47 = vmul.u32.u64.high 2863311531, %v10570_v11, %v10613_v50  ;;  %v1685_v53 = vmul.u32 24, %v1684_v16  ;;  %v2610_v60 = vld [vmem:[#allocation8 + $0x40] sm:$0xff]  ;;  %v2617_v32 = vld [vmem:[#allocation8 + $0x78] sm:$0xff] }
 0x1b7   : > { %vm2131_vm11 = vcmp.lt.s32.totalorder %v10579_v14, 0  ;;  %v10627_v45 = vadd.s32 24, %v10579_v14  ;;  %v10635_v10 = vsub.s32 %v10431_v15, %v1663_v3  ;;  %v10643_v19 = vsub.s32 %v10436_v17, %v1696_v30  ;;  %v4180_v14 = vld [vmem:[#allocation8 + $0x210] sm:$0xff] }
 0x1b8   : > { %13197 = vst [vmem:[#allocation20_spill] sm:$0xff] %v10597_v41  ;;  %8693 = vmatpush3.bf16.msra.mxu0 %v8690_v12  ;;  %vm2082_vm15 = vcmp.ne.s32.totalorder %v10597_v41, 0  ;;  %vm2130_vm0 = vcmp.lt.s32.totalorder %v10597_v41, 0  ;;  %v10632_v7 = vadd.s32 24, %v10597_v41  ;;  %v10650_v33 = vsub.s32 %v10442_v20, %v1685_v53  ;;  %vm10687_vm2 = vmand %vm2131_vm11, %vm2083_vm9 }
 0x1b9   : > { %13198 = vst [vmem:[#allocation21_spill] sm:$0xff] %v10627_v45  ;;  %8695 = vmatprep.subr.bf16.mxu0 %v8694_v54  ;;  %v10638_v12 = vmul.u32.u64.low 2863311531, %v10607_v42  ;;  %v10639_v16 = vmul.u32.u64.high 2863311531, %v10607_v42, %v10638_v12  ;;  %v10646_v27 = vmul.u32.u64.low 2863311531, %v10610_v9  ;;  %v10647_v28 = vmul.u32.u64.high 2863311531, %v10610_v9, %v10646_v27  ;;  %vm10702_vm5 = vmand %vm2130_vm0, %vm2082_vm15  ;;  %v4181_v45 = vld [vmem:[#allocation8 + $0x218] sm:$0xff] }
 0x1ba   : > { %13199 = vst [vmem:[#allocation22_spill] sm:$0xff] %v10632_v7  ;;  %13200 = vst [vmem:[#allocation23_spill] sm:$0xff] %v10650_v33  ;;  %v1717_v15 = vshrl.u32 %v10584_v21, 4  ;;  %v10654_v3 = vadd.s32 144, %v10337_v24  ;;  %v8698_v50 = vpack.c.bf16 %v2611_v4, %v2610_v60  ;;  %v1706_v17 = vshrl.u32 %v10601_v39, 4  ;;  %v2612_v60 = vld [vmem:[#allocation8 + $0x50] sm:$0xff] }
 0x1bb   : > { %v10662_v30 = vadd.s32 168, %v10337_v24  ;;  %vm2084_vm4 = vcmp.ne.s32.totalorder %v10635_v10, 0  ;;  %v10667_v20 = vadd.s32 160, %v10337_v24  ;;  %v10670_v21 = vadd.s32 184, %v10337_v24  ;;  %v2613_v4 = vld [vmem:[#allocation8 + $0x58] sm:$0xff] }
 0x1bc   : > { %8697 = vmatpush3.bf16.msra.mxu0 %v8694_v54  ;;  %v10658_v54 = vadd.s32 24, %v10604_v62  ;;  %v10673_v53 = vadd.s32 24, %v10635_v10  ;;  %v1739_v39 = vshrl.u32 %v10614_v47, 4  ;;  %v1718_v12 = vmul.u32 24, %v1717_v15 }
 0x1bd   : > { %8699 = vmatprep.subr.bf16.mxu0 %v8698_v50  ;;  %v10680_v27 = vmul.u32.u64.low 2863311531, %v10654_v3  ;;  %v10681_v59 = vmul.u32.u64.high 2863311531, %v10654_v3, %v10680_v27  ;;  %v13201_v31 = vmov 0  ;;  %v1707_v47 = vmul.u32 24, %v1706_v17 }
 0x1be   : > { %v13202_v31 = vsel %vm10687_vm2, 4294967295, %v13201_v31  ;;  %v10696_v15 = vadd.s32 176, %v10337_v24  ;;  %v13204_v27 = vmov 0  ;;  %v1728_v49 = vshrl.u32 %v10639_v16, 4  ;;  %v2616_v16 = vld [vmem:[#allocation8 + $0x70] sm:$0xff] }
 0x1bf   : > { %13203 = vst [vmem:[#allocation24_spill] sm:$0xff] %v13202_v31  ;;  %v13205_v27 = vsel %vm10702_vm5, 4294967295, %v13204_v27  ;;  %v10708_v48 = vmul.u32.u64.low 2863311531, %v10667_v20  ;;  %v10709_v17 = vmul.u32.u64.high 2863311531, %v10667_v20, %v10708_v48  ;;  %v8702_v43 = vpack.c.bf16 %v2613_v4, %v2612_v60 }
 0x1c0   : > { %8701 = vmatpush3.bf16.msra.mxu0 %v8698_v50  ;;  %v10692_v50 = vmul.u32.u64.low 2863311531, %v10662_v30  ;;  %v10693_v57 = vmul.u32.u64.high 2863311531, %v10662_v30, %v10692_v50  ;;  %vm13206_vm9 = vcmp.ne.s32.totalorder %v10604_v62, 0  ;;  %vm13207_vm11 = vcmp.lt.s32.totalorder %v10604_v62, 0 }
 0x1c1   : > { %vm10715_vm1 = vmand %vm13207_vm11, %vm13206_vm9  ;;  %v13208_v50 = vmov 0  ;;  %v1740_v22 = vmul.u32 24, %v1739_v39  ;;  %v1761_v52 = vshrl.u32 %v10647_v28, 4  ;;  %v8706_v8 = vpack.c.bf16 %v2615_v29, %v2614_v55  ;;  %8703 = vmatprep.subr.bf16.mxu0 %v8702_v43 }
 0x1c2   : > { %v13209_v50 = vsel %vm10715_vm1, 4294967295, %v13208_v50  ;;  %vm13210_vm0 = vcmp.lt.s32.totalorder %v10635_v10, 0  ;;  %v13211_v60 = vmov 0  ;;  %v10734_v39 = vadd.s32 24, %v10643_v19 }
 0x1c3   : > { %vm10729_vm9 = vmand %vm13210_vm0, %vm2084_vm4  ;;  %v10737_v29 = vmul.u32.u64.low 2863311531, %v10670_v21  ;;  %v10738_v55 = vmul.u32.u64.high 2863311531, %v10670_v21, %v10737_v29  ;;  %vm13213_vm11 = vcmp.ne.s32.totalorder %v10643_v19, 0  ;;  %vm13214_vm15 = vcmp.lt.s32.totalorder %v10643_v19, 0 }
 0x1c4   : > { %v13212_v60 = vsel %vm10729_vm9, 4294967295, %v13211_v60  ;;  %vm10744_vm2 = vmand %vm13214_vm15, %vm13213_vm11  ;;  %v13215_v28 = vmov 0  ;;  %v10749_v4 = vadd.s32 24, %v10650_v33  ;;  %v10752_v48 = vsub.s32 %v10545_v36, %v1718_v12  ;;  %8705 = vmatpush3.bf16.msra.mxu0 %v8702_v43 }
 0x1c5   : > { %v13216_v28 = vsel %vm10744_vm2, 4294967295, %v13215_v28  ;;  %v10755_v31 = vmul.u32.u64.low 2863311531, %v10696_v15  ;;  %v10756_v29 = vmul.u32.u64.high 2863311531, %v10696_v15, %v10755_v31  ;;  %vm13218_vm4 = vcmp.ne.s32.totalorder %v10650_v33, 0  ;;  %8707 = vmatprep.subr.bf16.mxu0 %v8706_v8 }
 0x1c6   : > { %13217 = vst [vmem:[#allocation25_spill] sm:$0xff] %v10749_v4  ;;  %vm13219_vm15 = vcmp.lt.s32.totalorder %v10650_v33, 0  ;;  %v13220_v46 = vmov 0  ;;  %v10771_v36 = vsub.s32 %v10552_v1, %v1707_v47  ;;  %v1729_v12 = vmul.u32 24, %v1728_v49 }
 0x1c7   : > { %vm10766_vm0 = vmand %vm13219_vm15, %vm13218_vm4  ;;  %v8710_v31 = vpack.c.bf16 %v2617_v32, %v2616_v16  ;;  %v10782_v41 = vsub.s32 %v10570_v11, %v1740_v22  ;;  %v1762_v7 = vmul.u32 24, %v1761_v52  ;;  %v10788_v1 = vpack.c.bf16 %v4181_v45, %v4180_v14 }
 0x1c8   : > { %v13221_v46 = vsel %vm10766_vm0, 4294967295, %v13220_v46  ;;  %v1750_v32 = vshrl.u32 %v10681_v59, 4  ;;  %v10792_v47 = vadd.s32 200, %v10337_v24  ;;  %v1783_v22 = vshrl.u32 %v10693_v57, 4  ;;  %8709 = vmatpush3.bf16.msra.mxu0 %v8706_v8 }
 0x1c9   : > { %13222 = vst [vmem:[#allocation26_spill] sm:$0xff] %v13221_v46  ;;  %13223 = vst [vmem:[#allocation27_spill] sm:$0xff] %v10782_v41  ;;  %v10803_v52 = vsub.s32 %v10607_v42, %v1729_v12  ;;  %v1772_v11 = vshrl.u32 %v10709_v17, 4  ;;  %v10807_v14 = vadd.s32 192, %v10337_v24  ;;  %8711 = vmatprep.subr.bf16.mxu0 %v8710_v31  ;;  %vm2136_vm0 = vcmp.lt.s32.totalorder %v10771_v36, 0 }
 0x1ca   : > { %13224 = vst [vmem:[#allocation28_spill] sm:$0xff] %v10788_v1  ;;  %v10813_v57 = vsub.s32 %v10610_v9, %v1762_v7  ;;  %v1751_v8 = vmul.u32 24, %v1750_v32  ;;  %v1805_v59 = vshrl.u32 %v10738_v55, 4  ;;  %vm13227_vm15 = vcmp.ne.s32.totalorder %v10752_v48, 0 }
 0x1cb   : > { %13225 = vst [vmem:[#allocation29_spill] sm:$0xff] %v10803_v52  ;;  %v10817_v42 = vmul.u32.u64.low 2863311531, %v10792_v47  ;;  %v10818_v45 = vmul.u32.u64.high 2863311531, %v10792_v47, %v10817_v42  ;;  %vm13228_vm2 = vcmp.lt.s32.totalorder %v10752_v48, 0  ;;  %v13229_v17 = vmov 0 }
 0x1cc   : > { %13226 = vst [vmem:[#allocation30_spill] sm:$0xff] %v10813_v57  ;;  %vm10824_vm9 = vmand %vm13228_vm2, %vm13227_vm15  ;;  %v10829_v12 = vadd.s32 24, %v10752_v48  ;;  %v1784_v9 = vmul.u32 24, %v1783_v22  ;;  %v1794_v7 = vshrl.u32 %v10756_v29, 4  ;;  %v10833_v55 = vadd.s32 216, %v10337_v24  ;;  %8713 = vmatpush3.bf16.msra.mxu0 %v8710_v31 }
 0x1cd   : > { %v13230_v17 = vsel %vm10824_vm9, 4294967295, %v13229_v17  ;;  %vm13231_vm4 = vcmp.ne.s32.totalorder %v10771_v36, 0  ;;  %v13232_v32 = vmov 0  ;;  %v10842_v42 = vadd.s32 24, %v10771_v36 }
 0x1ce   : > { %vm10837_vm11 = vmand %vm2136_vm0, %vm13231_vm4  ;;  %v10845_v16 = vadd.s32 24, %v10782_v41  ;;  %v1773_v22 = vmul.u32 24, %v1772_v11  ;;  %vm13235_vm15 = vcmp.ne.s32.totalorder %v10782_v41, 0  ;;  %vm13236_vm1 = vcmp.lt.s32.totalorder %v10782_v41, 0 }
 0x1cf   : > { %v13233_v32 = vsel %vm10837_vm11, 4294967295, %v13232_v32  ;;  %vm10852_vm5 = vmand %vm13236_vm1, %vm13235_vm15  ;;  %v13237_v29 = vmov 0  ;;  %vm2138_vm0 = vcmp.lt.s32.totalorder %v10803_v52, 0  ;;  %v10862_v0 = vadd.s32 208, %v10337_v24 }
 0x1d0   : > { %13234 = vst [vmem:[#allocation31_spill] sm:$0xff] %v10845_v16  ;;  %v13238_v29 = vsel %vm10852_vm5, 4294967295, %v13237_v29  ;;  %v10858_v31 = vmul.u32.u64.low 2863311531, %v10807_v14  ;;  %v10859_v49 = vmul.u32.u64.high 2863311531, %v10807_v14, %v10858_v31  ;;  %vm2093_vm4 = vcmp.ne.s32.totalorder %v10813_v57, 0 }
 0x1d1   : > { %13239 = vst [vmem:[#allocation32_spill] sm:$0xff] %v13238_v29  ;;  %vm2141_vm2 = vcmp.lt.s32.totalorder %v10813_v57, 0  ;;  %v10867_v11 = vsub.s32 %v10654_v3, %v1751_v8  ;;  %v1806_v43 = vmul.u32 24, %v1805_v59  ;;  %v10870_v33 = vsub.s32 %v10662_v30, %v1784_v9  ;;  %v4182_v8 = vld [vmem:[#allocation8 + $0x220] sm:$0xff]  ;;  %v4183_v59 = vld [vmem:[#allocation8 + $0x228] sm:$0xff] }
 0x1d2   : > { %v1795_v4 = vmul.u32 24, %v1794_v7  ;;  %v10873_v46 = vmul.u32.u64.low 2863311531, %v10833_v55  ;;  %v10874_v1 = vmul.u32.u64.high 2863311531, %v10833_v55, %v10873_v46  ;;  %v10889_v9 = vsub.s32 %v10667_v20, %v1773_v22  ;;  %vm10913_vm5 = vmand %vm2141_vm2, %vm2093_vm4 }
 0x1d3   : > { %13240 = vst [vmem:[#allocation33_spill] sm:$0xff] %v10867_v11  ;;  %13241 = vst [vmem:[#allocation34_spill] sm:$0xff] %v10870_v33  ;;  %vm13243_vm1 = vcmp.ne.s32.totalorder %v10803_v52, 0  ;;  %v13244_v46 = vmov 0  ;;  %v10900_v7 = vadd.s32 24, %v10803_v52  ;;  %v10903_v3 = vadd.s32 24, %v10813_v57 }
 0x1d4   : > { %13242 = vst [vmem:[#allocation35_spill] sm:$0xff] %v10889_v9  ;;  %vm10895_vm15 = vmand %vm2138_vm0, %vm13243_vm1  ;;  %v10906_v30 = vmul.u32.u64.low 2863311531, %v10862_v0  ;;  %v10907_v31 = vmul.u32.u64.high 2863311531, %v10862_v0, %v10906_v30  ;;  %v13248_v20 = vmov 0  ;;  %vm2092_vm0 = vcmp.ne.s32.totalorder %v10867_v11, 0 }
 0x1d5   : > { %v13245_v46 = vsel %vm10895_vm15, 4294967295, %v13244_v46  ;;  %13246 = vst [vmem:[#allocation36_spill] sm:$0xff] %v10900_v7  ;;  %13247 = vst [vmem:[#allocation37_spill] sm:$0xff] %v10903_v3  ;;  %v13249_v20 = vsel %vm10913_vm5, 4294967295, %v13248_v20  ;;  %vm2140_vm1 = vcmp.lt.s32.totalorder %v10867_v11, 0  ;;  %v10920_v22 = vsub.s32 %v10670_v21, %v1806_v43 }
 0x1d6   : > { %13250 = vst [vmem:[#allocation38_spill] sm:$0xff] %v13249_v20  ;;  %v1827_v41 = vshrl.u32 %v10818_v45, 4  ;;  %vm2095_vm11 = vcmp.ne.s32.totalorder %v10870_v33, 0  ;;  %v10925_v30 = vpack.c.bf16 %v4183_v59, %v4182_v8  ;;  %v10928_v16 = vsub.s32 %v10696_v15, %v1795_v4  ;;  %vm10948_vm9 = vmand %vm2140_vm1, %vm2092_vm0 }
 0x1d7   : > { %13251 = vst [vmem:[#allocation39_spill] sm:$0xff] %v10920_v22  ;;  %v10931_v29 = vadd.s32 24, %v10867_v11  ;;  %v10936_v21 = vadd.s32 232, %v10337_v24  ;;  %v13254_v4 = vmov 0  ;;  %v10953_v45 = vadd.s32 24, %v10870_v33 }
 0x1d8   : > { %13252 = vst [vmem:[#allocation40_spill] sm:$0xff] %v10928_v16  ;;  %v13255_v4 = vsel %vm10948_vm9, 4294967295, %v13254_v4  ;;  %v1816_v8 = vshrl.u32 %v10859_v49, 4  ;;  %v13258_v59 = vsel %vm10448_vm6, %v10399_v51, %v10381_v35  ;;  %vm13261_vm0 = vcmp.lt.s32.totalorder %v10870_v33, 0 }
 0x1d9   : > { %13253 = vst [vmem:[#allocation41_spill] sm:$0xff] %v10931_v29  ;;  %13256 = vst [vmem:[#allocation42_spill] sm:$0xff] %v13255_v4  ;;  %vm10961_vm4 = vcmp.lt.s32.totalorder %v13258_v59, 16  ;;  %v13262_v15 = vmov 0  ;;  %v10974_v57 = vadd.s32 24, %v10889_v9  ;;  %vm2145_vm5 = vcmp.lt.s32.totalorder %v10920_v22, 0 }
 0x1da   : > { %13257 = vst [vmem:[#allocation43_spill] sm:$0xff] %v10953_v45  ;;  %vm10969_vm1 = vmand %vm13261_vm0, %vm2095_vm11  ;;  %v1828_v35 = vmul.u32 24, %v1827_v41  ;;  %v13266_v51 = vsel %vm10462_vm10, %v10410_v61, %v10388_v40  ;;  %vm13269_vm11 = vcmp.ne.s32.totalorder %v10889_v9, 0  ;;  %vm13270_vm0 = vcmp.lt.s32.totalorder %v10889_v9, 0  ;;  %v4184_v41 = vld [vmem:[#allocation8 + $0x230] sm:$0xff]  ;;  %v4185_v40 = vld [vmem:[#allocation8 + $0x238] sm:$0xff] }
 0x1db   : > { %v13263_v15 = vsel %vm10969_vm1, 4294967295, %v13262_v15  ;;  %13265 = vst [vmem:[#allocation45_spill] sm:$0xff] %v10974_v57  ;;  %vm10983_vm6 = vcmp.lt.s32.totalorder %v13266_v51, 16  ;;  %vm10991_vm15 = vmand %vm13270_vm0, %vm13269_vm11  ;;  %v13271_v49 = vmov 0  ;;  %vm2096_vm2 = vcmp.ne.s32.totalorder %v10928_v16, 0 }
 0x1dc   : > { %13264 = vst [vmem:[#allocation44_spill] sm:$0xff] %v13263_v15  ;;  %v13272_v49 = vsel %vm10991_vm15, 4294967295, %v13271_v49  ;;  %vm2144_vm8 = vcmp.lt.s32.totalorder %v10928_v16, 0  ;;  %v1849_v26 = vshrl.u32 %v10874_v1, 4  ;;  %v10999_v61 = vadd.s32 224, %v10337_v24 }
 0x1dd   : > { %13273 = vst [vmem:[#allocation46_spill] sm:$0xff] %v13272_v49  ;;  %v11006_v51 = vadd.s32 24, %v10920_v22  ;;  %v11009_v3 = vmul.u32.u64.low 2863311531, %v10936_v21  ;;  %v11010_v20 = vmul.u32.u64.high 2863311531, %v10936_v21, %v11009_v3  ;;  %vm13275_vm10 = vcmp.ne.s32.totalorder %v10920_v22, 0  ;;  %vm11048_vm0 = vmand %vm2144_vm8, %vm2096_vm2 }
 0x1de   : > { %vm11018_vm11 = vmand %vm2145_vm5, %vm13275_vm10  ;;  %v13276_v52 = vmov 0  ;;  %v11023_v59 = vadd.s32 24, %v10928_v16  ;;  %v1817_v11 = vmul.u32 24, %v1816_v8  ;;  %v1838_v29 = vshrl.u32 %v10907_v31, 4  ;;  %v11029_v3 = vld [vmem:[%s13075_s2] ss:$0 sm:$0xff] }
 0x1df   : > { %13274 = vst [vmem:[#allocation47_spill] sm:$0xff] %v11006_v51  ;;  %v13277_v52 = vsel %vm11018_vm11, 4294967295, %v13276_v52  ;;  %v13280_v1 = vsel %vm10475_vm12, %v10439_v18, %v10406_v56  ;;  %v13283_v31 = vmov 0  ;;  %v11053_v34 = vsub.s32 %v10792_v47, %v1828_v35 }
 0x1e0   : > { %13278 = vst [vmem:[#allocation48_spill] sm:$0xff] %v13277_v52  ;;  %13279 = vst [vmem:[#allocation49_spill] sm:$0xff] %v11023_v59  ;;  %vm11036_vm5 = vcmp.lt.s32.totalorder %v13280_v1, 16  ;;  %v13284_v31 = vsel %vm11048_vm0, 4294967295, %v13283_v31  ;;  %v11055_v56 = vpack.c.bf16 %v4185_v40, %v4184_v41  ;;  %v11058_v18 = vadd.s32 248, %v10337_v24 }
 0x1e1   : > { %13285 = vst [vmem:[#allocation50_spill] sm:$0xff] %v13284_v31  ;;  %v13286_v1 = vsel %vm10493_vm13, %v10455_v25, %v10417_v5  ;;  %v1850_v9 = vmul.u32 24, %v1849_v26  ;;  %v11070_v57 = vmul.u32.u64.low 2863311531, %v10999_v61  ;;  %v11071_v49 = vmul.u32.u64.high 2863311531, %v10999_v61, %v11070_v57 }
 0x1e2   : > { %vm11065_vm12 = vcmp.lt.s32.totalorder %v13286_v1, 16  ;;  %v11074_v47 = vadd.s32 240, %v10337_v24  ;;  %v11081_v5 = vadd.s32 264, %v10337_v24  ;;  %v11084_v25 = vadd.s32 256, %v10337_v24 }
 0x1e3   : > { %v11087_v26 = vadd.s32 280, %v10337_v24  ;;  %v11095_v1 = vsub.s32 %v10807_v14, %v1817_v11  ;;  %v1839_v63 = vmul.u32 24, %v1838_v29  ;;  %v13289_v51 = vsel %vm10513_vm14, %v10480_v37, %v10419_v6 }
 0x1e4   : > { %vm11103_vm13 = vcmp.lt.s32.totalorder %v13289_v51, 16  ;;  %v13292_v44 = vsel %vm10558_vm3, %v10537_v58, %v10483_v38  ;;  %v11122_v6 = vadd.s32 24, %v11053_v34  ;;  %v11125_v37 = vsub.s32 %v10833_v55, %v1850_v9 }
 0x1e5   : > { %vm11117_vm10 = vcmp.lt.s32.totalorder %v13292_v44, 16  ;;  %v11128_v11 = vadd.s32 296, %v10337_v24  ;;  %v1871_v2 = vshrl.u32 %v11010_v20, 4  ;;  %v11140_v55 = vsub.s32 %v10862_v0, %v1839_v63 }
 0x1e6   : > { %v11156_v0 = vadd.s32 24, %v11095_v1  ;;  %vm13309_vm14 = vcmp.lt.s32.totalorder %v11053_v34, 0  ;;  %v11358_v13 = vadd.s32 320, %v10337_v24 }
 0x1e7   : > { %13295 = vst [vmem:[#allocation51_spill] sm:$0xff] %v11128_v11  ;;  %v1872_v23 = vmul.u32 24, %v1871_v2  ;;  %v13316_v2 = vld [vmem:[#allocation24_spill] sm:$0xff] }
 0x222   : > { %v7548_v35 = vpop.f32.mrb[0].mxu0 }
 0x223   : > { %v1392_v57 = vadd.f32 %v7548_v35, %v11029_v3  ;;  %v1097_v41 = vpop.f32.mrb[1].mxu0  ;;  %v11110_v35 = vadd.s32 272, %v10337_v24 }
 0x224   : > { %v1391_v22 = vadd.f32 %v11029_v3, %v1097_v41  ;;  %v11132_v41 = vmul.u32.u64.low 2863311531, %v11058_v18  ;;  %v11133_v38 = vmul.u32.u64.high 2863311531, %v11058_v18, %v11132_v41 }
 0x225   : > { %v1440_v14 = vmax.f32 %v1392_v57, 0.0  ;;  %v13297_v41 = vld [vmem:[#allocation14_spill] sm:$0xff] }
 0x226   : > { %v1439_v51 = vmax.f32 %v1391_v22, 0.0  ;;  %v7551_v57 = vpop.f32.mrb[2].mxu0  ;;  %v13296_v22 = vld [vmem:[#allocation16_spill] sm:$0xff] }
 0x227   : > { %v2459_v58 = vsel %vm10961_vm4, %v1440_v14, 0.0  ;;  %v1394_v44 = vadd.f32 %v7551_v57, %v11029_v3  ;;  %v1107_v40 = vpop.f32.mrb[3].mxu0  ;;  %v13298_v16 = vsel %vm10574_vm7, %v13296_v22, %v13297_v41  ;;  %v13301_v57 = vld [vmem:[#allocation19_spill] sm:$0xff]  ;;  %vm13308_vm7 = vcmp.ne.s32.totalorder %v11053_v34, 0 }
 0x228   : > { %2507 = vst [vmem:[#allocation2 + $0x21] sm:$0xff] %v2459_v58  ;;  %v2458_v9 = vsel %vm10983_vm6, %v1439_v51, 0.0  ;;  %v1393_v20 = vadd.f32 %v11029_v3, %v1107_v40  ;;  %vm11150_vm3 = vcmp.lt.s32.totalorder %v13298_v16, 16  ;;  %vm13302_vm2 = vnez %v13301_v57  ;;  %v13303_v58 = vld [vmem:[#allocation17_spill] sm:$0xff]  ;;  %v13304_v40 = vld [vmem:[#allocation15_spill] sm:$0xff]  ;;  %9594 = vmatmul.mubr.msk.f32.gmra.mrb[50].mxu0 %vm10983_vm6, %v1439_v51  ;;  %vm11173_vm0 = vmand %vm13309_vm14, %vm13308_vm7 }
 0x229   : > { %2506 = vst [vmem:[#allocation2 + $0x19] sm:$0xff] %v2458_v9  ;;  %v1442_v63 = vmax.f32 %v1394_v44, 0.0  ;;  %v13305_v31 = vsel %vm13302_vm2, %v13303_v58, %v13304_v40  ;;  %v1860_v44 = vshrl.u32 %v11071_v49, 4  ;;  %9595 = vmatprep.mubr.msk.f32.mxu0 %vm10961_vm4, %v1440_v14  ;;  %v4187_v51 = vld [vmem:[#allocation8 + $0x248] sm:$0xff]  ;;  %vm13312_vm14 = vcmp.ne.s32.totalorder %v11095_v1, 0 }
 0x22a   : > { %vm11163_vm8 = vcmp.lt.s32.totalorder %v13305_v31, 16  ;;  %v11179_v9 = vmul.u32.u64.low 2863311531, %v11074_v47  ;;  %v11180_v22 = vmul.u32.u64.high 2863311531, %v11074_v47, %v11179_v9  ;;  %v4186_v31 = vld [vmem:[#allocation8 + $0x240] sm:$0xff]  ;;  %v1441_v41 = vmax.f32 %v1393_v20, 0.0  ;;  %v7554_v57 = vpop.f32.mrb[4].mxu0 }
 0x22b   : > { %v2461_v58 = vsel %vm11036_vm5, %v1442_v63, 0.0  ;;  %v1396_v49 = vadd.f32 %v7554_v57, %v11029_v3  ;;  %v1117_v40 = vpop.f32.mrb[5].mxu0  ;;  %vm13313_vm7 = vcmp.lt.s32.totalorder %v11095_v1, 0  ;;  %v13314_v20 = vmov 0  ;;  %v13318_v9 = vld [vmem:[#allocation21_spill] sm:$0xff]  ;;  %v13319_v57 = vld [vmem:[#allocation18_spill] sm:$0xff] }
 0x22c   : > { %vm11193_vm11 = vmand %vm13313_vm7, %vm13312_vm14  ;;  %2509 = vst [vmem:[#allocation2 + $0x31] sm:$0xff] %v2461_v58  ;;  %v2460_v43 = vsel %vm11065_vm12, %v1441_v41, 0.0  ;;  %v1395_v14 = vadd.f32 %v11029_v3, %v1117_v40  ;;  %vm13317_vm6 = vnez %v13316_v2  ;;  %v11216_v58 = vadd.s32 24, %v11125_v37  ;;  %v13324_v40 = vld [vmem:[#allocation22_spill] sm:$0xff]  ;;  %v13325_v2 = vld [vmem:[#allocation20_spill] sm:$0xff]  ;;  %9596 = vmatmul.mubr.msk.f32.gmra.mrb[52].mxu0 %vm11065_vm12, %v1441_v41 }
 0x22d   : > { %v13315_v20 = vsel %vm11193_vm11, 4294967295, %v13314_v20  ;;  %v13320_v45 = vsel %vm13317_vm6, %v13318_v9, %v13319_v57  ;;  %2508 = vst [vmem:[#allocation2 + $0x29] sm:$0xff] %v2460_v43  ;;  %v1444_v11 = vmax.f32 %v1396_v49, 0.0  ;;  %vm13323_vm14 = vnez %v13205_v27  ;;  %9597 = vmatprep.mubr.msk.f32.mxu0 %vm11036_vm5, %v1442_v63 }
 0x22e   : > { %vm11207_vm15 = vcmp.lt.s32.totalorder %v13320_v45, 16  ;;  %v13326_v7 = vsel %vm13323_vm14, %v13324_v40, %v13325_v2  ;;  %vm13329_vm7 = vcmp.ne.s32.totalorder %v11125_v37, 0  ;;  %vm13330_vm2 = vcmp.lt.s32.totalorder %v11125_v37, 0  ;;  %v7557_v57 = vpop.f32.mrb[6].mxu0 }
 0x22f   : > { %vm11223_vm6 = vcmp.lt.s32.totalorder %v13326_v7, 16  ;;  %vm11233_vm4 = vmand %vm13330_vm2, %vm13329_vm7  ;;  %v13331_v9 = vmov 0  ;;  %v11238_v27 = vadd.s32 24, %v11140_v55  ;;  %v1861_v49 = vmul.u32 24, %v1860_v44 }
 0x230   : > { %v13332_v9 = vsel %vm11233_vm4, 4294967295, %v13331_v9  ;;  %v11240_v43 = vpack.c.bf16 %v4187_v51, %v4186_v31  ;;  %v1443_v7 = vmax.f32 %v1395_v14, 0.0  ;;  %vm13333_vm12 = vcmp.ne.s32.totalorder %v11140_v55, 0  ;;  %v1127_v51 = vpop.f32.mrb[7].mxu0  ;;  %v3712_v8 = vld [vmem:[#allocation2 + $0x20] sm:$0xff] }
 0x231   : > { %vm13334_vm2 = vcmp.lt.s32.totalorder %v11140_v55, 0  ;;  %v13335_v41 = vmov 0  ;;  %v11257_v44 = vsub.s32 %v10936_v21, %v1872_v23  ;;  %v11260_v31 = vadd.s32 288, %v10337_v24  ;;  %v3711_v23 = vld [vmem:[#allocation2 + $0x18] sm:$0xff] }
 0x232   : > { %vm11252_vm14 = vmand %vm13334_vm2, %vm13333_vm12  ;;  %v2463_v33 = vsel %vm11103_vm13, %v1444_v11, 0.0  ;;  %v1398_v63 = vadd.f32 %v7557_v57, %v11029_v3  ;;  %v1893_v14 = vshrl.u32 %v11133_v38, 4  ;;  %v11267_v40 = vadd.s32 312, %v10337_v24  ;;  %7962 = vmatprep.mubr.f32.mxu1 %v3711_v23  ;;  %9598 = vmatmul.mubr.msk.f32.gmra.mrb[54].mxu0 %vm11117_vm10, %v1443_v7 }
 0x233   : > { %v13336_v41 = vsel %vm11252_vm14, 4294967295, %v13335_v41  ;;  %13337 = vst [vmem:[#allocation16_spill] sm:$0xff] %v11257_v44  ;;  %2511 = vst [vmem:[#allocation2 + $0x41] sm:$0xff] %v2463_v33  ;;  %v2462_v2 = vsel %vm11117_vm10, %v1443_v7, 0.0  ;;  %v1397_v21 = vadd.f32 %v11029_v3, %v1127_v51  ;;  %vm13338_vm5 = vnez %v13209_v50  ;;  %7963 = vmatmul.mubr.f32.vlgmr.msra.gmra.mrb[0].mxu1 %v3712_v8  ;;  %9599 = vmatprep.mubr.msk.f32.mxu0 %vm11103_vm13, %v1444_v11  ;;  %v13347_v7 = vld [vmem:[#allocation13_spill] sm:$0xff] }
 0x234   : > { %v13339_v4 = vsel %vm13338_vm5, %v10658_v54, %v10604_v62  ;;  %v11286_v33 = vadd.s32 304, %v10337_v24  ;;  %2510 = vst [vmem:[#allocation2 + $0x39] sm:$0xff] %v2462_v2  ;;  %v1446_v51 = vmax.f32 %v1398_v63, 0.0  ;;  %vm13342_vm12 = vnez %v13212_v60  ;;  %v7560_v2 = vpop.f32.mrb[8].mxu0  ;;  %8781 = vmatpush3.bf16.msra.mxu1 %v13347_v7  ;;  %v3713_v8 = vld [vmem:[#allocation2 + $0x28] sm:$0xff] }
 0x235   : > { %vm11277_vm7 = vcmp.lt.s32.totalorder %v13339_v4, 16  ;;  %v13343_v62 = vsel %vm13342_vm12, %v10673_v53, %v10635_v10  ;;  %v11304_v4 = vsub.s32 %v10999_v61, %v1861_v49  ;;  %v1882_v60 = vshrl.u32 %v11180_v22, 4  ;;  %v1137_v49 = vpop.f32.mrb[9].mxu0  ;;  %7965 = vmatprep.mubr.f32.mxu1 %v3713_v8  ;;  %v13355_v7 = vld [vmem:[#allocation25_spill] sm:$0xff] }
 0x236   : > { %vm11293_vm2 = vcmp.lt.s32.totalorder %v13343_v62, 16  ;;  %v1445_v63 = vmax.f32 %v1397_v21, 0.0  ;;  %v11311_v10 = vmul.u32.u64.low 2863311531, %v11081_v5  ;;  %v11312_v53 = vmul.u32.u64.high 2863311531, %v11081_v5, %v11311_v10  ;;  %v3714_v21 = vld [vmem:[#allocation2 + $0x30] sm:$0xff] }
 0x237   : > { %13346 = vst [vmem:[#allocation14_spill] sm:$0xff] %v11304_v4  ;;  %v2465_v29 = vsel %vm11150_vm3, %v1446_v51, 0.0  ;;  %v1400_v61 = vadd.f32 %v7560_v2, %v11029_v3  ;;  %v1894_v22 = vmul.u32 24, %v1893_v14  ;;  %v1399_v11 = vadd.f32 %v11029_v3, %v1137_v49  ;;  %v13352_v2 = vld [vmem:[#allocation28_spill] sm:$0xff]  ;;  %v13353_v49 = vld [vmem:[#allocation26_spill] sm:$0xff]  ;;  %7966 = vmatmul.mubr.f32.gmra.mrb[2].mxu1 %v3714_v21 }
 0x238   : > { %2513 = vst [vmem:[#allocation2 + $0x51] sm:$0xff] %v2465_v29  ;;  %v2464_v52 = vsel %vm11163_vm8, %v1445_v63, 0.0  ;;  %vm13348_vm13 = vnez %v13216_v28  ;;  %8783 = vmatprep.subr.bf16.mxu1 %v13352_v2  ;;  %v11333_v14 = vmul.u32.u64.low 2863311531, %v11084_v25  ;;  %v11334_v10 = vmul.u32.u64.high 2863311531, %v11084_v25, %v11333_v14  ;;  %v13356_v28 = vld [vmem:[#allocation23_spill] sm:$0xff]  ;;  %9600 = vmatmul.mubr.msk.f32.gmra.mrb[56].mxu0 %vm11163_vm8, %v1445_v63 }
 0x239   : > { %v13349_v23 = vsel %vm13348_vm13, %v10734_v39, %v10643_v19  ;;  %2512 = vst [vmem:[#allocation2 + $0x49] sm:$0xff] %v2464_v52  ;;  %v1448_v29 = vmax.f32 %v1400_v61, 0.0  ;;  %vm13354_vm10 = vnez %v13353_v49  ;;  %vm2102_vm13 = vcmp.ne.s32.totalorder %v11304_v4, 0  ;;  %v7563_v61 = vpop.f32.mrb[10].mxu0  ;;  %9601 = vmatprep.mubr.msk.f32.mxu0 %vm11150_vm3, %v1446_v51  ;;  %8785 = vmatpush3.bf16.msra.mxu1 %v13352_v2  ;;  %v4189_v14 = vld [vmem:[#allocation8 + $0x258] sm:$0xff] }
 0x23a   : > { %vm11327_vm12 = vcmp.lt.s32.totalorder %v13349_v23, 16  ;;  %v13357_v50 = vsel %vm13354_vm10, %v13355_v7, %v13356_v28  ;;  %vm2150_vm14 = vcmp.lt.s32.totalorder %v11304_v4, 0  ;;  %v1883_v39 = vmul.u32 24, %v1882_v60  ;;  %v4188_v23 = vld [vmem:[#allocation8 + $0x250] sm:$0xff]  ;;  %8787 = vmatprep.subr.bf16.mxu1 %v10925_v30 }
 0x23b   : > { %vm11341_vm5 = vcmp.lt.s32.totalorder %v13357_v50, 16  ;;  %v1447_v52 = vmax.f32 %v1399_v11, 0.0  ;;  %v11352_v8 = vadd.s32 24, %v11257_v44  ;;  %v11355_v50 = vadd.s32 328, %v10337_v24  ;;  %v1147_v11 = vpop.f32.mrb[11].mxu0  ;;  %v3715_v7 = vld [vmem:[#allocation2 + $0x38] sm:$0xff]  ;;  %vm11395_vm4 = vmand %vm2150_vm14, %vm2102_vm13 }
 0x23c   : > { %v2467_v63 = vsel %vm11207_vm15, %v1448_v29, 0.0  ;;  %v1402_v60 = vadd.f32 %v7563_v61, %v11029_v3  ;;  %vm13360_vm8 = vcmp.ne.s32.totalorder %v11257_v44, 0  ;;  %vm13361_vm3 = vcmp.lt.s32.totalorder %v11257_v44, 0  ;;  %v3716_v28 = vld [vmem:[#allocation2 + $0x40] sm:$0xff]  ;;  %7968 = vmatprep.mubr.f32.mxu1 %v3715_v7  ;;  %v7566_v7 = vpop.f32.mrb[12].mxu0 }
 0x23d   : > { %vm11368_vm10 = vmand %vm13361_vm3, %vm13360_vm8  ;;  %v11373_v51 = vadd.s32 24, %v11304_v4  ;;  %v11376_v21 = vsub.s32 %v11058_v18, %v1894_v22  ;;  %2515 = vst [vmem:[#allocation2 + $0x61] sm:$0xff] %v2467_v63  ;;  %v2466_v2 = vsel %vm11223_vm6, %v1447_v52, 0.0  ;;  %v1401_v49 = vadd.f32 %v11029_v3, %v1147_v11  ;;  %9602 = vmatmul.mubr.msk.f32.gmra.mrb[58].mxu0 %vm11223_vm6, %v1447_v52  ;;  %7969 = vmatmul.mubr.f32.gmra.mrb[4].mxu1 %v3716_v28  ;;  %v13380_v28 = vld [vmem:[#allocation27_spill] sm:$0xff] }
 0x23e   : > { %vm13365_vm8 = vnez %v13230_v17  ;;  %v13369_v18 = vmov 0  ;;  %v11400_v22 = vmul.u32.u64.low 2863311531, %v11087_v26  ;;  %v11401_v17 = vmul.u32.u64.high 2863311531, %v11087_v26, %v11400_v22  ;;  %2514 = vst [vmem:[#allocation2 + $0x59] sm:$0xff] %v2466_v2  ;;  %9603 = vmatprep.mubr.msk.f32.mxu0 %vm11207_vm15, %v1448_v29  ;;  %8789 = vmatpush3.bf16.msra.mxu1 %v10925_v30 }
 0x23f   : > { %13364 = vst [vmem:[#allocation19_spill] sm:$0xff] %v11373_v51  ;;  %v13366_v61 = vsel %vm13365_vm8, %v10829_v12, %v10752_v48  ;;  %v13370_v18 = vsel %vm11395_vm4, 4294967295, %v13369_v18  ;;  %v1450_v48 = vmax.f32 %v1402_v60, 0.0  ;;  %vm13372_vm8 = vnez %v13233_v32  ;;  %8791 = vmatprep.subr.bf16.mxu1 %v11055_v56 }
 0x240   : > { %vm11386_vm3 = vcmp.lt.s32.totalorder %v13366_v61, 16  ;;  %13371 = vst [vmem:[#allocation17_spill] sm:$0xff] %v13370_v18  ;;  %v13373_v12 = vsel %vm13372_vm8, %v10842_v42, %v10771_v36  ;;  %v11415_v11 = vsub.s32 %v11074_v47, %v1883_v39  ;;  %v1449_v60 = vmax.f32 %v1401_v49, 0.0  ;;  %v1157_v39 = vpop.f32.mrb[13].mxu0  ;;  %v3717_v52 = vld [vmem:[#allocation2 + $0x48] sm:$0xff]  ;;  %v13379_v49 = vld [vmem:[#allocation31_spill] sm:$0xff] }
 0x241   : > { %vm11408_vm11 = vcmp.lt.s32.totalorder %v13373_v12, 16  ;;  %v11418_v61 = vmul.u32.u64.low 2863311531, %v11110_v35  ;;  %v11419_v2 = vmul.u32.u64.high 2863311531, %v11110_v35, %v11418_v61  ;;  %v1915_v32 = vshrl.u32 %v11312_v53, 4  ;;  %7971 = vmatprep.mubr.f32.mxu1 %v3717_v52  ;;  %v7569_v52 = vpop.f32.mrb[14].mxu0  ;;  %v13409_v36 = vld [vmem:[#allocation33_spill] sm:$0xff] }
 0x242   : > { %13376 = vst [vmem:[#allocation15_spill] sm:$0xff] %v11415_v11  ;;  %v11428_v42 = vpack.c.bf16 %v4189_v14, %v4188_v23  ;;  %v2469_v47 = vsel %vm11277_vm7, %v1450_v48, 0.0  ;;  %v1404_v45 = vadd.f32 %v7566_v7, %v11029_v3  ;;  %v2468_v53 = vsel %vm11293_vm2, %v1449_v60, 0.0  ;;  %v3718_v23 = vld [vmem:[#allocation2 + $0x50] sm:$0xff]  ;;  %v13377_v14 = vld [vmem:[#allocation32_spill] sm:$0xff]  ;;  %9604 = vmatmul.mubr.msk.f32.gmra.mrb[60].mxu0 %vm11293_vm2, %v1449_v60  ;;  %8793 = vmatpush3.bf16.msra.mxu1 %v11055_v56 }
 0x243   : > { %2517 = vst [vmem:[#allocation2 + $0x71] sm:$0xff] %v2469_v47  ;;  %v1403_v29 = vadd.f32 %v11029_v3, %v1157_v39  ;;  %vm13378_vm6 = vnez %v13377_v14  ;;  %v11454_v12 = vadd.s32 24, %v11376_v21  ;;  %2516 = vst [vmem:[#allocation2 + $0x69] sm:$0xff] %v2468_v53  ;;  %vm13384_vm8 = vnez %v13245_v46  ;;  %v13385_v7 = vld [vmem:[#allocation36_spill] sm:$0xff]  ;;  %v13386_v47 = vld [vmem:[#allocation29_spill] sm:$0xff]  ;;  %7972 = vmatmul.mubr.f32.gmra.mrb[6].mxu1 %v3718_v23  ;;  %9605 = vmatprep.mubr.msk.f32.mxu0 %vm11277_vm7, %v1450_v48 }
 0x244   : > { %v13381_v30 = vsel %vm13378_vm6, %v13379_v49, %v13380_v28  ;;  %v1452_v61 = vmax.f32 %v1404_v45, 0.0  ;;  %v13387_v39 = vsel %vm13384_vm8, %v13385_v7, %v13386_v47  ;;  %vm2104_vm13 = vcmp.ne.s32.totalorder %v11415_v11, 0  ;;  %v13390_v49 = vld [vmem:[#allocation51_spill] sm:$0xff]  ;;  %v1167_v7 = vpop.f32.mrb[15].mxu0  ;;  %v13397_v47 = vld [vmem:[#allocation38_spill] sm:$0xff]  ;;  %8795 = vmatprep.subr.bf16.mxu1 %v11240_v43 }
 0x245   : > { %vm11447_vm14 = vcmp.lt.s32.totalorder %v13381_v30, 16  ;;  %vm11461_vm6 = vcmp.lt.s32.totalorder %v13387_v39, 16  ;;  %v1904_v53 = vshrl.u32 %v11334_v10, 4  ;;  %v1451_v45 = vmax.f32 %v1403_v29, 0.0  ;;  %v3719_v29 = vld [vmem:[#allocation2 + $0x58] sm:$0xff]  ;;  %v3720_v23 = vld [vmem:[#allocation2 + $0x60] sm:$0xff] }
 0x246   : > { %v1916_v46 = vmul.u32 24, %v1915_v32  ;;  %v11473_v28 = vmul.u32.u64.low 2863311531, %v13390_v49  ;;  %v11474_v30 = vmul.u32.u64.high 2863311531, %v13390_v49, %v11473_v28  ;;  %v2471_v54 = vsel %vm11327_vm12, %v1452_v61, 0.0  ;;  %v13399_v39 = vld [vmem:[#allocation37_spill] sm:$0xff]  ;;  %7974 = vmatprep.mubr.f32.mxu1 %v3719_v29  ;;  %v7572_v44 = vpop.f32.mrb[16].mxu0  ;;  %8797 = vmatpush3.bf16.msra.mxu1 %v11240_v43 }
 0x247   : > { %v11479_v60 = vadd.f32 %v7569_v52, %v11029_v3  ;;  %vm13391_vm2 = vcmp.ne.s32.totalorder %v11376_v21, 0  ;;  %vm13392_vm8 = vcmp.lt.s32.totalorder %v11376_v21, 0  ;;  %v11491_v10 = vadd.s32 24, %v11415_v11  ;;  %2519 = vst [vmem:[#allocation2 + $0x81] sm:$0xff] %v2471_v54  ;;  %v13400_v52 = vld [vmem:[#allocation30_spill] sm:$0xff]  ;;  %9606 = vmatmul.mubr.msk.f32.gmra.mrb[62].mxu0 %vm11341_vm5, %v1451_v45  ;;  %7975 = vmatmul.mubr.f32.gmra.mrb[8].mxu1 %v3720_v23 }
 0x248   : > { %vm11486_vm15 = vmand %vm13392_vm8, %vm13391_vm2  ;;  %v11494_v48 = vadd.s32 344, %v10337_v24  ;;  %v2470_v32 = vsel %vm11341_vm5, %v1451_v45, 0.0  ;;  %v1405_v56 = vadd.f32 %v11029_v3, %v1167_v7  ;;  %vm13398_vm7 = vnez %v13397_v47  ;;  %9607 = vmatprep.mubr.msk.f32.mxu0 %vm11327_vm12, %v1452_v61  ;;  %v1177_v45 = vpop.f32.mrb[17].mxu0  ;;  %v3342_v61 = vld [vmem:[#allocation8 + $0x100] sm:$0xff]  ;;  %8799 = vmatprep.subr.bf16.mxu1 %v11428_v42 }
 0x249   : > { %13395 = vst [vmem:[#allocation24_spill] sm:$0xff] %v11491_v10  ;;  %v13401_v28 = vsel %vm13398_vm7, %v13399_v39, %v13400_v52  ;;  %vm13404_vm8 = vcmp.lt.s32.totalorder %v11415_v11, 0  ;;  %v11518_v7 = vmul.u32.u64.low 2863311531, %v11260_v31  ;;  %v11519_v47 = vmul.u32.u64.high 2863311531, %v11260_v31, %v11518_v7  ;;  %2518 = vst [vmem:[#allocation2 + $0x79] sm:$0xff] %v2470_v32  ;;  %v13424_v11 = vld [vmem:[#allocation45_spill] sm:$0xff] }
 0x24a   : > { %13396 = vst [vmem:[#allocation21_spill] sm:$0xff] %v11494_v48  ;;  %vm11504_vm2 = vcmp.lt.s32.totalorder %v13401_v28, 16  ;;  %vm11512_vm4 = vmand %vm13404_vm8, %vm2104_vm13  ;;  %v1454_v39 = vmax.f32 %v11479_v60, 0.0  ;;  %v13408_v28 = vld [vmem:[#allocation41_spill] sm:$0xff]  ;;  %v1905_v51 = vmul.u32 24, %v1904_v53  ;;  %v1937_v18 = vshrl.u32 %v11401_v17, 4  ;;  %8801 = vmatpush3.bf16.msra.mxu1 %v11428_v42 }
 0x24b   : > { %v13410_v48 = vsel %vm10948_vm9, %v13408_v28, %v13409_v36  ;;  %v1926_v32 = vshrl.u32 %v11419_v2, 4  ;;  %v4190_v7 = vld [vmem:[#allocation8 + $0x260] sm:$0xff]  ;;  %v4191_v60 = vld [vmem:[#allocation8 + $0x268] sm:$0xff]  ;;  %v1453_v29 = vmax.f32 %v1405_v56, 0.0  ;;  %v11542_v19 = vsub.s32 %v11081_v5, %v1916_v46  ;;  %v13416_v28 = vld [vmem:[#allocation43_spill] sm:$0xff] }
 0x24c   : > { %vm11527_vm7 = vcmp.lt.s32.totalorder %v13410_v48, 16  ;;  %v11545_v17 = vadd.s32 336, %v10337_v24  ;;  %v2473_v2 = vsel %vm11386_vm3, %v1454_v39, 0.0  ;;  %v11550_v53 = vadd.f32 %v7572_v44, %v11029_v3  ;;  %v3343_v46 = vld [vmem:[#allocation8 + $0x108] sm:$0xff]  ;;  %v3721_v56 = vld [vmem:[#allocation2 + $0x68] sm:$0xff]  ;;  %v13425_v52 = vld [vmem:[#allocation35_spill] sm:$0xff] }
 0x24d   : > { %v11558_v5 = vadd.s32 360, %v10337_v24  ;;  %2521 = vst [vmem:[#allocation2 + $0x91] sm:$0xff] %v2473_v2  ;;  %v2472_v48 = vsel %vm11408_vm11, %v1453_v29, 0.0  ;;  %v1407_v44 = vadd.f32 %v11029_v3, %v1177_v45  ;;  %v3722_v23 = vld [vmem:[#allocation2 + $0x70] sm:$0xff]  ;;  %v11573_v2 = vpack.c.bf16 %v3343_v46, %v3342_v61  ;;  %7977 = vmatprep.mubr.f32.mxu1 %v3721_v56  ;;  %9608 = vmatmul.mubr.msk.f32.gmra.mrb[64].mxu0 %vm11408_vm11, %v1453_v29  ;;  %v4192_v61 = vld [vmem:[#allocation8 + $0x270] sm:$0xff]  ;;  %v13429_v29 = vld [vmem:[#allocation48_spill] sm:$0xff] }
 0x24e   : > { %13413 = vst [vmem:[#allocation18_spill] sm:$0xff] %v11545_v17  ;;  %v13417_v36 = vld [vmem:[#allocation34_spill] sm:$0xff]  ;;  %2520 = vst [vmem:[#allocation2 + $0x89] sm:$0xff] %v2472_v48  ;;  %v1456_v17 = vmax.f32 %v11550_v53, 0.0  ;;  %v4193_v53 = vld [vmem:[#allocation8 + $0x278] sm:$0xff]  ;;  %v7575_v48 = vpop.f32.mrb[18].mxu0  ;;  %7978 = vmatmul.mubr.f32.gmra.mrb[10].mxu1 %v3722_v23  ;;  %9609 = vmatprep.mubr.msk.f32.mxu0 %vm11386_vm3, %v1454_v39  ;;  %vm13430_vm11 = vnez %v13429_v29 }
 0x24f   : > { %13414 = vst [vmem:[#allocation22_spill] sm:$0xff] %v11558_v5  ;;  %v13418_v62 = vsel %vm10969_vm1, %v13416_v28, %v13417_v36  ;;  %v8802_v5 = vpack.c.bf16 %v4191_v60, %v4190_v7  ;;  %13421 = vst [vmem:[#allocation20_spill] sm:$0xff] %v11573_v2  ;;  %v13422_v45 = vld [vmem:[#allocation46_spill] sm:$0xff]  ;;  %v11588_v7 = vsub.s32 %v11084_v25, %v1905_v51  ;;  %v1938_v60 = vmul.u32 24, %v1937_v18  ;;  %v1187_v18 = vpop.f32.mrb[19].mxu0  ;;  %v13432_v23 = vld [vmem:[#allocation39_spill] sm:$0xff] }
 0x250   : > { %vm11568_vm9 = vcmp.lt.s32.totalorder %v13418_v62, 16  ;;  %vm13423_vm5 = vnez %v13422_v45  ;;  %v1927_v62 = vmul.u32 24, %v1926_v32  ;;  %v1455_v46 = vmax.f32 %v1407_v44, 0.0  ;;  %8715 = vmatprep.subr.bf16.mxu0 %v11573_v2  ;;  %v3723_v39 = vld [vmem:[#allocation2 + $0x78] sm:$0xff]  ;;  %v3724_v32 = vld [vmem:[#allocation2 + $0x80] sm:$0xff] }
 0x251   : > { %v13426_v10 = vsel %vm13423_vm5, %v13424_v11, %v13425_v52  ;;  %v1959_v11 = vshrl.u32 %v11474_v30, 4  ;;  %v2475_v25 = vsel %vm11447_vm14, %v1456_v17, 0.0  ;;  %v1410_v51 = vadd.f32 %v7575_v48, %v11029_v3  ;;  %v13431_v44 = vld [vmem:[#allocation47_spill] sm:$0xff]  ;;  %8803 = vmatprep.subr.bf16.mxu1 %v8802_v5  ;;  %7980 = vmatprep.mubr.f32.mxu1 %v3723_v39  ;;  %v7578_v39 = vpop.f32.mrb[20].mxu0 }
 0x252   : > { %vm11581_vm12 = vcmp.lt.s32.totalorder %v13426_v10, 16  ;;  %v11594_v10 = vmul.u32.u64.low 2863311531, %v11267_v40  ;;  %v11595_v56 = vmul.u32.u64.high 2863311531, %v11267_v40, %v11594_v10  ;;  %vm2107_vm1 = vcmp.ne.s32.totalorder %v11542_v19, 0  ;;  %2523 = vst [vmem:[#allocation2 + $0xa1] sm:$0xff] %v2475_v25  ;;  %v13438_v25 = vld [vmem:[#allocation49_spill] sm:$0xff]  ;;  %9610 = vmatmul.mubr.msk.f32.gmra.mrb[66].mxu0 %vm11461_vm6, %v1455_v46  ;;  %7981 = vmatmul.mubr.f32.gmra.mrb[12].mxu1 %v3724_v32 }
 0x253   : > { %v11603_v63 = vadd.s32 352, %v10337_v24  ;;  %v2474_v38 = vsel %vm11461_vm6, %v1455_v46, 0.0  ;;  %v1409_v30 = vadd.f32 %v11029_v3, %v1187_v18  ;;  %v13433_v28 = vsel %vm13430_vm11, %v13431_v44, %v13432_v23  ;;  %v13436_v10 = vld [vmem:[#allocation50_spill] sm:$0xff]  ;;  %v13439_v18 = vld [vmem:[#allocation40_spill] sm:$0xff]  ;;  %9611 = vmatprep.mubr.msk.f32.mxu0 %vm11447_vm14, %v1456_v17  ;;  %8805 = vmatpush3.bf16.msra.mxu1 %v8802_v5 }
 0x254   : > { %vm11614_vm3 = vcmp.lt.s32.totalorder %v13433_v28, 16  ;;  %v1948_v45 = vshrl.u32 %v11519_v47, 4  ;;  %v8806_v52 = vpack.c.bf16 %v4193_v53, %v4192_v61  ;;  %2522 = vst [vmem:[#allocation2 + $0x99] sm:$0xff] %v2474_v38  ;;  %v1458_v48 = vmax.f32 %v1410_v51, 0.0  ;;  %v4596_v53 = vld [vmem:[#allocation8 + $0x280] sm:$0xff]  ;;  %v4597_v51 = vld [vmem:[#allocation8 + $0x288] sm:$0xff] }
 0x255   : > { %vm13437_vm13 = vnez %v13436_v10  ;;  %vm2155_vm5 = vcmp.lt.s32.totalorder %v11542_v19, 0  ;;  %v11632_v47 = vadd.s32 24, %v11542_v19  ;;  %v11635_v61 = vsub.s32 %v11087_v26, %v1938_v60  ;;  %v1197_v60 = vpop.f32.mrb[21].mxu0 }
 0x256   : > { %v13440_v2 = vsel %vm13437_vm13, %v13438_v25, %v13439_v18  ;;  %v1457_v38 = vmax.f32 %v1409_v30, 0.0  ;;  %v11641_v14 = vsub.s32 %v11110_v35, %v1927_v62  ;;  %v2477_v46 = vsel %vm11504_vm2, %v1458_v48, 0.0  ;;  %v3725_v35 = vld [vmem:[#allocation2 + $0x88] sm:$0xff]  ;;  %v3726_v62 = vld [vmem:[#allocation2 + $0x90] sm:$0xff]  ;;  %8807 = vmatprep.subr.bf16.mxu1 %v8806_v52 }
 0x257   : > { %vm11624_vm8 = vcmp.lt.s32.totalorder %v13440_v2, 16  ;;  %v1960_v2 = vmul.u32 24, %v1959_v11  ;;  %v1412_v26 = vadd.f32 %v7578_v39, %v11029_v3  ;;  %2525 = vst [vmem:[#allocation2 + $0xb1] sm:$0xff] %v2477_v46  ;;  %v1411_v17 = vadd.f32 %v11029_v3, %v1197_v60  ;;  %7983 = vmatprep.mubr.f32.mxu1 %v3725_v35  ;;  %8809 = vmatpush3.bf16.msra.mxu1 %v8806_v52 }
 0x258   : > { %v11647_v44 = vmul.u32.u64.low 2863311531, %v11286_v33  ;;  %v11648_v30 = vmul.u32.u64.high 2863311531, %v11286_v33, %v11647_v44  ;;  %v2476_v22 = vsel %vm11527_vm7, %v1457_v38, 0.0  ;;  %v13443_v11 = vsel %vm11173_vm0, %v11122_v6, %v11053_v34  ;;  %9612 = vmatmul.mubr.msk.f32.gmra.mrb[68].mxu0 %vm11527_vm7, %v1457_v38  ;;  %7984 = vmatmul.mubr.f32.gmra.mrb[14].mxu1 %v3726_v62 }
 0x259   : > { %vm11658_vm14 = vcmp.lt.s32.totalorder %v13443_v11, 16  ;;  %v1949_v23 = vmul.u32 24, %v1948_v45  ;;  %v11662_v5 = vpack.c.bf16 %v4597_v51, %v4596_v53  ;;  %2524 = vst [vmem:[#allocation2 + $0xa9] sm:$0xff] %v2476_v22  ;;  %v1460_v28 = vmax.f32 %v1412_v26, 0.0  ;;  %v7581_v45 = vpop.f32.mrb[22].mxu0  ;;  %9613 = vmatprep.mubr.msk.f32.mxu0 %vm11504_vm2, %v1458_v48  ;;  %v13463_v11 = vld [vmem:[#allocation16_spill] sm:$0xff] }
 0x25a   : > { %vm13446_vm6 = vnez %v13315_v20  ;;  %vm2154_vm0 = vcmp.lt.s32.totalorder %v11588_v7, 0  ;;  %v11677_v34 = vadd.s32 24, %v11588_v7  ;;  %v1459_v6 = vmax.f32 %v1411_v17, 0.0  ;;  %v1207_v25 = vpop.f32.mrb[23].mxu0 }
 0x25b   : > { %v13447_v10 = vsel %vm13446_vm6, %v11156_v0, %v11095_v1  ;;  %v11684_v1 = vsub.s32 %v13390_v49, %v1960_v2  ;;  %v1981_v0 = vshrl.u32 %v11595_v56, 4  ;;  %v2479_v20 = vsel %vm11568_vm9, %v1460_v28, 0.0  ;;  %v3727_v48 = vld [vmem:[#allocation2 + $0x98] sm:$0xff]  ;;  %v3728_v56 = vld [vmem:[#allocation2 + $0xa0] sm:$0xff]  ;;  %8811 = vmatprep.subr.bf16.mxu1 %v11662_v5  ;;  %v7584_v46 = vpop.f32.mrb[24].mxu0 }
 0x25c   : > { %vm11669_vm13 = vcmp.lt.s32.totalorder %v13447_v10, 16  ;;  %v1414_v4 = vadd.f32 %v7581_v45, %v11029_v3  ;;  %v11691_v18 = vadd.s32 24, %v11635_v61  ;;  %2527 = vst [vmem:[#allocation2 + $0xc1] sm:$0xff] %v2479_v20  ;;  %v2478_v15 = vsel %vm11581_vm12, %v1459_v6, 0.0  ;;  %7986 = vmatprep.mubr.f32.mxu1 %v3727_v48  ;;  %9614 = vmatmul.mubr.msk.f32.gmra.mrb[70].mxu0 %vm11581_vm12, %v1459_v6  ;;  %v1217_v43 = vpop.f32.mrb[25].mxu0  ;;  %v13467_v45 = vld [vmem:[#allocation17_spill] sm:$0xff] }
 0x25d   : > { %v1413_v49 = vadd.f32 %v11029_v3, %v1207_v25  ;;  %vm13450_vm2 = vnez %v13332_v9  ;;  %v11708_v52 = vsub.s32 %v11260_v31, %v1949_v23  ;;  %2526 = vst [vmem:[#allocation2 + $0xb9] sm:$0xff] %v2478_v15  ;;  %vm13454_vm11 = vnez %v13336_v41  ;;  %7987 = vmatmul.mubr.f32.gmra.mrb[16].mxu1 %v3728_v56  ;;  %v13470_v20 = vld [vmem:[#allocation14_spill] sm:$0xff]  ;;  %v7587_v48 = vpop.f32.mrb[26].mxu0 }
 0x25e   : > { %v13451_v53 = vsel %vm13450_vm2, %v11216_v58, %v11125_v37  ;;  %v1462_v38 = vmax.f32 %v1414_v4, 0.0  ;;  %v13455_v9 = vsel %vm13454_vm11, %v11238_v27, %v11140_v55  ;;  %v13456_v37 = vmov 0  ;;  %9615 = vmatprep.mubr.msk.f32.mxu0 %vm11568_vm9, %v1460_v28  ;;  %vm11735_vm11 = vmand %vm2155_vm5, %vm2107_vm1 }
 0x25f   : > { %vm11702_vm6 = vcmp.lt.s32.totalorder %v13451_v53, 16  ;;  %vm11716_vm2 = vcmp.lt.s32.totalorder %v13455_v9, 16  ;;  %v11723_v58 = vadd.s32 24, %v11641_v14  ;;  %v1461_v2 = vmax.f32 %v1413_v49, 0.0 }
 0x260   : > { %v13457_v37 = vsel %vm11716_vm2, 4294967295, %v13456_v37  ;;  %v11726_v31 = vmul.u32.u64.low 2863311531, %v11355_v50  ;;  %v11727_v39 = vmul.u32.u64.high 2863311531, %v11355_v50, %v11726_v31  ;;  %v1982_v27 = vmul.u32 24, %v1981_v0  ;;  %v3729_v35 = vld [vmem:[#allocation2 + $0xa8] sm:$0xff]  ;;  %v3730_v62 = vld [vmem:[#allocation2 + $0xb0] sm:$0xff] }
 0x261   : > { %v2481_v41 = vsel %vm11614_vm3, %v1462_v38, 0.0  ;;  %v1416_v36 = vadd.f32 %v7584_v46, %v11029_v3  ;;  %vm13460_vm9 = vcmp.ne.s32.totalorder %v11588_v7, 0  ;;  %v2480_v22 = vsel %vm11624_vm8, %v1461_v2, 0.0  ;;  %7989 = vmatprep.mubr.f32.mxu1 %v3729_v35  ;;  %v13469_v0 = vld [vmem:[#allocation19_spill] sm:$0xff]  ;;  %9616 = vmatmul.mubr.msk.f32.gmra.mrb[72].mxu0 %vm11624_vm8, %v1461_v2 }
 0x262   : > { %vm11748_vm2 = vmand %vm2154_vm0, %vm13460_vm9  ;;  %v11753_v60 = vmul.u32.u64.low 2863311531, %v11358_v13  ;;  %v11754_v44 = vmul.u32.u64.high 2863311531, %v11358_v13, %v11753_v60  ;;  %2529 = vst [vmem:[#allocation2 + $0xd1] sm:$0xff] %v2481_v41  ;;  %v1415_v17 = vadd.f32 %v11029_v3, %v1217_v43  ;;  %v13464_v23 = vsel %vm11368_vm10, %v11352_v8, %v13463_v11  ;;  %7990 = vmatmul.mubr.f32.gmra.mrb[18].mxu1 %v3730_v62  ;;  %9617 = vmatprep.mubr.msk.f32.mxu0 %vm11614_vm3, %v1462_v38  ;;  %v13498_v11 = vld [vmem:[#allocation18_spill] sm:$0xff] }
 0x263   : > { %vm11764_vm1 = vcmp.lt.s32.totalorder %v13464_v23, 16  ;;  %v1970_v10 = vshrl.u32 %v11648_v30, 4  ;;  %2528 = vst [vmem:[#allocation2 + $0xc9] sm:$0xff] %v2480_v22  ;;  %v1464_v6 = vmax.f32 %v1416_v36, 0.0  ;;  %vm13468_vm0 = vnez %v13467_v45  ;;  %v13478_v30 = vld [vmem:[#allocation21_spill] sm:$0xff] }
 0x264   : > { %v13471_v4 = vsel %vm13468_vm0, %v13469_v0, %v13470_v20  ;;  %vm13474_vm10 = vcmp.ne.s32.totalorder %v11635_v61, 0  ;;  %vm13475_vm5 = vcmp.lt.s32.totalorder %v11635_v61, 0  ;;  %vm2158_vm12 = vcmp.lt.s32.totalorder %v11708_v52, 0  ;;  %v3731_v46 = vld [vmem:[#allocation2 + $0xb8] sm:$0xff]  ;;  %v3732_v55 = vld [vmem:[#allocation2 + $0xc0] sm:$0xff] }
 0x265   : > { %vm11775_vm9 = vcmp.lt.s32.totalorder %v13471_v4, 16  ;;  %vm11785_vm7 = vmand %vm13475_vm5, %vm13474_vm10  ;;  %v11791_v25 = vmul.u32.u64.low 2863311531, %v13478_v30  ;;  %v11792_v15 = vmul.u32.u64.high 2863311531, %v13478_v30, %v11791_v25  ;;  %v1463_v49 = vmax.f32 %v1415_v17, 0.0  ;;  %7992 = vmatprep.mubr.f32.mxu1 %v3731_v46 }
 0x266   : > { %v2299_v29 = vsel %vm11735_vm11, %v11632_v47, %v11542_v19  ;;  %v2298_v56 = vsel %vm11748_vm2, %v11677_v34, %v11588_v7  ;;  %vm13479_vm8 = vcmp.ne.s32.totalorder %v11641_v14, 0  ;;  %vm13480_vm5 = vcmp.lt.s32.totalorder %v11641_v14, 0  ;;  %v1227_v47 = vpop.f32.mrb[27].mxu0  ;;  %7993 = vmatmul.mubr.f32.gmra.mrb[20].mxu1 %v3732_v55 }
 0x267   : > { %vm11808_vm0 = vmand %vm13480_vm5, %vm13479_vm8  ;;  %v11813_v42 = vadd.s32 376, %v10337_v24  ;;  %v2483_v38 = vsel %vm11658_vm14, %v1464_v6, 0.0  ;;  %v1418_v19 = vadd.f32 %v7587_v48, %v11029_v3  ;;  %vm13483_vm3 = vcmp.ne.s32.totalorder %v11684_v1, 0  ;;  %9618 = vmatmul.mubr.msk.f32.gmra.mrb[74].mxu0 %vm11669_vm13, %v1463_v49  ;;  %v7590_v62 = vpop.f32.mrb[28].mxu0 }
 0x268   : > { %vm13484_vm2 = vcmp.lt.s32.totalorder %v11684_v1, 0  ;;  %v11827_v34 = vadd.s32 24, %v11684_v1  ;;  %v11830_v9 = vadd.s32 24, %v11708_v52  ;;  %2531 = vst [vmem:[#allocation2 + $0xe1] sm:$0xff] %v2483_v38  ;;  %v2482_v31 = vsel %vm11669_vm13, %v1463_v49, 0.0  ;;  %9619 = vmatprep.mubr.msk.f32.mxu0 %vm11658_vm14, %v1464_v6 }
 0x269   : > { %vm11822_vm11 = vmand %vm13484_vm2, %vm13483_vm3  ;;  %v1417_v2 = vadd.f32 %v11029_v3, %v1227_v47  ;;  %v13487_v41 = vsel %vm11486_vm15, %v11454_v12, %v11376_v21  ;;  %vm13490_vm8 = vcmp.ne.s32.totalorder %v11708_v52, 0  ;;  %v11853_v26 = vsub.s32 %v11267_v40, %v1982_v27  ;;  %2530 = vst [vmem:[#allocation2 + $0xd9] sm:$0xff] %v2482_v31  ;;  %v13493_v21 = vld [vmem:[#allocation24_spill] sm:$0xff]  ;;  %v13494_v12 = vld [vmem:[#allocation15_spill] sm:$0xff] }
 0x26a   : > { %vm11840_vm10 = vcmp.lt.s32.totalorder %v13487_v41, 16  ;;  %vm11848_vm5 = vmand %vm2158_vm12, %vm13490_vm8  ;;  %v1971_v60 = vmul.u32 24, %v1970_v10  ;;  %v1466_v57 = vmax.f32 %v1418_v19, 0.0  ;;  %v13495_v22 = vsel %vm11512_vm4, %v13493_v21, %v13494_v12  ;;  %v3733_v6 = vld [vmem:[#allocation2 + $0xc8] sm:$0xff]  ;;  %v3734_v45 = vld [vmem:[#allocation2 + $0xd0] sm:$0xff] }
 0x26b   : > { %vm11860_vm15 = vcmp.lt.s32.totalorder %v13495_v22, 16  ;;  %v2301_v40 = vsel %vm11785_vm7, %v11691_v18, %v11635_v61  ;;  %v2300_v54 = vsel %vm11808_vm0, %v11723_v58, %v11641_v14  ;;  %v11875_v27 = vadd.s32 368, %v10337_v24  ;;  %v1237_v18 = vpop.f32.mrb[29].mxu0  ;;  %7995 = vmatprep.mubr.f32.mxu1 %v3733_v6 }
 0x26c   : > { %v1465_v35 = vmax.f32 %v1417_v2, 0.0  ;;  %v2003_v16 = vshrl.u32 %v11727_v39, 4  ;;  %v11881_v23 = vmul.u32.u64.low 2863311531, %v13498_v11  ;;  %v11882_v10 = vmul.u32.u64.high 2863311531, %v13498_v11, %v11881_v23  ;;  %7996 = vmatmul.mubr.f32.gmra.mrb[22].mxu1 %v3734_v45 }
 0x26d   : > { %v2485_v61 = vsel %vm11702_vm6, %v1466_v57, 0.0  ;;  %v1420_v14 = vadd.f32 %v7590_v62, %v11029_v3  ;;  %v2303_v24 = vsel %vm11822_vm11, %v11827_v34, %v11684_v1  ;;  %v2302_v32 = vsel %vm11848_vm5, %v11830_v9, %v11708_v52 }
 0x26e   : > { %2533 = vst [vmem:[#allocation2 + $0xf1] sm:$0xff] %v2485_v61  ;;  %vm13499_vm4 = vnez %v13457_v37  ;;  %v1419_v39 = vadd.f32 %v11029_v3, %v1237_v18  ;;  %vm11898_vm14 = vcmp.lt.s32.totalorder %v2299_v29, 16  ;;  %vm2113_vm13 = vcmp.ne.s32.totalorder %v11853_v26, 0  ;;  %v7593_v29 = vpop.f32.mrb[30].mxu0 }
 0x26f   : > { %v2484_v58 = vsel %vm13499_vm4, %v1465_v35, 0.0  ;;  %v11904_v20 = vsub.s32 %v11286_v33, %v1971_v60  ;;  %v1468_v4 = vmax.f32 %v1420_v14, 0.0  ;;  %vm11906_vm7 = vcmp.lt.s32.totalorder %v2298_v56, 16  ;;  %9620 = vmatmul.mubr.msk.f32.gmra.mrb[76].mxu0 %vm13499_vm4, %v1465_v35  ;;  %v13504_v56 = vld [vmem:[#allocation22_spill] sm:$0xff]  ;;  %v1247_v47 = vpop.f32.mrb[31].mxu0 }
 0x270   : > { %2532 = vst [vmem:[#allocation2 + $0xe9] sm:$0xff] %v2484_v58  ;;  %vm2161_vm12 = vcmp.lt.s32.totalorder %v11853_v26, 0  ;;  %v1992_v25 = vshrl.u32 %v11754_v44, 4  ;;  %v2025_v49 = vshrl.u32 %v11792_v15, 4  ;;  %v1467_v48 = vmax.f32 %v1419_v39, 0.0  ;;  %9621 = vmatprep.mubr.msk.f32.mxu0 %vm11702_vm6, %v1466_v57  ;;  %v3735_v2 = vld [vmem:[#allocation2 + $0xd8] sm:$0xff] }
 0x271   : > { %v2004_v33 = vmul.u32 24, %v2003_v16  ;;  %v11918_v53 = vmul.u32.u64.low 2863311531, %v13504_v56  ;;  %v11919_v38 = vmul.u32.u64.high 2863311531, %v13504_v56, %v11918_v53  ;;  %v2487_v37 = vsel %vm11764_vm1, %v1468_v4, 0.0  ;;  %v3736_v46 = vld [vmem:[#allocation2 + $0xe0] sm:$0xff]  ;;  %7998 = vmatprep.mubr.f32.mxu1 %v3735_v2  ;;  %vm11952_vm8 = vmand %vm2161_vm12, %vm2113_vm13 }
 0x272   : > { %v1422_v19 = vadd.f32 %v7593_v29, %v11029_v3  ;;  %v11925_v44 = vmul.u32.u64.low 2863311531, %v11603_v63  ;;  %v11926_v15 = vmul.u32.u64.high 2863311531, %v11603_v63, %v11925_v44  ;;  %2535 = vst [vmem:[#allocation2 + $0x101] sm:$0xff] %v2487_v37  ;;  %v2486_v51 = vsel %vm11775_vm9, %v1467_v48, 0.0  ;;  %7999 = vmatmul.mubr.f32.gmra.mrb[24].mxu1 %v3736_v46 }
 0x273   : > { %v1421_v31 = vadd.f32 %v11029_v3, %v1247_v47  ;;  %vm11931_vm6 = vcmp.lt.s32.totalorder %v2301_v40, 16  ;;  %vm2112_vm0 = vcmp.ne.s32.totalorder %v11904_v20, 0  ;;  %vm2160_vm3 = vcmp.lt.s32.totalorder %v11904_v20, 0  ;;  %2534 = vst [vmem:[#allocation2 + $0xf9] sm:$0xff] %v2486_v51  ;;  %9622 = vmatmul.mubr.msk.f32.gmra.mrb[78].mxu0 %vm11775_vm9, %v1467_v48  ;;  %v7596_v40 = vpop.f32.mrb[32].mxu0 }
 0x274   : > { %v1470_v41 = vmax.f32 %v1422_v19, 0.0  ;;  %vm11937_vm2 = vcmp.lt.s32.totalorder %v2300_v54, 16  ;;  %v11944_v57 = vadd.s32 24, %v11853_v26  ;;  %v1993_v21 = vmul.u32 24, %v1992_v25  ;;  %9623 = vmatprep.mubr.msk.f32.mxu0 %vm11764_vm1, %v1468_v4  ;;  %v1257_v23 = vpop.f32.mrb[33].mxu0  ;;  %vm11970_vm1 = vmand %vm2160_vm3, %vm2112_vm0 }
 0x275   : > { %v2026_v12 = vmul.u32 24, %v2025_v49  ;;  %v1469_v22 = vmax.f32 %v1421_v31, 0.0  ;;  %v11957_v59 = vadd.s32 24, %v11904_v20  ;;  %v11960_v35 = vsub.s32 %v11355_v50, %v2004_v33  ;;  %v7599_v52 = vpop.f32.mrb[34].mxu0 }
 0x276   : > { %v2014_v62 = vshrl.u32 %v11882_v10, 4  ;;  %v2489_v28 = vsel %vm11840_vm10, %v1470_v41, 0.0  ;;  %v1424_v16 = vadd.f32 %v7596_v40, %v11029_v3  ;;  %v1423_v18 = vadd.f32 %v11029_v3, %v1257_v23  ;;  %v1267_v36 = vpop.f32.mrb[35].mxu0  ;;  %v3293_v3 = vld [vmem:[#allocation2 + $0x2] sm:$0xff]  ;;  %v5019_v40 = vld [vmem:[#allocation8 + $0x328] sm:$0xff] }
 0x277   : > { %v11975_v14 = vmul.u32.u64.low 2863311531, %v11813_v42  ;;  %v11976_v50 = vmul.u32.u64.high 2863311531, %v11813_v42, %v11975_v14  ;;  %2537 = vst [vmem:[#allocation2 + $0x111] sm:$0xff] %v2489_v28  ;;  %v2488_v10 = vsel %vm11860_vm15, %v1469_v22, 0.0  ;;  %v11981_v58 = vld [vmem:[#allocation2 + $0xe8] sm:$0xff]  ;;  %v11983_v39 = vld [vmem:[#allocation2 + $0xf0] sm:$0xff]  ;;  %9624 = vmatmul.mubr.msk.f32.gmra.mrb[80].mxu0 %vm11860_vm15, %v1469_v22  ;;  %v2305_v1 = vsel %vm11952_vm8, %v11944_v57, %v11853_v26 }
 0x278   : > { %vm11990_vm9 = vcmp.lt.s32.totalorder %v2303_v24, 16  ;;  %v11995_v45 = vmul.u32.u64.low 2863311531, %v11875_v27  ;;  %v11996_v4 = vmul.u32.u64.high 2863311531, %v11875_v27, %v11995_v45  ;;  %2536 = vst [vmem:[#allocation2 + $0x109] sm:$0xff] %v2488_v10  ;;  %v1472_v25 = vmax.f32 %v1424_v16, 0.0  ;;  %8001 = vmatprep.mubr.f32.mxu1 %v11981_v58  ;;  %9625 = vmatprep.mubr.msk.f32.mxu0 %vm11840_vm10, %v1470_v41  ;;  %v7602_v37 = vpop.f32.mrb[36].mxu0 }
 0x279   : > { %vm12004_vm4 = vcmp.lt.s32.totalorder %v2302_v32, 16  ;;  %v12015_v7 = vsub.s32 %v11358_v13, %v1993_v21  ;;  %v12018_v34 = vsub.s32 %v13478_v30, %v2026_v12  ;;  %v1471_v43 = vmax.f32 %v1423_v18, 0.0  ;;  %8002 = vmatmul.mubr.f32.gmra.mrb[26].mxu1 %v11983_v39  ;;  %v12033_v30 = vld [vmem:[%s13075_s2] ss:$0 sm:$0xff]  ;;  %v3294_v22 = vld [vmem:[#allocation2 + $0xa] sm:$0xff]  ;;  %v3295_v41 = vld [vmem:[#allocation2 + $0x12] sm:$0xff] }
 0x27a   : > { %v2304_v9 = vsel %vm11970_vm1, %v11957_v59, %v11904_v20  ;;  %v2015_v17 = vmul.u32 24, %v2014_v62  ;;  %v2047_v26 = vshrl.u32 %v11919_v38, 4  ;;  %v2491_v13 = vsel %vm11898_vm14, %v1472_v25, 0.0  ;;  %v12041_v48 = vld [vmem:[#allocation2 + $0xf8] sm:$0xff]  ;;  %v12043_v29 = vld [vmem:[#allocation2 + $0x100] sm:$0xff] }
 0x27b   : > { %v1426_v24 = vadd.f32 %v12033_v30, %v7599_v52  ;;  %vm2115_vm11 = vcmp.ne.s32.totalorder %v11960_v35, 0  ;;  %v2036_v32 = vshrl.u32 %v11926_v15, 4  ;;  %2539 = vst [vmem:[#allocation2 + $0x121] sm:$0xff] %v2491_v13  ;;  %v2490_v20 = vsel %vm11906_vm7, %v1471_v43, 0.0  ;;  %8004 = vmatprep.mubr.f32.mxu1 %v12041_v48  ;;  %9626 = vmatmul.mubr.msk.f32.gmra.mrb[82].mxu0 %vm11906_vm7, %v1471_v43  ;;  %v1277_v15 = vpop.f32.mrb[37].mxu0 }
 0x27c   : > { %v1425_v49 = vadd.f32 %v12033_v30, %v1267_v36  ;;  %vm2163_vm10 = vcmp.lt.s32.totalorder %v11960_v35, 0  ;;  %v2259_v33 = vadd.s32 24, %v11960_v35  ;;  %2538 = vst [vmem:[#allocation2 + $0x119] sm:$0xff] %v2490_v20  ;;  %vm2114_vm5 = vcmp.ne.s32.totalorder %v12015_v7, 0  ;;  %9627 = vmatprep.mubr.msk.f32.mxu0 %vm11898_vm14, %v1472_v25  ;;  %v7605_v28 = vpop.f32.mrb[38].mxu0 }
 0x27d   : > { %v1474_v53 = vmax.f32 %v1426_v24, 0.0  ;;  %vm2162_vm15 = vcmp.lt.s32.totalorder %v12015_v7, 0  ;;  %vm2117_vm13 = vcmp.ne.s32.totalorder %v12018_v34, 0  ;;  %8005 = vmatmul.mubr.f32.gmra.mrb[28].mxu1 %v12043_v29  ;;  %vm2165_vm12 = vcmp.lt.s32.totalorder %v12018_v34, 0  ;;  %vm12067_vm7 = vmand %vm2163_vm10, %vm2115_vm11  ;;  %v1287_v14 = vpop.f32.mrb[39].mxu0 }
 0x27e   : > { %v1473_v38 = vmax.f32 %v1425_v49, 0.0  ;;  %v12058_v19 = vsub.s32 %v13498_v11, %v2015_v17  ;;  %v2048_v8 = vmul.u32 24, %v2047_v26  ;;  %v1428_v44 = vadd.f32 %v12033_v30, %v7602_v37  ;;  %vm12093_vm3 = vmand %vm2162_vm15, %vm2114_vm5 }
 0x27f   : > { %v2493_v47 = vsel %vm11931_vm6, %v1474_v53, 0.0  ;;  %v2037_v0 = vmul.u32 24, %v2036_v32  ;;  %v2069_v31 = vshrl.u32 %v11976_v50, 4  ;;  %v1427_v2 = vadd.f32 %v12033_v30, %v1277_v15  ;;  %v12075_v46 = vld [vmem:[#allocation2 + $0x108] sm:$0xff]  ;;  %v12081_v57 = vld [vmem:[#allocation2 + $0x110] sm:$0xff]  ;;  %vm12111_vm8 = vmand %vm2165_vm12, %vm2117_vm13 }
 0x280   : > { %2541 = vst [vmem:[#allocation2 + $0x131] sm:$0xff] %v2493_v47  ;;  %v2492_v11 = vsel %vm11937_vm2, %v1473_v38, 0.0  ;;  %vm12077_vm14 = vcmp.lt.s32.totalorder %v2305_v1, 16  ;;  %v2058_v21 = vshrl.u32 %v11996_v4, 4  ;;  %v1476_v12 = vmax.f32 %v1428_v44, 0.0  ;;  %8007 = vmatprep.mubr.f32.mxu1 %v12075_v46  ;;  %9628 = vmatmul.mubr.msk.f32.gmra.mrb[84].mxu0 %vm11937_vm2, %v1473_v38 }
 0x281   : > { %2540 = vst [vmem:[#allocation2 + $0x129] sm:$0xff] %v2492_v11  ;;  %vm12085_vm0 = vcmp.lt.s32.totalorder %v2304_v9, 16  ;;  %v2258_v54 = vadd.s32 24, %v12015_v7  ;;  %v2261_v59 = vadd.s32 24, %v12018_v34  ;;  %v12101_v62 = vmax.f32 %v1427_v2, 0.0  ;;  %8008 = vmatmul.mubr.f32.gmra.mrb[30].mxu1 %v12081_v57  ;;  %9629 = vmatprep.mubr.msk.f32.mxu0 %vm11931_vm6, %v1474_v53  ;;  %v7608_v9 = vpop.f32.mrb[40].mxu0 }
 0x282   : > { %v2307_v16 = vsel %vm12067_vm7, %v2259_v33, %v11960_v35  ;;  %vm2116_vm2 = vcmp.ne.s32.totalorder %v12058_v19, 0  ;;  %v12119_v60 = vsub.s32 %v13504_v56, %v2048_v8  ;;  %v2495_v61 = vsel %vm11990_vm9, %v1476_v12, 0.0  ;;  %v1297_v26 = vpop.f32.mrb[41].mxu0 }
 0x283   : > { %v1430_v35 = vadd.f32 %v12033_v30, %v7605_v28  ;;  %v12125_v50 = vsub.s32 %v11603_v63, %v2037_v0  ;;  %v2070_v10 = vmul.u32 24, %v2069_v31  ;;  %2543 = vst [vmem:[#allocation2 + $0x141] sm:$0xff] %v2495_v61  ;;  %v2494_v55 = vsel %vm12004_vm4, %v12101_v62, 0.0  ;;  %v12131_v45 = vld [vmem:[#allocation2 + $0x118] sm:$0xff]  ;;  %v12133_v56 = vld [vmem:[#allocation2 + $0x120] sm:$0xff]  ;;  %v7611_v37 = vpop.f32.mrb[42].mxu0 }
 0x284   : > { %v1429_v18 = vadd.f32 %v12033_v30, %v1287_v14  ;;  %vm2164_vm6 = vcmp.lt.s32.totalorder %v12058_v19, 0  ;;  %v2059_v4 = vmul.u32 24, %v2058_v21  ;;  %2542 = vst [vmem:[#allocation2 + $0x139] sm:$0xff] %v2494_v55  ;;  %8010 = vmatprep.mubr.f32.mxu1 %v12131_v45  ;;  %vm12139_vm1 = vcmp.lt.s32.totalorder %v2307_v16, 16  ;;  %9630 = vmatmul.mubr.msk.f32.gmra.mrb[86].mxu0 %vm12004_vm4, %v12101_v62  ;;  %v1307_v51 = vpop.f32.mrb[43].mxu0  ;;  %v9592_v0 = vld [vmem:[#allocation2] sm:$0xff] }
 0x285   : > { %v12136_v25 = vmax.f32 %v1430_v35, 0.0  ;;  %v2306_v1 = vsel %vm12093_vm3, %v2258_v54, %v12015_v7  ;;  %v2309_v43 = vsel %vm12111_vm8, %v2261_v59, %v12018_v34  ;;  %8011 = vmatmul.mubr.f32.gmra.mrb[32].mxu1 %v12133_v56  ;;  %v2260_v17 = vadd.s32 24, %v12058_v19  ;;  %9631 = vmatprep.mubr.msk.f32.mxu0 %vm11990_vm9, %v1476_v12  ;;  %vm12168_vm5 = vmand %vm2164_vm6, %vm2116_vm2  ;;  %v7614_v16 = vpop.f32.mrb[44].mxu0 }
 0x286   : > { %v12152_v52 = vmax.f32 %v1429_v18, 0.0  ;;  %vm2119_vm11 = vcmp.ne.s32.totalorder %v12119_v60, 0  ;;  %vm2167_vm10 = vcmp.lt.s32.totalorder %v12119_v60, 0  ;;  %v1432_v34 = vadd.f32 %v12033_v30, %v7608_v9  ;;  %v3303_v18 = vld [vmem:[#allocation2 + $0x52] sm:$0xff] }
 0x287   : > { %v2497_v7 = vsel %vm12077_vm14, %v12136_v25, 0.0  ;;  %vm2118_vm15 = vcmp.ne.s32.totalorder %v12125_v50, 0  ;;  %v12174_v6 = vsub.s32 %v11813_v42, %v2070_v10  ;;  %v1431_v36 = vadd.f32 %v12033_v30, %v1297_v26  ;;  %vm12213_vm7 = vmand %vm2167_vm10, %vm2119_vm11  ;;  %v2557_v10 = vld [vmem:[#allocation2 + $0x18] sm:$0xff]  ;;  %v5017_v42 = vld [vmem:[#allocation8 + $0x318] sm:$0xff] }
 0x288   : > { %2545 = vst [vmem:[#allocation2 + $0x151] sm:$0xff] %v2497_v7  ;;  %v2496_v24 = vsel %vm12085_vm0, %v12152_v52, 0.0  ;;  %v12180_v32 = vld [vmem:[#allocation2 + $0x128] sm:$0xff]  ;;  %v12182_v20 = vld [vmem:[#allocation2 + $0x130] sm:$0xff]  ;;  %vm2166_vm9 = vcmp.lt.s32.totalorder %v12125_v50, 0  ;;  %v12186_v49 = vsub.s32 %v11875_v27, %v2059_v4  ;;  %v12188_v33 = vmax.f32 %v1432_v34, 0.0  ;;  %9632 = vmatmul.mubr.msk.f32.gmra.mrb[88].mxu0 %vm12085_vm0, %v12152_v52 }
 0x289   : > { %2544 = vst [vmem:[#allocation2 + $0x149] sm:$0xff] %v2496_v24  ;;  %vm12190_vm13 = vcmp.lt.s32.totalorder %v2306_v1, 16  ;;  %8013 = vmatprep.mubr.f32.mxu1 %v12180_v32  ;;  %v2263_v53 = vadd.s32 24, %v12119_v60  ;;  %v12199_v38 = vmax.f32 %v1431_v36, 0.0  ;;  %vm12201_vm12 = vcmp.lt.s32.totalorder %v2309_v43, 16  ;;  %9633 = vmatprep.mubr.msk.f32.mxu0 %vm12077_vm14, %v12136_v25  ;;  %vm12229_vm3 = vmand %vm2166_vm9, %vm2118_vm15  ;;  %v4551_v27 = vld [vmem:[#allocation2 + $0x3a] sm:$0xff] }
 0x28a   : > { %8014 = vmatmul.mubr.f32.gmra.mrb[34].mxu1 %v12182_v20  ;;  %v2308_v8 = vsel %vm12168_vm5, %v2260_v17, %v12058_v19  ;;  %v2262_v44 = vadd.s32 24, %v12125_v50  ;;  %v2499_v15 = vsel %vm12139_vm1, %v12188_v33, 0.0  ;;  %v1434_v19 = vadd.f32 %v12033_v30, %v7611_v37  ;;  %v4555_v17 = vld [vmem:[#allocation2 + $0x5a] sm:$0xff] }
 0x28b   : > { %vm2121_vm8 = vcmp.ne.s32.totalorder %v12174_v6, 0  ;;  %vm2169_vm2 = vcmp.lt.s32.totalorder %v12174_v6, 0  ;;  %2547 = vst [vmem:[#allocation2 + $0x161] sm:$0xff] %v2499_v15  ;;  %v2498_v31 = vsel %vm12190_vm13, %v12199_v38, 0.0  ;;  %v1433_v11 = vadd.f32 %v12033_v30, %v1307_v51  ;;  %v12239_v2 = vld [vmem:[#allocation2 + $0x138] sm:$0xff]  ;;  %v12241_v21 = vld [vmem:[#allocation2 + $0x140] sm:$0xff] }
 0x28c   : > { %vm2120_vm6 = vcmp.ne.s32.totalorder %v12186_v49, 0  ;;  %vm2168_vm11 = vcmp.lt.s32.totalorder %v12186_v49, 0  ;;  %2546 = vst [vmem:[#allocation2 + $0x159] sm:$0xff] %v2498_v31  ;;  %v12245_v12 = vmax.f32 %v1434_v19, 0.0  ;;  %vm12247_vm10 = vcmp.lt.s32.totalorder %v2308_v8, 16  ;;  %8016 = vmatprep.mubr.f32.mxu1 %v12239_v2  ;;  %9634 = vmatmul.mubr.msk.f32.gmra.mrb[90].mxu0 %vm12190_vm13, %v12199_v38  ;;  %vm12269_vm5 = vmand %vm2169_vm2, %vm2121_vm8  ;;  %v3344_v19 = vld [vmem:[#allocation8 + $0x110] sm:$0xff] }
 0x28d   : > { %v2311_v54 = vsel %vm12213_vm7, %v2263_v53, %v12119_v60  ;;  %v2265_v59 = vadd.s32 24, %v12174_v6  ;;  %v12259_v28 = vmax.f32 %v1433_v11, 0.0  ;;  %v2310_v23 = vsel %vm12229_vm3, %v2262_v44, %v12125_v50  ;;  %9635 = vmatprep.mubr.msk.f32.mxu0 %vm12139_vm1, %v12188_v33  ;;  %v1317_v50 = vpop.f32.mrb[45].mxu0  ;;  %vm12287_vm15 = vmand %vm2168_vm11, %vm2120_vm6  ;;  %v3347_v60 = vld [vmem:[#allocation8 + $0x128] sm:$0xff] }
 0x28e   : > { %8017 = vmatmul.mubr.f32.gmra.mrb[36].mxu1 %v12241_v21  ;;  %v2264_v61 = vadd.s32 24, %v12186_v49  ;;  %v2501_v35 = vsel %vm12201_vm12, %v12245_v12, 0.0  ;;  %v12281_v14 = vadd.f32 %v12033_v30, %v7614_v16  ;;  %vm12294_vm9 = vcmp.lt.s32.totalorder %v2311_v54, 16  ;;  %v7617_v26 = vpop.f32.mrb[46].mxu0  ;;  %v12509_v15 = vld [vmem:[#allocation2 + $0x72] sm:$0xff] }
 0x28f   : > { %2549 = vst [vmem:[#allocation2 + $0x171] sm:$0xff] %v2501_v35  ;;  %v2500_v55 = vsel %vm12247_vm10, %v12259_v28, 0.0  ;;  %v1435_v4 = vadd.f32 %v12033_v30, %v1317_v50  ;;  %vm12304_vm7 = vcmp.lt.s32.totalorder %v2310_v23, 16  ;;  %v2313_v7 = vsel %vm12269_vm5, %v2265_v59, %v12174_v6  ;;  %v1327_v36 = vpop.f32.mrb[47].mxu0  ;;  %v3346_v23 = vld [vmem:[#allocation8 + $0x120] sm:$0xff] }
 0x290   : > { %v12299_v1 = vld [vmem:[#allocation2 + $0x148] sm:$0xff]  ;;  %v12301_v43 = vld [vmem:[#allocation2 + $0x150] sm:$0xff]  ;;  %2548 = vst [vmem:[#allocation2 + $0x169] sm:$0xff] %v2500_v55  ;;  %v13154_v9 = vmax.f32 %v12281_v14, 0.0  ;;  %9636 = vmatmul.mubr.msk.f32.gmra.mrb[92].mxu0 %vm12247_vm10, %v12259_v28  ;;  %v2312_v13 = vsel %vm12287_vm15, %v2264_v61, %v12186_v49  ;;  %v12329_v24 = vadd.f32 %v12033_v30, %v7617_v26  ;;  %vm12334_vm3 = vcmp.lt.s32.totalorder %v2313_v7, 16  ;;  %v13553_v61 = vld [vmem:[#allocation20_spill] sm:$0xff] }
 0x291   : > { %8019 = vmatprep.mubr.f32.mxu1 %v12299_v1  ;;  %v12315_v34 = vmax.f32 %v1435_v4, 0.0  ;;  %9637 = vmatprep.mubr.msk.f32.mxu0 %vm12201_vm12, %v12245_v12  ;;  %v12339_v37 = vadd.f32 %v12033_v30, %v1327_v36  ;;  %vm12346_vm8 = vcmp.lt.s32.totalorder %v2312_v13, 16  ;;  %v3345_v30 = vld [vmem:[#allocation8 + $0x118] sm:$0xff]  ;;  %v8722_v55 = vpack.c.bf16 %v3347_v60, %v3346_v23  ;;  %v3348_v7 = vld [vmem:[#allocation8 + $0x130] sm:$0xff]  ;;  %v2559_v36 = vld [vmem:[#allocation2 + $0x28] sm:$0xff] }
 0x292   : > { %8020 = vmatmul.mubr.f32.gmra.mrb[38].mxu1 %v12301_v43  ;;  %v2503_v6 = vsel %vm12294_vm9, %v13154_v9, 0.0  ;;  %v13152_v44 = vmax.f32 %v12329_v24, 0.0  ;;  %v8718_v16 = vpack.c.bf16 %v3345_v30, %v3344_v19  ;;  %v2558_v4 = vld [vmem:[#allocation2 + $0x20] sm:$0xff]  ;;  %v12374_v19 = vld [vmem:[#allocation2 + $0x30] sm:$0xff]  ;;  %v4598_v30 = vld [vmem:[#allocation8 + $0x290] sm:$0xff]  ;;  %v13561_v63 = vmax.f32 %v12281_v14, 0.0 }
 0x293   : > { %2551 = vst [vmem:[#allocation2 + $0x181] sm:$0xff] %v2503_v6  ;;  %v2502_v53 = vsel %vm12304_vm7, %v12315_v34, 0.0  ;;  %v12341_v8 = vld [vmem:[#allocation2 + $0x158] sm:$0xff]  ;;  %v12343_v47 = vld [vmem:[#allocation2 + $0x160] sm:$0xff]  ;;  %v13153_v51 = vmax.f32 %v12339_v37, 0.0  ;;  %v3351_v23 = vld [vmem:[#allocation8 + $0x148] sm:$0xff] }
 0x294   : > { %2550 = vst [vmem:[#allocation2 + $0x179] sm:$0xff] %v2502_v53  ;;  %8022 = vmatprep.mubr.f32.mxu1 %v12341_v8  ;;  %9638 = vmatmul.mubr.msk.f32.gmra.mrb[94].mxu0 %vm12304_vm7, %v12315_v34  ;;  %v2505_v31 = vsel %vm12334_vm3, %v13152_v44, 0.0  ;;  %v3349_v26 = vld [vmem:[#allocation8 + $0x138] sm:$0xff]  ;;  %v4136_v9 = vld [vmem:[#allocation2 + $0x51] sm:$0xff]  ;;  %v5022_v49 = vld [vmem:[#allocation8 + $0x340] sm:$0xff] }
 0x295   : > { %7754 = vmatprep.mubr.f32.mxu0 %v9592_v0  ;;  %2553 = vst [vmem:[#allocation2 + $0x191] sm:$0xff] %v2505_v31  ;;  %v2504_v11 = vsel %vm12346_vm8, %v13153_v51, 0.0  ;;  %v8726_v53 = vpack.c.bf16 %v3349_v26, %v3348_v7  ;;  %v4129_v31 = vld [vmem:[#allocation2 + $0x19] sm:$0xff]  ;;  %v4131_v26 = vld [vmem:[#allocation2 + $0x29] sm:$0xff]  ;;  %v4134_v44 = vld [vmem:[#allocation2 + $0x41] sm:$0xff] }
 0x296   : > { %8023 = vmatmul.mubr.f32.gmra.mrb[40].mxu1 %v12343_v47  ;;  %2552 = vst [vmem:[#allocation2 + $0x189] sm:$0xff] %v2504_v11  ;;  %v3350_v11 = vld [vmem:[#allocation8 + $0x140] sm:$0xff]  ;;  %v12390_v51 = vld [vmem:[#allocation2 + $0x58] sm:$0xff] }
 0x297   : > { %v12364_v54 = vld [vmem:[#allocation2 + $0x168] sm:$0xff]  ;;  %v12366_v59 = vld [vmem:[#allocation2 + $0x170] sm:$0xff]  ;;  %v8730_v7 = vpack.c.bf16 %v3351_v23, %v3350_v11  ;;  %v4603_v11 = vld [vmem:[#allocation8 + $0x2b8] sm:$0xff] }
 0x298   : > { %8025 = vmatprep.mubr.f32.mxu1 %v12364_v54  ;;  %7755 = vmatmul.mubr.f32.vlgmr.msra.gmra.mrb[48].mxu0 %v9592_v0 }
 0x299   : > { %7757 = vmatprep.mubr.f32.mxu0 %v9592_v0  ;;  %8717 = vmatpush3.bf16.msra.mxu0 %v13553_v61  ;;  %v4599_v0 = vld [vmem:[#allocation8 + $0x298] sm:$0xff]  ;;  %v4600_v61 = vld [vmem:[#allocation8 + $0x2a0] sm:$0xff] }
 0x29a   : > { %8026 = vmatmul.mubr.f32.gmra.mrb[42].mxu1 %v12366_v59  ;;  %8719 = vmatprep.subr.bf16.mxu0 %v8718_v16  ;;  %v8814_v60 = vpack.c.bf16 %v4599_v0, %v4598_v30  ;;  %v12387_v0 = vld [vmem:[#allocation2 + $0x50] sm:$0xff] }
 0x29b   : > { %v12371_v35 = vld [vmem:[#allocation2 + $0x178] sm:$0xff]  ;;  %v3756_v50 = vld [vmem:[#allocation2 + $0x180] sm:$0xff]  ;;  %13554 = vst [vmem:[#allocation13_spill] sm:$0xff] %v12387_v0 }
 0x29c   : > { %8028 = vmatprep.mubr.f32.mxu1 %v12371_v35  ;;  %7758 = vmatmul.mubr.f32.gmra.mrb[50].mxu0 %v2557_v10  ;;  %v12380_v10 = vld [vmem:[#allocation2 + $0x40] sm:$0xff] }
 0x29d   : > { %7760 = vmatprep.mubr.f32.mxu0 %v2558_v4  ;;  %8721 = vmatpush3.bf16.msra.mxu0 %v8718_v16  ;;  %v3757_v13 = vld [vmem:[#allocation2 + $0x188] sm:$0xff]  ;;  %v3758_v6 = vld [vmem:[#allocation2 + $0x190] sm:$0xff]  ;;  %v12377_v16 = vld [vmem:[#allocation2 + $0x38] sm:$0xff] }
 0x29e   : > { %8029 = vmatmul.mubr.f32.gmra.mrb[44].mxu1 %v3756_v50  ;;  %8723 = vmatprep.subr.bf16.mxu0 %v8722_v55  ;;  %v4130_v50 = vld [vmem:[#allocation2 + $0x21] sm:$0xff]  ;;  %v4601_v4 = vld [vmem:[#allocation8 + $0x2a8] sm:$0xff] }
 0x29f   : > { %8031 = vmatprep.mubr.f32.mxu1 %v3757_v13  ;;  %v3352_v13 = vld [vmem:[#allocation8 + $0x150] sm:$0xff]  ;;  %v8818_v30 = vpack.c.bf16 %v4601_v4, %v4600_v61  ;;  %v12393_v61 = vld [vmem:[#allocation2 + $0x60] sm:$0xff]  ;;  %v4604_v4 = vld [vmem:[#allocation8 + $0x2c0] sm:$0xff] }
 0x2a0   : > { %7761 = vmatmul.mubr.f32.gmra.mrb[52].mxu0 %v2559_v36  ;;  %v12384_v36 = vld [vmem:[#allocation2 + $0x48] sm:$0xff] }
 0x2a1   : > { %7763 = vmatprep.mubr.f32.mxu0 %v12374_v19  ;;  %8725 = vmatpush3.bf16.msra.mxu0 %v8722_v55  ;;  %v4132_v55 = vld [vmem:[#allocation2 + $0x31] sm:$0xff] }
 0x2a2   : > { %8032 = vmatmul.mubr.f32.gmra.mrb[46].mxu1 %v3758_v6  ;;  %8727 = vmatprep.subr.bf16.mxu0 %v8726_v53  ;;  %v3353_v6 = vld [vmem:[#allocation8 + $0x158] sm:$0xff] }
 0x2a3   : > { %8066 = vmatprep.mubr.f32.mxu1 %v4129_v31  ;;  %v4602_v31 = vld [vmem:[#allocation8 + $0x2b0] sm:$0xff]  ;;  %v8734_v23 = vpack.c.bf16 %v3353_v6, %v3352_v13  ;;  %v4605_v13 = vld [vmem:[#allocation8 + $0x2c8] sm:$0xff] }
 0x2a4   : > { %7764 = vmatmul.mubr.f32.gmra.mrb[54].mxu0 %v12377_v16 }
 0x2a5   : > { %7766 = vmatprep.mubr.f32.mxu0 %v12380_v10  ;;  %8729 = vmatpush3.bf16.msra.mxu0 %v8726_v53  ;;  %v8822_v53 = vpack.c.bf16 %v4603_v11, %v4602_v31  ;;  %v12399_v31 = vld [vmem:[#allocation2 + $0x70] sm:$0xff]  ;;  %v4606_v11 = vld [vmem:[#allocation8 + $0x2d0] sm:$0xff] }
 0x2a6   : > { %8067 = vmatmul.mubr.f32.vlgmr.msra.gmra.mrb[0].mxu1 %v4130_v50  ;;  %8731 = vmatprep.subr.bf16.mxu0 %v8730_v7  ;;  %v4133_v50 = vld [vmem:[#allocation2 + $0x39] sm:$0xff] }
 0x2a7   : > { %8069 = vmatprep.mubr.f32.mxu1 %v4131_v26  ;;  %8813 = vmatpush3.bf16.msra.mxu1 %v11662_v5  ;;  %v3354_v26 = vld [vmem:[#allocation8 + $0x160] sm:$0xff]  ;;  %v3355_v5 = vld [vmem:[#allocation8 + $0x168] sm:$0xff] }
 0x2a8   : > { %8815 = vmatprep.subr.bf16.mxu1 %v8814_v60  ;;  %7767 = vmatmul.mubr.f32.gmra.mrb[56].mxu0 %v12384_v36  ;;  %v8738_v6 = vpack.c.bf16 %v3355_v5, %v3354_v26  ;;  %v4607_v26 = vld [vmem:[#allocation8 + $0x2d8] sm:$0xff] }
 0x2a9   : > { %7769 = vmatprep.mubr.f32.mxu0 %v12387_v0  ;;  %8733 = vmatpush3.bf16.msra.mxu0 %v8730_v7  ;;  %v12396_v0 = vld [vmem:[#allocation2 + $0x68] sm:$0xff]  ;;  %v8826_v7 = vpack.c.bf16 %v4605_v13, %v4604_v4  ;;  %v4137_v5 = vld [vmem:[#allocation2 + $0x59] sm:$0xff]  ;;  %v8830_v4 = vpack.c.bf16 %v4607_v26, %v4606_v11 }
 0x2aa   : > { %8070 = vmatmul.mubr.f32.gmra.mrb[2].mxu1 %v4132_v55  ;;  %8735 = vmatprep.subr.bf16.mxu0 %v8734_v23  ;;  %v4135_v55 = vld [vmem:[#allocation2 + $0x49] sm:$0xff]  ;;  %13555 = vst [vmem:[#allocation28_spill] sm:$0xff] %v12396_v0  ;;  %v4610_v11 = vld [vmem:[#allocation8 + $0x2f0] sm:$0xff]  ;;  %v4611_v26 = vld [vmem:[#allocation8 + $0x2f8] sm:$0xff] }
 0x2ab   : > { %8072 = vmatprep.mubr.f32.mxu1 %v4133_v50  ;;  %8817 = vmatpush3.bf16.msra.mxu1 %v8814_v60  ;;  %v3356_v50 = vld [vmem:[#allocation8 + $0x170] sm:$0xff]  ;;  %v3357_v60 = vld [vmem:[#allocation8 + $0x178] sm:$0xff]  ;;  %v4608_v13 = vld [vmem:[#allocation8 + $0x2e0] sm:$0xff] }
 0x2ac   : > { %8819 = vmatprep.subr.bf16.mxu1 %v8818_v30  ;;  %7770 = vmatmul.mubr.f32.gmra.mrb[58].mxu0 %v12390_v51 }
 0x2ad   : > { %7772 = vmatprep.mubr.f32.mxu0 %v12393_v61  ;;  %8737 = vmatpush3.bf16.msra.mxu0 %v8734_v23  ;;  %v12405_v23 = vld [vmem:[#allocation2 + $0x80] sm:$0xff] }
 0x2ae   : > { %8073 = vmatmul.mubr.f32.gmra.mrb[4].mxu1 %v4134_v44  ;;  %8739 = vmatprep.subr.bf16.mxu0 %v8738_v6  ;;  %v8742_v44 = vpack.c.bf16 %v3357_v60, %v3356_v50  ;;  %v12408_v50 = vld [vmem:[#allocation2 + $0x88] sm:$0xff] }
 0x2af   : > { %8075 = vmatprep.mubr.f32.mxu1 %v4135_v55  ;;  %8821 = vmatpush3.bf16.msra.mxu1 %v8818_v30  ;;  %v4138_v30 = vld [vmem:[#allocation2 + $0x61] sm:$0xff]  ;;  %v12402_v55 = vld [vmem:[#allocation2 + $0x78] sm:$0xff]  ;;  %13556 = vst [vmem:[#allocation26_spill] sm:$0xff] %v12408_v50 }
 0x2b0   : > { %8823 = vmatprep.subr.bf16.mxu1 %v8822_v53  ;;  %7773 = vmatmul.mubr.f32.gmra.mrb[60].mxu0 %v12396_v0  ;;  %v4609_v0 = vld [vmem:[#allocation8 + $0x2e8] sm:$0xff] }
 0x2b1   : > { %7775 = vmatprep.mubr.f32.mxu0 %v12399_v31  ;;  %8741 = vmatpush3.bf16.msra.mxu0 %v8738_v6  ;;  %v8834_v60 = vpack.c.bf16 %v4609_v0, %v4608_v13  ;;  %v12411_v6 = vld [vmem:[#allocation2 + $0x90] sm:$0xff]  ;;  %v12417_v0 = vld [vmem:[#allocation2 + $0xa0] sm:$0xff] }
 0x2b2   : > { %8076 = vmatmul.mubr.f32.gmra.mrb[6].mxu1 %v4136_v9  ;;  %8743 = vmatprep.subr.bf16.mxu0 %v8742_v44  ;;  %v4139_v9 = vld [vmem:[#allocation2 + $0x69] sm:$0xff] }
 0x2b3   : > { %8078 = vmatprep.mubr.f32.mxu1 %v4137_v5  ;;  %8825 = vmatpush3.bf16.msra.mxu1 %v8822_v53  ;;  %v4140_v53 = vld [vmem:[#allocation2 + $0x71] sm:$0xff]  ;;  %v4141_v5 = vld [vmem:[#allocation2 + $0x79] sm:$0xff] }
 0x2b4   : > { %8827 = vmatprep.subr.bf16.mxu1 %v8826_v7  ;;  %7776 = vmatmul.mubr.f32.gmra.mrb[62].mxu0 %v12402_v55  ;;  %v5015_v13 = vld [vmem:[#allocation8 + $0x308] sm:$0xff] }
 0x2b5   : > { %7778 = vmatprep.mubr.f32.mxu0 %v12405_v23  ;;  %8745 = vmatpush3.bf16.msra.mxu0 %v8742_v44  ;;  %v5014_v44 = vld [vmem:[#allocation8 + $0x300] sm:$0xff] }
 0x2b6   : > { %8079 = vmatmul.mubr.f32.gmra.mrb[8].mxu1 %v4138_v30  ;;  %v4142_v30 = vld [vmem:[#allocation2 + $0x81] sm:$0xff] }
 0x2b7   : > { %8081 = vmatprep.mubr.f32.mxu1 %v4139_v9  ;;  %8829 = vmatpush3.bf16.msra.mxu1 %v8826_v7  ;;  %v12414_v7 = vld [vmem:[#allocation2 + $0x98] sm:$0xff]  ;;  %v8838_v9 = vpack.c.bf16 %v4611_v26, %v4610_v11  ;;  %v12425_v11 = vld [vmem:[#allocation2 + $0xb0] sm:$0xff] }
 0x2b8   : > { %8831 = vmatprep.subr.bf16.mxu1 %v8830_v4  ;;  %7779 = vmatmul.mubr.f32.gmra.mrb[64].mxu0 %v12408_v50  ;;  %v4143_v50 = vld [vmem:[#allocation2 + $0x89] sm:$0xff]  ;;  %13557 = vst [vmem:[#allocation25_spill] sm:$0xff] %v12425_v11  ;;  %v4145_v26 = vld [vmem:[#allocation2 + $0x99] sm:$0xff] }
 0x2b9   : > { %7781 = vmatprep.mubr.f32.mxu0 %v12411_v6 }
 0x2ba   : > { %8082 = vmatmul.mubr.f32.gmra.mrb[10].mxu1 %v4140_v53  ;;  %v12420_v53 = vld [vmem:[#allocation2 + $0xa8] sm:$0xff] }
 0x2bb   : > { %8084 = vmatprep.mubr.f32.mxu1 %v4141_v5  ;;  %8833 = vmatpush3.bf16.msra.mxu1 %v8830_v4  ;;  %v12422_v4 = vpack.c.bf16 %v5015_v13, %v5014_v44  ;;  %v4144_v5 = vld [vmem:[#allocation2 + $0x91] sm:$0xff]  ;;  %v4147_v44 = vld [vmem:[#allocation2 + $0xa9] sm:$0xff] }
 0x2bc   : > { %8835 = vmatprep.subr.bf16.mxu1 %v8834_v60  ;;  %7782 = vmatmul.mubr.f32.gmra.mrb[66].mxu0 %v12414_v7  ;;  %v12435_v13 = vld [vmem:[#allocation2 + $0xc8] sm:$0xff] }
 0x2bd   : > { %7784 = vmatprep.mubr.f32.mxu0 %v12417_v0  ;;  %13559 = vst [vmem:[#allocation32_spill] sm:$0xff] %v12435_v13 }
 0x2be   : > { %8085 = vmatmul.mubr.f32.gmra.mrb[12].mxu1 %v4142_v30  ;;  %v12428_v30 = vld [vmem:[#allocation2 + $0xb8] sm:$0xff] }
 0x2bf   : > { %8087 = vmatprep.mubr.f32.mxu1 %v4143_v50  ;;  %8837 = vmatpush3.bf16.msra.mxu1 %v8834_v60  ;;  %13558 = vst [vmem:[#allocation23_spill] sm:$0xff] %v12428_v30  ;;  %v4146_v50 = vld [vmem:[#allocation2 + $0xa1] sm:$0xff] }
 0x2c0   : > { %8839 = vmatprep.subr.bf16.mxu1 %v8838_v9  ;;  %7785 = vmatmul.mubr.f32.gmra.mrb[68].mxu0 %v12420_v53  ;;  %v12432_v60 = vld [vmem:[#allocation2 + $0xc0] sm:$0xff] }
 0x2c1   : > { %7787 = vmatprep.mubr.f32.mxu0 %v12425_v11  ;;  %v4150_v11 = vld [vmem:[#allocation2 + $0xc1] sm:$0xff] }
 0x2c2   : > { %8088 = vmatmul.mubr.f32.gmra.mrb[14].mxu1 %v4144_v5  ;;  %v4148_v5 = vld [vmem:[#allocation2 + $0xb1] sm:$0xff] }
 0x2c3   : > { %8090 = vmatprep.mubr.f32.mxu1 %v4145_v26  ;;  %8841 = vmatpush3.bf16.msra.mxu1 %v8838_v9  ;;  %v12438_v9 = vld [vmem:[#allocation2 + $0xd0] sm:$0xff]  ;;  %v4149_v26 = vld [vmem:[#allocation2 + $0xb9] sm:$0xff] }
 0x2c4   : > { %8843 = vmatprep.subr.bf16.mxu1 %v12422_v4  ;;  %7788 = vmatmul.mubr.f32.gmra.mrb[70].mxu0 %v12428_v30  ;;  %v12441_v30 = vld [vmem:[#allocation2 + $0xd8] sm:$0xff] }
 0x2c5   : > { %7790 = vmatprep.mubr.f32.mxu0 %v12432_v60  ;;  %13560 = vst [vmem:[#allocation31_spill] sm:$0xff] %v12441_v30 }
 0x2c6   : > { %8091 = vmatmul.mubr.f32.gmra.mrb[16].mxu1 %v4146_v50  ;;  %v12444_v50 = vld [vmem:[#allocation2 + $0xe0] sm:$0xff] }
 0x2c7   : > { %8093 = vmatprep.mubr.f32.mxu1 %v4147_v44  ;;  %v4151_v44 = vld [vmem:[#allocation2 + $0xc9] sm:$0xff] }
 0x2c8   : > { %7791 = vmatmul.mubr.f32.gmra.mrb[72].mxu0 %v12435_v13  ;;  %v4152_v13 = vld [vmem:[#allocation2 + $0xd1] sm:$0xff] }
 0x2c9   : > { %7793 = vmatprep.mubr.f32.mxu0 %v12438_v9 }
 0x2ca   : > { %8094 = vmatmul.mubr.f32.gmra.mrb[18].mxu1 %v4148_v5  ;;  %v4153_v5 = vld [vmem:[#allocation2 + $0xd9] sm:$0xff] }
 0x2cb   : > { %8096 = vmatprep.mubr.f32.mxu1 %v4149_v26  ;;  %v4154_v26 = vld [vmem:[#allocation2 + $0xe1] sm:$0xff] }
 0x2cc   : > { %7794 = vmatmul.mubr.f32.gmra.mrb[74].mxu0 %v12441_v30  ;;  %v4155_v30 = vld [vmem:[#allocation2 + $0xe9] sm:$0xff] }
 0x2cd   : > { %7796 = vmatprep.mubr.f32.mxu0 %v12444_v50 }
 0x2ce   : > { %8097 = vmatmul.mubr.f32.gmra.mrb[20].mxu1 %v4150_v11  ;;  %v4156_v11 = vld [vmem:[#allocation2 + $0xf1] sm:$0xff] }
 0x2cf   : > { %8099 = vmatprep.mubr.f32.mxu1 %v4151_v44  ;;  %v4157_v44 = vld [vmem:[#allocation2 + $0xf9] sm:$0xff] }
 0x2d0   : > { %7797 = vmatmul.mubr.f32.gmra.mrb[76].mxu0 %v11981_v58  ;;  %v4158_v58 = vld [vmem:[#allocation2 + $0x101] sm:$0xff] }
 0x2d1   : > { %7799 = vmatprep.mubr.f32.mxu0 %v11983_v39  ;;  %v4159_v39 = vld [vmem:[#allocation2 + $0x109] sm:$0xff] }
 0x2d2   : > { %8100 = vmatmul.mubr.f32.gmra.mrb[22].mxu1 %v4152_v13  ;;  %v5026_v13 = vld [vmem:[#allocation8 + $0x360] sm:$0xff] }
 0x2d3   : > { %8102 = vmatprep.mubr.f32.mxu1 %v4153_v5  ;;  %v5027_v5 = vld [vmem:[#allocation8 + $0x368] sm:$0xff] }
 0x2d4   : > { %7800 = vmatmul.mubr.f32.gmra.mrb[78].mxu0 %v12041_v48  ;;  %v4160_v48 = vld [vmem:[#allocation2 + $0x111] sm:$0xff] }
 0x2d5   : > { %7802 = vmatprep.mubr.f32.mxu0 %v12043_v29  ;;  %v4161_v29 = vld [vmem:[#allocation2 + $0x119] sm:$0xff] }
 0x2d6   : > { %8103 = vmatmul.mubr.f32.gmra.mrb[24].mxu1 %v4154_v26  ;;  %v12520_v26 = vld [vmem:[#allocation2 + $0x8a] sm:$0xff] }
 0x2d7   : > { %8105 = vmatprep.mubr.f32.mxu1 %v4155_v30  ;;  %v12515_v30 = vld [vmem:[#allocation2 + $0x82] sm:$0xff] }
 0x2d8   : > { %7803 = vmatmul.mubr.f32.gmra.mrb[80].mxu0 %v12075_v46  ;;  %v4162_v46 = vld [vmem:[#allocation2 + $0x121] sm:$0xff] }
 0x2d9   : > { %7805 = vmatprep.mubr.f32.mxu0 %v12081_v57  ;;  %v4163_v57 = vld [vmem:[#allocation2 + $0x129] sm:$0xff] }
 0x2da   : > { %8106 = vmatmul.mubr.f32.gmra.mrb[26].mxu1 %v4156_v11  ;;  %v8866_v11 = vpack.c.bf16 %v5027_v5, %v5026_v13  ;;  %v5434_v13 = vld [vmem:[#allocation8 + $0x390] sm:$0xff]  ;;  %v5435_v5 = vld [vmem:[#allocation8 + $0x398] sm:$0xff] }
 0x2db   : > { %8108 = vmatprep.mubr.f32.mxu1 %v4157_v44  ;;  %v12523_v44 = vld [vmem:[#allocation2 + $0x92] sm:$0xff] }
 0x2dc   : > { %7806 = vmatmul.mubr.f32.gmra.mrb[82].mxu0 %v12131_v45  ;;  %v4164_v45 = vld [vmem:[#allocation2 + $0x131] sm:$0xff] }
 0x2dd   : > { %7808 = vmatprep.mubr.f32.mxu0 %v12133_v56  ;;  %v4166_v56 = vld [vmem:[#allocation2 + $0x141] sm:$0xff] }
 0x2de   : > { %8109 = vmatmul.mubr.f32.gmra.mrb[28].mxu1 %v4158_v58  ;;  %v5028_v58 = vld [vmem:[#allocation8 + $0x370] sm:$0xff] }
 0x2df   : > { %8111 = vmatprep.mubr.f32.mxu1 %v4159_v39  ;;  %v5029_v39 = vld [vmem:[#allocation8 + $0x378] sm:$0xff] }
 0x2e0   : > { %7809 = vmatmul.mubr.f32.gmra.mrb[84].mxu0 %v12180_v32  ;;  %v4549_v32 = vld [vmem:[#allocation2 + $0x2a] sm:$0xff] }
 0x2e1   : > { %7811 = vmatprep.mubr.f32.mxu0 %v12182_v20  ;;  %v3299_v20 = vld [vmem:[#allocation2 + $0x32] sm:$0xff] }
 0x2e2   : > { %8112 = vmatmul.mubr.f32.gmra.mrb[30].mxu1 %v4160_v48  ;;  %v12528_v48 = vld [vmem:[#allocation2 + $0x9a] sm:$0xff] }
 0x2e3   : > { %8114 = vmatprep.mubr.f32.mxu1 %v4161_v29  ;;  %v8870_v29 = vpack.c.bf16 %v5029_v39, %v5028_v58  ;;  %v5436_v58 = vld [vmem:[#allocation8 + $0x3a0] sm:$0xff]  ;;  %v5437_v39 = vld [vmem:[#allocation8 + $0x3a8] sm:$0xff] }
 0x2e4   : > { %7812 = vmatmul.mubr.f32.gmra.mrb[86].mxu0 %v12239_v2 }
 0x2e5   : > { %7814 = vmatprep.mubr.f32.mxu0 %v12241_v21  ;;  %v3301_v21 = vld [vmem:[#allocation2 + $0x42] sm:$0xff] }
 0x2e6   : > { %8115 = vmatmul.mubr.f32.gmra.mrb[32].mxu1 %v4162_v46  ;;  %v12531_v46 = vld [vmem:[#allocation2 + $0xa2] sm:$0xff] }
 0x2e7   : > { %8117 = vmatprep.mubr.f32.mxu1 %v4163_v57  ;;  %v5432_v57 = vld [vmem:[#allocation8 + $0x380] sm:$0xff] }
 0x2e8   : > { %7815 = vmatmul.mubr.f32.gmra.mrb[88].mxu0 %v12299_v1  ;;  %v5020_v1 = vld [vmem:[#allocation8 + $0x330] sm:$0xff] }
 0x2e9   : > { %7817 = vmatprep.mubr.f32.mxu0 %v12301_v43  ;;  %v5021_v43 = vld [vmem:[#allocation8 + $0x338] sm:$0xff] }
 0x2ea   : > { %8118 = vmatmul.mubr.f32.gmra.mrb[34].mxu1 %v4164_v45  ;;  %v5433_v45 = vld [vmem:[#allocation8 + $0x388] sm:$0xff] }
 0x2eb   : > { %9639 = vmatprep.mubr.msk.f32.mxu1 %vm12004_vm4, %v12101_v62  ;;  %v4547_v62 = vld [vmem:[#allocation2 + $0x1a] sm:$0xff] }
 0x2ec   : > { %7818 = vmatmul.mubr.f32.gmra.mrb[90].mxu0 %v12341_v8  ;;  %v12506_v8 = vld [vmem:[#allocation2 + $0x6a] sm:$0xff] }
 0x2ed   : > { %7820 = vmatprep.mubr.f32.mxu0 %v12343_v47 }
 0x2ee   : > { %8121 = vmatmul.mubr.f32.gmra.mrb[36].mxu1 %v4166_v56  ;;  %v12536_v56 = vld [vmem:[#allocation2 + $0xaa] sm:$0xff] }
 0x2ef   : > { %9640 = vmatprep.mubr.msk.f32.mxu1 %vm12085_vm0, %v12152_v52  ;;  %v13562_v52 = vmax.f32 %v12339_v37, 0.0  ;;  %v5023_v37 = vld [vmem:[#allocation8 + $0x348] sm:$0xff] }
 0x2f0   : > { %7821 = vmatmul.mubr.f32.gmra.mrb[92].mxu0 %v12364_v54  ;;  %v8858_v47 = vpack.c.bf16 %v5023_v37, %v5022_v49  ;;  %v5024_v54 = vld [vmem:[#allocation8 + $0x350] sm:$0xff]  ;;  %v12635_v49 = vld [vmem:[#allocation2 + $0x16a] sm:$0xff] }
 0x2f1   : > { %7823 = vmatprep.mubr.f32.mxu0 %v12366_v59  ;;  %v5025_v59 = vld [vmem:[#allocation8 + $0x358] sm:$0xff]  ;;  %v12638_v37 = vld [vmem:[#allocation2 + $0x172] sm:$0xff] }
 0x2f2   : > { %9641 = vmatmul.mubr.msk.f32.gmra.mrb[38].mxu1 %vm12077_vm14, %v12136_v25  ;;  %v3297_v25 = vld [vmem:[#allocation2 + $0x22] sm:$0xff] }
 0x2f3   : > { %9642 = vmatprep.mubr.msk.f32.mxu1 %vm12190_vm13, %v12199_v38  ;;  %v13563_v38 = vmax.f32 %v12329_v24, 0.0  ;;  %v12503_v24 = vld [vmem:[#allocation2 + $0x62] sm:$0xff] }
 0x2f4   : > { %7824 = vmatmul.mubr.f32.gmra.mrb[94].mxu0 %v12371_v35  ;;  %v12512_v35 = vld [vmem:[#allocation2 + $0x7a] sm:$0xff] }
 0x2f5   : > { %7858 = vmatprep.mubr.f32.mxu0 %v3293_v3  ;;  %v12538_v3 = vpack.c.bf16 %v5433_v45, %v5432_v57  ;;  %v5438_v57 = vld [vmem:[#allocation8 + $0x3b0] sm:$0xff]  ;;  %v5439_v45 = vld [vmem:[#allocation8 + $0x3b8] sm:$0xff] }
 0x2f6   : > { %9643 = vmatmul.mubr.msk.f32.gmra.mrb[40].mxu1 %vm12139_vm1, %v12188_v33  ;;  %v5016_v33 = vld [vmem:[#allocation8 + $0x310] sm:$0xff] }
 0x2f7   : > { %9644 = vmatprep.mubr.msk.f32.mxu1 %vm12247_vm10, %v12259_v28  ;;  %v8846_v2 = vpack.c.bf16 %v5017_v42, %v5016_v33  ;;  %v4553_v28 = vld [vmem:[#allocation2 + $0x4a] sm:$0xff]  ;;  %v12574_v33 = vld [vmem:[#allocation2 + $0xf2] sm:$0xff]  ;;  %v12579_v42 = vld [vmem:[#allocation2 + $0xfa] sm:$0xff] }
 0x2f8   : > { %7859 = vmatmul.mubr.f32.vlgmr.msra.gmra.mrb[48].mxu0 %v3294_v22  ;;  %v12541_v22 = vld [vmem:[#allocation2 + $0xb2] sm:$0xff] }
 0x2f9   : > { %7861 = vmatprep.mubr.f32.mxu0 %v3295_v41  ;;  %v12546_v41 = vld [vmem:[#allocation2 + $0xba] sm:$0xff] }
 0x2fa   : > { %9645 = vmatmul.mubr.msk.f32.gmra.mrb[42].mxu1 %vm12201_vm12, %v12245_v12  ;;  %v5018_v12 = vld [vmem:[#allocation8 + $0x320] sm:$0xff] }
 0x2fb   : > { %9646 = vmatprep.mubr.msk.f32.mxu1 %vm12304_vm7, %v12315_v34  ;;  %v8850_v14 = vpack.c.bf16 %v5019_v40, %v5018_v12  ;;  %v8854_v34 = vpack.c.bf16 %v5021_v43, %v5020_v1  ;;  %v12598_v12 = vld [vmem:[#allocation2 + $0x122] sm:$0xff]  ;;  %v12603_v40 = vld [vmem:[#allocation2 + $0x12a] sm:$0xff]  ;;  %v12622_v43 = vld [vmem:[#allocation2 + $0x152] sm:$0xff] }
 0x2fc   : > { %7862 = vmatmul.mubr.f32.gmra.mrb[50].mxu0 %v4547_v62  ;;  %v12619_v1 = vld [vmem:[#allocation2 + $0x14a] sm:$0xff] }
 0x2fd   : > { %7864 = vmatprep.mubr.f32.mxu0 %v3297_v25 }
 0x2fe   : > { %9647 = vmatmul.mubr.msk.f32.gmra.mrb[44].mxu1 %vm12294_vm9, %v13561_v63  ;;  %v12558_v63 = vld [vmem:[#allocation2 + $0xd2] sm:$0xff] }
 0x2ff   : > { %9648 = vmatprep.mubr.msk.f32.mxu1 %vm12346_vm8, %v13562_v52  ;;  %v12563_v52 = vld [vmem:[#allocation2 + $0xda] sm:$0xff] }
 0x300   : > { %7865 = vmatmul.mubr.f32.gmra.mrb[52].mxu0 %v4549_v32 }
 0x301   : > { %7867 = vmatprep.mubr.f32.mxu0 %v3299_v20 }
 0x302   : > { %9649 = vmatmul.mubr.msk.f32.gmra.mrb[46].mxu1 %vm12334_vm3, %v13563_v38  ;;  %v12582_v38 = vld [vmem:[#allocation2 + $0x102] sm:$0xff] }
 0x303   : > { %8170 = vmatprep.mubr.f32.mxu1 %v4547_v62  ;;  %v12550_v62 = vld [vmem:[#allocation2 + $0xc2] sm:$0xff] }
 0x304   : > { %7868 = vmatmul.mubr.f32.gmra.mrb[54].mxu0 %v4551_v27 }
 0x305   : > { %7870 = vmatprep.mubr.f32.mxu0 %v3301_v21 }
 0x306   : > { %8171 = vmatmul.mubr.f32.vlgmr.msra.gmra.mrb[0].mxu1 %v3297_v25  ;;  %v12555_v25 = vld [vmem:[#allocation2 + $0xca] sm:$0xff] }
 0x307   : > { %8173 = vmatprep.mubr.f32.mxu1 %v4549_v32  ;;  %8845 = vmatpush3.bf16.msra.mxu1 %v12422_v4  ;;  %v8862_v4 = vpack.c.bf16 %v5025_v59, %v5024_v54  ;;  %v12566_v32 = vld [vmem:[#allocation2 + $0xe2] sm:$0xff]  ;;  %v12653_v59 = vld [vmem:[#allocation2 + $0x18a] sm:$0xff] }
 0x308   : > { %8847 = vmatprep.subr.bf16.mxu1 %v8846_v2  ;;  %7871 = vmatmul.mubr.f32.gmra.mrb[56].mxu0 %v4553_v28  ;;  %v12650_v54 = vld [vmem:[#allocation2 + $0x182] sm:$0xff]  ;;  %13564 = vst [vmem:[#allocation27_spill] sm:$0xff] %v12653_v59 }
 0x309   : > { %7873 = vmatprep.mubr.f32.mxu0 %v3303_v18 }
 0x30a   : > { %8174 = vmatmul.mubr.f32.gmra.mrb[2].mxu1 %v3299_v20  ;;  %v12571_v20 = vld [vmem:[#allocation2 + $0xea] sm:$0xff] }
 0x30b   : > { %8176 = vmatprep.mubr.f32.mxu1 %v4551_v27  ;;  %8849 = vmatpush3.bf16.msra.mxu1 %v8846_v2  ;;  %v12587_v27 = vld [vmem:[#allocation2 + $0x10a] sm:$0xff]  ;;  %v12590_v2 = vld [vmem:[#allocation2 + $0x112] sm:$0xff] }
 0x30c   : > { %8851 = vmatprep.subr.bf16.mxu1 %v8850_v14  ;;  %7874 = vmatmul.mubr.f32.gmra.mrb[58].mxu0 %v4555_v17 }
 0x30d   : > { %7876 = vmatprep.mubr.f32.mxu0 %v12503_v24 }
 0x30e   : > { %8177 = vmatmul.mubr.f32.gmra.mrb[4].mxu1 %v3301_v21  ;;  %v12595_v21 = vld [vmem:[#allocation2 + $0x11a] sm:$0xff] }
 0x30f   : > { %8179 = vmatprep.mubr.f32.mxu1 %v4553_v28  ;;  %8853 = vmatpush3.bf16.msra.mxu1 %v8850_v14  ;;  %v12606_v28 = vld [vmem:[#allocation2 + $0x132] sm:$0xff]  ;;  %v12611_v14 = vld [vmem:[#allocation2 + $0x13a] sm:$0xff] }
 0x310   : > { %8855 = vmatprep.subr.bf16.mxu1 %v8854_v34  ;;  %7877 = vmatmul.mubr.f32.gmra.mrb[60].mxu0 %v12506_v8 }
 0x311   : > { %7879 = vmatprep.mubr.f32.mxu0 %v12509_v15 }
 0x312   : > { %8180 = vmatmul.mubr.f32.gmra.mrb[6].mxu1 %v3303_v18  ;;  %v12614_v18 = vld [vmem:[#allocation2 + $0x142] sm:$0xff] }
 0x313   : > { %8182 = vmatprep.mubr.f32.mxu1 %v4555_v17  ;;  %8857 = vmatpush3.bf16.msra.mxu1 %v8854_v34  ;;  %v12627_v17 = vld [vmem:[#allocation2 + $0x15a] sm:$0xff]  ;;  %v12630_v34 = vld [vmem:[#allocation2 + $0x162] sm:$0xff] }
 0x314   : > { %8859 = vmatprep.subr.bf16.mxu1 %v8858_v47  ;;  %7880 = vmatmul.mubr.f32.gmra.mrb[62].mxu0 %v12512_v35 }
 0x315   : > { %7882 = vmatprep.mubr.f32.mxu0 %v12515_v30 }
 0x316   : > { %8183 = vmatmul.mubr.f32.gmra.mrb[8].mxu1 %v12503_v24 }
 0x317   : > { %8185 = vmatprep.mubr.f32.mxu1 %v12506_v8  ;;  %8861 = vmatpush3.bf16.msra.mxu1 %v8858_v47  ;;  %v12643_v47 = vld [vmem:[#allocation2 + $0x17a] sm:$0xff] }
 0x318   : > { %8863 = vmatprep.subr.bf16.mxu1 %v8862_v4  ;;  %7883 = vmatmul.mubr.f32.gmra.mrb[64].mxu0 %v12520_v26 }
 0x319   : > { %7885 = vmatprep.mubr.f32.mxu0 %v12523_v44 }
 0x31a   : > { %8186 = vmatmul.mubr.f32.gmra.mrb[10].mxu1 %v12509_v15 }
 0x31b   : > { %8188 = vmatprep.mubr.f32.mxu1 %v12512_v35  ;;  %8865 = vmatpush3.bf16.msra.mxu1 %v8862_v4  ;;  %v12656_v4 = vld [vmem:[#allocation2 + $0x192] sm:$0xff] }
 0x31c   : > { %8867 = vmatprep.subr.bf16.mxu1 %v8866_v11  ;;  %7886 = vmatmul.mubr.f32.gmra.mrb[66].mxu0 %v12528_v48 }
 0x31d   : > { %7888 = vmatprep.mubr.f32.mxu0 %v12531_v46 }
 0x31e   : > { %8189 = vmatmul.mubr.f32.gmra.mrb[12].mxu1 %v12515_v30 }
 0x31f   : > { %8191 = vmatprep.mubr.f32.mxu1 %v12520_v26  ;;  %8869 = vmatpush3.bf16.msra.mxu1 %v8866_v11  ;;  %v8878_v11 = vpack.c.bf16 %v5435_v5, %v5434_v13  ;;  %v5440_v13 = vld [vmem:[#allocation8 + $0x3c0] sm:$0xff]  ;;  %v5441_v5 = vld [vmem:[#allocation8 + $0x3c8] sm:$0xff] }
 0x320   : > { %8871 = vmatprep.subr.bf16.mxu1 %v8870_v29  ;;  %7889 = vmatmul.mubr.f32.gmra.mrb[68].mxu0 %v12536_v56 }
 0x321   : > { %7891 = vmatprep.mubr.f32.mxu0 %v12541_v22 }
 0x322   : > { %8192 = vmatmul.mubr.f32.gmra.mrb[14].mxu1 %v12523_v44 }
 0x323   : > { %8194 = vmatprep.mubr.f32.mxu1 %v12528_v48  ;;  %8873 = vmatpush3.bf16.msra.mxu1 %v8870_v29  ;;  %v8882_v29 = vpack.c.bf16 %v5437_v39, %v5436_v58  ;;  %v13566_v58 = vld [vmem:[#allocation28_spill] sm:$0xff] }
 0x324   : > { %8875 = vmatprep.subr.bf16.mxu1 %v12538_v3  ;;  %7892 = vmatmul.mubr.f32.gmra.mrb[70].mxu0 %v12546_v41  ;;  %v5447_v39 = vld [vmem:[#allocation8 + $0x3f8] sm:$0xff] }
 0x325   : > { %7894 = vmatprep.mubr.f32.mxu0 %v12550_v62 }
 0x326   : > { %8195 = vmatmul.mubr.f32.gmra.mrb[16].mxu1 %v12531_v46 }
 0x327   : > { %8197 = vmatprep.mubr.f32.mxu1 %v12536_v56 }
 0x328   : > { %7895 = vmatmul.mubr.f32.gmra.mrb[72].mxu0 %v12555_v25 }
 0x329   : > { %7897 = vmatprep.mubr.f32.mxu0 %v12558_v63 }
 0x32a   : > { %8198 = vmatmul.mubr.f32.gmra.mrb[18].mxu1 %v12541_v22 }
 0x32b   : > { %8200 = vmatprep.mubr.f32.mxu1 %v12546_v41 }
 0x32c   : > { %7898 = vmatmul.mubr.f32.gmra.mrb[74].mxu0 %v12563_v52 }
 0x32d   : > { %7900 = vmatprep.mubr.f32.mxu0 %v12566_v32 }
 0x32e   : > { %8201 = vmatmul.mubr.f32.gmra.mrb[20].mxu1 %v12550_v62 }
 0x32f   : > { %8203 = vmatprep.mubr.f32.mxu1 %v12555_v25 }
 0x330   : > { %7901 = vmatmul.mubr.f32.gmra.mrb[76].mxu0 %v12571_v20 }
 0x331   : > { %7903 = vmatprep.mubr.f32.mxu0 %v12574_v33 }
 0x332   : > { %8204 = vmatmul.mubr.f32.gmra.mrb[22].mxu1 %v12558_v63 }
 0x333   : > { %8206 = vmatprep.mubr.f32.mxu1 %v12563_v52 }
 0x334   : > { %7904 = vmatmul.mubr.f32.gmra.mrb[78].mxu0 %v12579_v42 }
 0x335   : > { %7906 = vmatprep.mubr.f32.mxu0 %v12582_v38 }
 0x336   : > { %8207 = vmatmul.mubr.f32.gmra.mrb[24].mxu1 %v12566_v32 }
 0x337   : > { %8209 = vmatprep.mubr.f32.mxu1 %v12571_v20 }
 0x338   : > { %7907 = vmatmul.mubr.f32.gmra.mrb[80].mxu0 %v12587_v27 }
 0x339   : > { %7909 = vmatprep.mubr.f32.mxu0 %v12590_v2 }
 0x33a   : > { %8210 = vmatmul.mubr.f32.gmra.mrb[26].mxu1 %v12574_v33 }
 0x33b   : > { %8212 = vmatprep.mubr.f32.mxu1 %v12579_v42 }
 0x33c   : > { %7910 = vmatmul.mubr.f32.gmra.mrb[82].mxu0 %v12595_v21 }
 0x33d   : > { %7912 = vmatprep.mubr.f32.mxu0 %v12598_v12 }
 0x33e   : > { %8213 = vmatmul.mubr.f32.gmra.mrb[28].mxu1 %v12582_v38 }
 0x33f   : > { %8215 = vmatprep.mubr.f32.mxu1 %v12587_v27 }
 0x340   : > { %7913 = vmatmul.mubr.f32.gmra.mrb[84].mxu0 %v12603_v40 }
 0x341   : > { %7915 = vmatprep.mubr.f32.mxu0 %v12606_v28 }
 0x342   : > { %8216 = vmatmul.mubr.f32.gmra.mrb[30].mxu1 %v12590_v2 }
 0x343   : > { %8218 = vmatprep.mubr.f32.mxu1 %v12595_v21 }
 0x344   : > { %7916 = vmatmul.mubr.f32.gmra.mrb[86].mxu0 %v12611_v14 }
 0x345   : > { %7918 = vmatprep.mubr.f32.mxu0 %v12614_v18 }
 0x346   : > { %8219 = vmatmul.mubr.f32.gmra.mrb[32].mxu1 %v12598_v12 }
 0x347   : > { %8221 = vmatprep.mubr.f32.mxu1 %v12603_v40 }
 0x348   : > { %7919 = vmatmul.mubr.f32.gmra.mrb[88].mxu0 %v12619_v1 }
 0x349   : > { %7921 = vmatprep.mubr.f32.mxu0 %v12622_v43 }
 0x34a   : > { %8222 = vmatmul.mubr.f32.gmra.mrb[34].mxu1 %v12606_v28 }
 0x34b   : > { %8224 = vmatprep.mubr.f32.mxu1 %v12611_v14 }
 0x34c   : > { %7922 = vmatmul.mubr.f32.gmra.mrb[90].mxu0 %v12627_v17 }
 0x34d   : > { %7924 = vmatprep.mubr.f32.mxu0 %v12630_v34 }
 0x34e   : > { %8225 = vmatmul.mubr.f32.gmra.mrb[36].mxu1 %v12614_v18 }
 0x34f   : > { %8227 = vmatprep.mubr.f32.mxu1 %v12619_v1 }
 0x350   : > { %7925 = vmatmul.mubr.f32.gmra.mrb[92].mxu0 %v12635_v49 }
 0x351   : > { %7927 = vmatprep.mubr.f32.mxu0 %v12638_v37 }
 0x352   : > { %8228 = vmatmul.mubr.f32.gmra.mrb[38].mxu1 %v12622_v43 }
 0x353   : > { %8230 = vmatprep.mubr.f32.mxu1 %v12627_v17 }
 0x354   : > { %7928 = vmatmul.mubr.f32.gmra.mrb[94].mxu0 %v12643_v47 }
 0x356   : > { %8231 = vmatmul.mubr.f32.gmra.mrb[40].mxu1 %v12630_v34 }
 0x357   : > { %8233 = vmatprep.mubr.f32.mxu1 %v12635_v49 }
 0x35a   : > { %8234 = vmatmul.mubr.f32.gmra.mrb[42].mxu1 %v12638_v37 }
 0x35b   : > { %8236 = vmatprep.mubr.f32.mxu1 %v12643_v47 }
 0x35e   : > { %8237 = vmatmul.mubr.f32.gmra.mrb[44].mxu1 %v12650_v54 }
 0x35f   : > { %8239 = vmatprep.mubr.f32.mxu1 %v12653_v59  ;;  %v13565_v59 = vld [vmem:[#allocation13_spill] sm:$0xff] }
 0x362   : > { %8240 = vmatmul.mubr.f32.gmra.mrb[46].mxu1 %v12656_v4 }
 0x363   : > { %8274 = vmatprep.mubr.f32.mxu1 %v12374_v19  ;;  %v8886_v19 = vpack.c.bf16 %v5439_v45, %v5438_v57  ;;  %v5850_v57 = vld [vmem:[#allocation8 + $0x400] sm:$0xff]  ;;  %v5851_v45 = vld [vmem:[#allocation8 + $0x408] sm:$0xff] }
 0x366   : > { %8275 = vmatmul.mubr.f32.vlgmr.msra.gmra.mrb[0].mxu1 %v12377_v16  ;;  %v8890_v16 = vpack.c.bf16 %v5441_v5, %v5440_v13  ;;  %v4990_v13 = vld [vmem:[#allocation2 + $0xf8] sm:$0xff]  ;;  %v4991_v5 = vld [vmem:[#allocation2 + $0x100] sm:$0xff] }
 0x367   : > { %8277 = vmatprep.mubr.f32.mxu1 %v12380_v10  ;;  %8877 = vmatpush3.bf16.msra.mxu1 %v12538_v3  ;;  %v5442_v10 = vld [vmem:[#allocation8 + $0x3d0] sm:$0xff]  ;;  %v5443_v3 = vld [vmem:[#allocation8 + $0x3d8] sm:$0xff] }
 0x368   : > { %8879 = vmatprep.subr.bf16.mxu1 %v8878_v11 }
 0x36a   : > { %8278 = vmatmul.mubr.f32.gmra.mrb[2].mxu1 %v12384_v36  ;;  %v8894_v36 = vpack.c.bf16 %v5443_v3, %v5442_v10  ;;  %v4993_v10 = vld [vmem:[#allocation2 + $0x110] sm:$0xff]  ;;  %v4995_v3 = vld [vmem:[#allocation2 + $0x120] sm:$0xff] }
 0x36b   : > { %8280 = vmatprep.mubr.f32.mxu1 %v13565_v59  ;;  %8881 = vmatpush3.bf16.msra.mxu1 %v8878_v11  ;;  %v5444_v59 = vld [vmem:[#allocation8 + $0x3e0] sm:$0xff]  ;;  %v5445_v11 = vld [vmem:[#allocation8 + $0x3e8] sm:$0xff] }
 0x36c   : > { %8883 = vmatprep.subr.bf16.mxu1 %v8882_v29 }
 0x36e   : > { %8281 = vmatmul.mubr.f32.gmra.mrb[4].mxu1 %v12390_v51  ;;  %v8898_v51 = vpack.c.bf16 %v5445_v11, %v5444_v59  ;;  %v5000_v59 = vld [vmem:[#allocation2 + $0x148] sm:$0xff]  ;;  %v5001_v11 = vld [vmem:[#allocation2 + $0x150] sm:$0xff] }
 0x36f   : > { %8283 = vmatprep.mubr.f32.mxu1 %v12393_v61  ;;  %8885 = vmatpush3.bf16.msra.mxu1 %v8882_v29  ;;  %v5446_v61 = vld [vmem:[#allocation8 + $0x3f0] sm:$0xff]  ;;  %v13567_v29 = vld [vmem:[#allocation26_spill] sm:$0xff] }
 0x370   : > { %8887 = vmatprep.subr.bf16.mxu1 %v8886_v19 }
 0x372   : > { %8284 = vmatmul.mubr.f32.gmra.mrb[6].mxu1 %v13566_v58  ;;  %v4997_v58 = vld [vmem:[#allocation2 + $0x130] sm:$0xff] }
 0x373   : > { %8286 = vmatprep.mubr.f32.mxu1 %v12399_v31  ;;  %8889 = vmatpush3.bf16.msra.mxu1 %v8886_v19  ;;  %v8902_v31 = vpack.c.bf16 %v5447_v39, %v5446_v61  ;;  %v13570_v19 = vld [vmem:[#allocation32_spill] sm:$0xff]  ;;  %v5004_v39 = vld [vmem:[#allocation2 + $0x168] sm:$0xff] }
 0x374   : > { %8891 = vmatprep.subr.bf16.mxu1 %v8890_v16  ;;  %v5003_v61 = vld [vmem:[#allocation2 + $0x160] sm:$0xff] }
 0x376   : > { %8287 = vmatmul.mubr.f32.gmra.mrb[8].mxu1 %v12402_v55  ;;  %v12675_v55 = vpack.c.bf16 %v5851_v45, %v5850_v57  ;;  %v5007_v57 = vld [vmem:[#allocation2 + $0x180] sm:$0xff]  ;;  %v5008_v45 = vld [vmem:[#allocation2 + $0x188] sm:$0xff] }
 0x377   : > { %8289 = vmatprep.mubr.f32.mxu1 %v12405_v23  ;;  %8893 = vmatpush3.bf16.msra.mxu1 %v8890_v16  ;;  %v13568_v23 = vld [vmem:[#allocation25_spill] sm:$0xff] }
 0x378   : > { %8895 = vmatprep.subr.bf16.mxu1 %v8894_v36  ;;  %v4992_v16 = vld [vmem:[#allocation2 + $0x108] sm:$0xff] }
 0x37a   : > { %8290 = vmatmul.mubr.f32.gmra.mrb[10].mxu1 %v13567_v29  ;;  %v5005_v29 = vld [vmem:[#allocation2 + $0x170] sm:$0xff] }
 0x37b   : > { %8292 = vmatprep.mubr.f32.mxu1 %v12411_v6  ;;  %8897 = vmatpush3.bf16.msra.mxu1 %v8894_v36  ;;  %v13569_v6 = vld [vmem:[#allocation23_spill] sm:$0xff]  ;;  %v4999_v36 = vld [vmem:[#allocation2 + $0x140] sm:$0xff] }
 0x37c   : > { %8899 = vmatprep.subr.bf16.mxu1 %v8898_v51 }
 0x37e   : > { %8293 = vmatmul.mubr.f32.gmra.mrb[12].mxu1 %v12414_v7  ;;  %v13571_v7 = vld [vmem:[#allocation31_spill] sm:$0xff] }
 0x37f   : > { %8295 = vmatprep.mubr.f32.mxu1 %v12417_v0  ;;  %8901 = vmatpush3.bf16.msra.mxu1 %v8898_v51  ;;  %v4988_v0 = vld [vmem:[#allocation2 + $0xe8] sm:$0xff]  ;;  %v5002_v51 = vld [vmem:[#allocation2 + $0x158] sm:$0xff] }
 0x380   : > { %8903 = vmatprep.subr.bf16.mxu1 %v8902_v31 }
 0x382   : > { %8296 = vmatmul.mubr.f32.gmra.mrb[14].mxu1 %v12420_v53  ;;  %v4989_v53 = vld [vmem:[#allocation2 + $0xf0] sm:$0xff] }
 0x383   : > { %8298 = vmatprep.mubr.f32.mxu1 %v13568_v23  ;;  %8905 = vmatpush3.bf16.msra.mxu1 %v8902_v31  ;;  %v5006_v31 = vld [vmem:[#allocation2 + $0x178] sm:$0xff]  ;;  %v5009_v23 = vld [vmem:[#allocation2 + $0x190] sm:$0xff] }
 0x384   : > { %8907 = vmatprep.subr.bf16.mxu1 %v12675_v55 }
 0x386   : > { %8299 = vmatmul.mubr.f32.gmra.mrb[16].mxu1 %v13569_v6  ;;  %v5011_v6 = vld [vmem:[#allocation2 + $0x1a0] sm:$0xff] }
 0x387   : > { %8301 = vmatprep.mubr.f32.mxu1 %v12432_v60  ;;  %v4994_v60 = vld [vmem:[#allocation2 + $0x118] sm:$0xff] }
 0x38a   : > { %8302 = vmatmul.mubr.f32.gmra.mrb[18].mxu1 %v13570_v19  ;;  %v5010_v19 = vld [vmem:[#allocation2 + $0x198] sm:$0xff] }
 0x38b   : > { %8304 = vmatprep.mubr.f32.mxu1 %v12438_v9  ;;  %v4996_v9 = vld [vmem:[#allocation2 + $0x128] sm:$0xff] }
 0x38e   : > { %8305 = vmatmul.mubr.f32.gmra.mrb[20].mxu1 %v13571_v7  ;;  %v5012_v7 = vld [vmem:[#allocation2 + $0x1a8] sm:$0xff] }
 0x38f   : > { %8307 = vmatprep.mubr.f32.mxu1 %v12444_v50  ;;  %v4998_v50 = vld [vmem:[#allocation2 + $0x138] sm:$0xff] }
 0x392   : > { %8308 = vmatmul.mubr.f32.gmra.mrb[22].mxu1 %v4988_v0  ;;  %v5852_v0 = vld [vmem:[#allocation8 + $0x410] sm:$0xff] }
 0x393   : > { %8310 = vmatprep.mubr.f32.mxu1 %v4989_v53  ;;  %v5853_v53 = vld [vmem:[#allocation8 + $0x418] sm:$0xff] }
 0x396   : > { %8311 = vmatmul.mubr.f32.gmra.mrb[24].mxu1 %v4990_v13  ;;  %v5383_v13 = vld [vmem:[#allocation2 + $0x31] sm:$0xff] }
 0x397   : > { %8313 = vmatprep.mubr.f32.mxu1 %v4991_v5  ;;  %v8910_v5 = vpack.c.bf16 %v5853_v53, %v5852_v0  ;;  %v5391_v0 = vld [vmem:[#allocation2 + $0x71] sm:$0xff] }
 0x39a   : > { %8314 = vmatmul.mubr.f32.gmra.mrb[26].mxu1 %v4992_v16  ;;  %v5384_v16 = vld [vmem:[#allocation2 + $0x39] sm:$0xff] }
 0x39b   : > { %8316 = vmatprep.mubr.f32.mxu1 %v4993_v10  ;;  %v5854_v10 = vld [vmem:[#allocation8 + $0x420] sm:$0xff] }
 0x39e   : > { %8317 = vmatmul.mubr.f32.gmra.mrb[28].mxu1 %v4994_v60  ;;  %v5855_v60 = vld [vmem:[#allocation8 + $0x428] sm:$0xff] }
 0x39f   : > { %8319 = vmatprep.mubr.f32.mxu1 %v4995_v3  ;;  %v5385_v3 = vld [vmem:[#allocation2 + $0x41] sm:$0xff] }
 0x3a2   : > { %8320 = vmatmul.mubr.f32.gmra.mrb[30].mxu1 %v4996_v9  ;;  %v8914_v9 = vpack.c.bf16 %v5855_v60, %v5854_v10  ;;  %v5862_v10 = vld [vmem:[#allocation8 + $0x460] sm:$0xff]  ;;  %v5863_v60 = vld [vmem:[#allocation8 + $0x468] sm:$0xff] }
 0x3a3   : > { %8322 = vmatprep.mubr.f32.mxu1 %v4997_v58  ;;  %v5386_v58 = vld [vmem:[#allocation2 + $0x49] sm:$0xff] }
 0x3a6   : > { %8323 = vmatmul.mubr.f32.gmra.mrb[32].mxu1 %v4998_v50  ;;  %v5856_v50 = vld [vmem:[#allocation8 + $0x430] sm:$0xff] }
 0x3a7   : > { %8325 = vmatprep.mubr.f32.mxu1 %v4999_v36  ;;  %v5857_v36 = vld [vmem:[#allocation8 + $0x438] sm:$0xff] }
 0x3aa   : > { %8326 = vmatmul.mubr.f32.gmra.mrb[34].mxu1 %v5000_v59  ;;  %v5387_v59 = vld [vmem:[#allocation2 + $0x51] sm:$0xff] }
 0x3ab   : > { %8328 = vmatprep.mubr.f32.mxu1 %v5001_v11 }
 0x3ae   : > { %8329 = vmatmul.mubr.f32.gmra.mrb[36].mxu1 %v5002_v51  ;;  %v8918_v51 = vpack.c.bf16 %v5857_v36, %v5856_v50  ;;  %v5394_v50 = vld [vmem:[#allocation2 + $0x89] sm:$0xff] }
 0x3af   : > { %8331 = vmatprep.mubr.f32.mxu1 %v5003_v61  ;;  %v5388_v61 = vld [vmem:[#allocation2 + $0x59] sm:$0xff] }
 0x3b2   : > { %8332 = vmatmul.mubr.f32.gmra.mrb[38].mxu1 %v5004_v39 }
 0x3b3   : > { %8334 = vmatprep.mubr.f32.mxu1 %v5005_v29  ;;  %v5858_v29 = vld [vmem:[#allocation8 + $0x440] sm:$0xff] }
 0x3b6   : > { %8335 = vmatmul.mubr.f32.gmra.mrb[40].mxu1 %v5006_v31  ;;  %v5859_v31 = vld [vmem:[#allocation8 + $0x448] sm:$0xff] }
 0x3b7   : > { %8337 = vmatprep.mubr.f32.mxu1 %v5007_v57 }
 0x3ba   : > { %8338 = vmatmul.mubr.f32.gmra.mrb[42].mxu1 %v5008_v45  ;;  %v8922_v45 = vpack.c.bf16 %v5859_v31, %v5858_v29 }
 0x3bb   : > { %8340 = vmatprep.mubr.f32.mxu1 %v5009_v23  ;;  %v5390_v23 = vld [vmem:[#allocation2 + $0x69] sm:$0xff] }
 0x3be   : > { %8341 = vmatmul.mubr.f32.gmra.mrb[44].mxu1 %v5010_v19  ;;  %v5860_v19 = vld [vmem:[#allocation8 + $0x450] sm:$0xff] }
 0x3bf   : > { %8343 = vmatprep.mubr.f32.mxu1 %v5011_v6 }
 0x3c2   : > { %8344 = vmatmul.mubr.f32.gmra.mrb[46].mxu1 %v5012_v7  ;;  %v5861_v7 = vld [vmem:[#allocation8 + $0x458] sm:$0xff] }
 0x3c3   : > { %8378 = vmatprep.mubr.f32.mxu1 %v5383_v13  ;;  %v8926_v13 = vpack.c.bf16 %v5861_v7, %v5860_v19  ;;  %v5398_v7 = vld [vmem:[#allocation2 + $0xa9] sm:$0xff] }
 0x3c6   : > { %8379 = vmatmul.mubr.f32.vlgmr.msra.gmra.mrb[0].mxu1 %v5384_v16 }
 0x3c7   : > { %8381 = vmatprep.mubr.f32.mxu1 %v5385_v3  ;;  %8909 = vmatpush3.bf16.msra.mxu1 %v12675_v55  ;;  %v5389_v55 = vld [vmem:[#allocation2 + $0x61] sm:$0xff] }
 0x3c8   : > { %8911 = vmatprep.subr.bf16.mxu1 %v8910_v5  ;;  %v5393_v3 = vld [vmem:[#allocation2 + $0x81] sm:$0xff] }
 0x3ca   : > { %8382 = vmatmul.mubr.f32.gmra.mrb[2].mxu1 %v5386_v58  ;;  %v8930_v58 = vpack.c.bf16 %v5863_v60, %v5862_v10  ;;  %v5400_v10 = vld [vmem:[#allocation2 + $0xb9] sm:$0xff] }
 0x3cb   : > { %8384 = vmatprep.mubr.f32.mxu1 %v5387_v59  ;;  %8913 = vmatpush3.bf16.msra.mxu1 %v8910_v5  ;;  %v12687_v11 = vpop.f32.mrb[48].mxu0  ;;  %v5392_v5 = vld [vmem:[#allocation2 + $0x79] sm:$0xff] }
 0x3cc   : > { %8915 = vmatprep.subr.bf16.mxu1 %v8914_v9  ;;  %v12689_v39 = vpop.f32.mrb[49].mxu0  ;;  %v5864_v59 = vld [vmem:[#allocation8 + $0x470] sm:$0xff] }
 0x3ce   : > { %8385 = vmatmul.mubr.f32.gmra.mrb[4].mxu1 %v5388_v61  ;;  %v5395_v61 = vld [vmem:[#allocation2 + $0x91] sm:$0xff] }
 0x3cf   : > { %8387 = vmatprep.mubr.f32.mxu1 %v5389_v55  ;;  %8917 = vmatpush3.bf16.msra.mxu1 %v8914_v9  ;;  %v12691_v57 = vpop.f32.mrb[50].mxu0  ;;  %v5396_v55 = vld [vmem:[#allocation2 + $0x99] sm:$0xff] }
 0x3d0   : > { %8919 = vmatprep.subr.bf16.mxu1 %v8918_v51  ;;  %v12693_v6 = vpop.f32.mrb[51].mxu0 }
 0x3d2   : > { %8388 = vmatmul.mubr.f32.gmra.mrb[6].mxu1 %v5390_v23 }
 0x3d3   : > { %8390 = vmatprep.mubr.f32.mxu1 %v5391_v0  ;;  %8921 = vmatpush3.bf16.msra.mxu1 %v8918_v51  ;;  %v12695_v53 = vpop.f32.mrb[52].mxu0  ;;  %v5865_v51 = vld [vmem:[#allocation8 + $0x478] sm:$0xff] }
 0x3d4   : > { %8923 = vmatprep.subr.bf16.mxu1 %v8922_v45  ;;  %v12697_v16 = vpop.f32.mrb[53].mxu0  ;;  %v8934_v31 = vpack.c.bf16 %v5865_v51, %v5864_v59  ;;  %v5403_v51 = vld [vmem:[#allocation2 + $0xd1] sm:$0xff] }
 0x3d6   : > { %8391 = vmatmul.mubr.f32.gmra.mrb[8].mxu1 %v5392_v5  ;;  %v5399_v5 = vld [vmem:[#allocation2 + $0xb1] sm:$0xff] }
 0x3d7   : > { %8393 = vmatprep.mubr.f32.mxu1 %v5393_v3  ;;  %8925 = vmatpush3.bf16.msra.mxu1 %v8922_v45  ;;  %v12699_v9 = vpop.f32.mrb[54].mxu0  ;;  %v5397_v45 = vld [vmem:[#allocation2 + $0xa1] sm:$0xff] }
 0x3d8   : > { %8927 = vmatprep.subr.bf16.mxu1 %v8926_v13  ;;  %v12701_v36 = vpop.f32.mrb[55].mxu0  ;;  %v5401_v3 = vld [vmem:[#allocation2 + $0xc1] sm:$0xff] }
 0x3da   : > { %8394 = vmatmul.mubr.f32.gmra.mrb[10].mxu1 %v5394_v50 }
 0x3db   : > { %8396 = vmatprep.mubr.f32.mxu1 %v5395_v61  ;;  %8929 = vmatpush3.bf16.msra.mxu1 %v8926_v13  ;;  %v12703_v29 = vpop.f32.mrb[56].mxu0 }
 0x3dc   : > { %8931 = vmatprep.subr.bf16.mxu1 %v8930_v58  ;;  %v12705_v23 = vpop.f32.mrb[57].mxu0 }
 0x3de   : > { %8397 = vmatmul.mubr.f32.gmra.mrb[12].mxu1 %v5396_v55  ;;  %v5404_v55 = vld [vmem:[#allocation2 + $0xd9] sm:$0xff] }
 0x3df   : > { %8399 = vmatprep.mubr.f32.mxu1 %v5397_v45  ;;  %8933 = vmatpush3.bf16.msra.mxu1 %v8930_v58  ;;  %v12707_v19 = vpop.f32.mrb[58].mxu0  ;;  %v5402_v58 = vld [vmem:[#allocation2 + $0xc9] sm:$0xff]  ;;  %v5405_v45 = vld [vmem:[#allocation2 + $0xe1] sm:$0xff] }
 0x3e0   : > { %8935 = vmatprep.subr.bf16.mxu1 %v8934_v31  ;;  %v12709_v0 = vpop.f32.mrb[59].mxu0 }
 0x3e2   : > { %8400 = vmatmul.mubr.f32.gmra.mrb[14].mxu1 %v5398_v7 }
 0x3e3   : > { %8402 = vmatprep.mubr.f32.mxu1 %v5399_v5  ;;  %8937 = vmatpush3.bf16.msra.mxu1 %v8934_v31  ;;  %v12711_v13 = vpop.f32.mrb[60].mxu0  ;;  %v5406_v5 = vld [vmem:[#allocation2 + $0xe9] sm:$0xff] }
 0x3e4   : > { %v12713_v60 = vpop.f32.mrb[61].mxu0 }
 0x3e6   : > { %8403 = vmatmul.mubr.f32.gmra.mrb[16].mxu1 %v5400_v10 }
 0x3e7   : > { %8405 = vmatprep.mubr.f32.mxu1 %v5401_v3  ;;  %v12715_v50 = vpop.f32.mrb[62].mxu0  ;;  %v5407_v3 = vld [vmem:[#allocation2 + $0xf1] sm:$0xff] }
 0x3e8   : > { %v12717_v59 = vpop.f32.mrb[63].mxu0 }
 0x3e9   : > { %13572 = vst [vmem:[#allocation36_spill] sm:$0xff] %v12717_v59 }
 0x3ea   : > { %8406 = vmatmul.mubr.f32.gmra.mrb[18].mxu1 %v5402_v58  ;;  %v5408_v58 = vld [vmem:[#allocation2 + $0xf9] sm:$0xff] }
 0x3eb   : > { %8408 = vmatprep.mubr.f32.mxu1 %v5403_v51  ;;  %v12719_v61 = vpop.f32.mrb[64].mxu0 }
 0x3ec   : > { %13573 = vst [vmem:[#allocation29_spill] sm:$0xff] %v12719_v61  ;;  %v12721_v31 = vpop.f32.mrb[65].mxu0  ;;  %v5409_v61 = vld [vmem:[#allocation2 + $0x101] sm:$0xff] }
 0x3ed   : > { %13574 = vst [vmem:[#allocation51_spill] sm:$0xff] %v12721_v31 }
 0x3ee   : > { %8409 = vmatmul.mubr.f32.gmra.mrb[20].mxu1 %v5404_v55  ;;  %v5410_v55 = vld [vmem:[#allocation2 + $0x109] sm:$0xff] }
 0x3ef   : > { %8411 = vmatprep.mubr.f32.mxu1 %v5405_v45  ;;  %v12723_v7 = vpop.f32.mrb[66].mxu0 }
 0x3f0   : > { %13575 = vst [vmem:[#allocation38_spill] sm:$0xff] %v12723_v7  ;;  %v12725_v10 = vpop.f32.mrb[67].mxu0  ;;  %v5411_v7 = vld [vmem:[#allocation2 + $0x111] sm:$0xff] }
 0x3f1   : > { %13576 = vst [vmem:[#allocation37_spill] sm:$0xff] %v12725_v10 }
 0x3f2   : > { %8412 = vmatmul.mubr.f32.gmra.mrb[22].mxu1 %v5406_v5  ;;  %v5412_v5 = vld [vmem:[#allocation2 + $0x119] sm:$0xff] }
 0x3f3   : > { %8414 = vmatprep.mubr.f32.mxu1 %v5407_v3  ;;  %v12727_v59 = vpop.f32.mrb[68].mxu0 }
 0x3f4   : > { %13577 = vst [vmem:[#allocation30_spill] sm:$0xff] %v12727_v59  ;;  %v12729_v51 = vpop.f32.mrb[69].mxu0  ;;  %v5413_v59 = vld [vmem:[#allocation2 + $0x121] sm:$0xff] }
 0x3f5   : > { %13578 = vst [vmem:[#allocation42_spill] sm:$0xff] %v12729_v51 }
 0x3f6   : > { %8415 = vmatmul.mubr.f32.gmra.mrb[24].mxu1 %v5408_v58  ;;  %v5414_v58 = vld [vmem:[#allocation2 + $0x129] sm:$0xff] }
 0x3f7   : > { %8417 = vmatprep.mubr.f32.mxu1 %v5409_v61  ;;  %v12731_v31 = vpop.f32.mrb[70].mxu0 }
 0x3f8   : > { %13579 = vst [vmem:[#allocation41_spill] sm:$0xff] %v12731_v31  ;;  %v12733_v45 = vpop.f32.mrb[71].mxu0  ;;  %v5415_v31 = vld [vmem:[#allocation2 + $0x131] sm:$0xff] }
 0x3f9   : > { %13580 = vst [vmem:[#allocation33_spill] sm:$0xff] %v12733_v45 }
 0x3fa   : > { %8418 = vmatmul.mubr.f32.gmra.mrb[26].mxu1 %v5410_v55  ;;  %v5416_v55 = vld [vmem:[#allocation2 + $0x139] sm:$0xff] }
 0x3fb   : > { %8420 = vmatprep.mubr.f32.mxu1 %v5411_v7  ;;  %v12735_v10 = vpop.f32.mrb[72].mxu0 }
 0x3fc   : > { %13581 = vst [vmem:[#allocation44_spill] sm:$0xff] %v12735_v10  ;;  %v12737_v3 = vpop.f32.mrb[73].mxu0  ;;  %v5417_v10 = vld [vmem:[#allocation2 + $0x141] sm:$0xff] }
 0x3fd   : > { %13582 = vst [vmem:[#allocation43_spill] sm:$0xff] %v12737_v3 }
 0x3fe   : > { %8421 = vmatmul.mubr.f32.gmra.mrb[28].mxu1 %v5412_v5  ;;  %v5418_v5 = vld [vmem:[#allocation2 + $0x149] sm:$0xff] }
 0x3ff   : > { %8423 = vmatprep.mubr.f32.mxu1 %v5413_v59  ;;  %v12739_v51 = vpop.f32.mrb[74].mxu0 }
 0x400   : > { %13583 = vst [vmem:[#allocation34_spill] sm:$0xff] %v12739_v51  ;;  %v12741_v61 = vpop.f32.mrb[75].mxu0  ;;  %v5419_v51 = vld [vmem:[#allocation2 + $0x151] sm:$0xff] }
 0x401   : > { %13584 = vst [vmem:[#allocation46_spill] sm:$0xff] %v12741_v61 }
 0x402   : > { %8424 = vmatmul.mubr.f32.gmra.mrb[30].mxu1 %v5414_v58  ;;  %v5420_v58 = vld [vmem:[#allocation2 + $0x159] sm:$0xff] }
 0x403   : > { %8426 = vmatprep.mubr.f32.mxu1 %v5415_v31  ;;  %v12743_v45 = vpop.f32.mrb[76].mxu0 }
 0x404   : > { %13585 = vst [vmem:[#allocation45_spill] sm:$0xff] %v12743_v45  ;;  %v12745_v7 = vpop.f32.mrb[77].mxu0  ;;  %v5421_v45 = vld [vmem:[#allocation2 + $0x161] sm:$0xff] }
 0x405   : > { %13586 = vst [vmem:[#allocation35_spill] sm:$0xff] %v12745_v7 }
 0x406   : > { %8427 = vmatmul.mubr.f32.gmra.mrb[32].mxu1 %v5416_v55  ;;  %v5422_v55 = vld [vmem:[#allocation2 + $0x169] sm:$0xff] }
 0x407   : > { %8429 = vmatprep.mubr.f32.mxu1 %v5417_v10  ;;  %v12747_v3 = vpop.f32.mrb[78].mxu0 }
 0x408   : > { %13587 = vst [vmem:[#allocation48_spill] sm:$0xff] %v12747_v3  ;;  %v12749_v59 = vpop.f32.mrb[79].mxu0  ;;  %v5423_v3 = vld [vmem:[#allocation2 + $0x171] sm:$0xff] }
 0x409   : > { %13588 = vst [vmem:[#allocation47_spill] sm:$0xff] %v12749_v59 }
 0x40a   : > { %8430 = vmatmul.mubr.f32.gmra.mrb[34].mxu1 %v5418_v5  ;;  %v5424_v5 = vld [vmem:[#allocation2 + $0x179] sm:$0xff] }
 0x40b   : > { %8432 = vmatprep.mubr.f32.mxu1 %v5419_v51  ;;  %v12751_v61 = vpop.f32.mrb[80].mxu0 }
 0x40c   : > { %13589 = vst [vmem:[#allocation39_spill] sm:$0xff] %v12751_v61  ;;  %v12753_v31 = vpop.f32.mrb[81].mxu0  ;;  %v5425_v61 = vld [vmem:[#allocation2 + $0x181] sm:$0xff] }
 0x40d   : > { %13590 = vst [vmem:[#allocation50_spill] sm:$0xff] %v12753_v31 }
 0x40e   : > { %8433 = vmatmul.mubr.f32.gmra.mrb[36].mxu1 %v5420_v58  ;;  %v5426_v58 = vld [vmem:[#allocation2 + $0x189] sm:$0xff] }
 0x40f   : > { %8435 = vmatprep.mubr.f32.mxu1 %v5421_v45  ;;  %v12755_v7 = vpop.f32.mrb[82].mxu0 }
 0x410   : > { %13591 = vst [vmem:[#allocation49_spill] sm:$0xff] %v12755_v7  ;;  %v12757_v10 = vpop.f32.mrb[83].mxu0  ;;  %v5427_v7 = vld [vmem:[#allocation2 + $0x191] sm:$0xff] }
 0x411   : > { %13592 = vst [vmem:[#allocation40_spill] sm:$0xff] %v12757_v10 }
 0x412   : > { %8436 = vmatmul.mubr.f32.gmra.mrb[38].mxu1 %v5422_v55 }
 0x413   : > { %8438 = vmatprep.mubr.f32.mxu1 %v5423_v3  ;;  %v12759_v59 = vpop.f32.mrb[84].mxu0  ;;  %v9593_v3 = vld [vmem:[#allocation2] sm:$0xff] }
 0x414   : > { %13593 = vst [vmem:[#allocation16_spill] sm:$0xff] %v12759_v59  ;;  %v12761_v51 = vpop.f32.mrb[85].mxu0 }
 0x415   : > { %13594 = vst [vmem:[#allocation17_spill] sm:$0xff] %v12761_v51 }
 0x416   : > { %8439 = vmatmul.mubr.f32.gmra.mrb[40].mxu1 %v5424_v5 }
 0x417   : > { %8441 = vmatprep.mubr.f32.mxu1 %v5425_v61  ;;  %v12763_v31 = vpop.f32.mrb[86].mxu0  ;;  %v5801_v61 = vld [vmem:[#allocation2 + $0x32] sm:$0xff] }
 0x418   : > { %13595 = vst [vmem:[#allocation19_spill] sm:$0xff] %v12763_v31  ;;  %v12765_v45 = vpop.f32.mrb[87].mxu0 }
 0x419   : > { %13596 = vst [vmem:[#allocation14_spill] sm:$0xff] %v12765_v45  ;;  %v5802_v45 = vld [vmem:[#allocation2 + $0x3a] sm:$0xff] }
 0x41a   : > { %8442 = vmatmul.mubr.f32.gmra.mrb[42].mxu1 %v5426_v58 }
 0x41b   : > { %8444 = vmatprep.mubr.f32.mxu1 %v5427_v7  ;;  %v12767_v10 = vpop.f32.mrb[88].mxu0  ;;  %v5803_v7 = vld [vmem:[#allocation2 + $0x42] sm:$0xff] }
 0x41c   : > { %13597 = vst [vmem:[#allocation21_spill] sm:$0xff] %v12767_v10  ;;  %v12769_v55 = vpop.f32.mrb[89].mxu0 }
 0x41d   : > { %13598 = vst [vmem:[#allocation24_spill] sm:$0xff] %v12769_v55  ;;  %v5804_v55 = vld [vmem:[#allocation2 + $0x4a] sm:$0xff] }
 0x41e   : > { %8445 = vmatmul.mubr.f32.gmra.mrb[44].mxu1 %v9593_v3 }
 0x41f   : > { %8447 = vmatprep.mubr.f32.mxu1 %v9593_v3  ;;  %v12771_v59 = vpop.f32.mrb[90].mxu0 }
 0x420   : > { %13599 = vst [vmem:[#allocation15_spill] sm:$0xff] %v12771_v59  ;;  %v12773_v5 = vpop.f32.mrb[91].mxu0  ;;  %v5805_v59 = vld [vmem:[#allocation2 + $0x52] sm:$0xff] }
 0x421   : > { %13600 = vst [vmem:[#allocation18_spill] sm:$0xff] %v12773_v5  ;;  %v5806_v5 = vld [vmem:[#allocation2 + $0x5a] sm:$0xff] }
 0x422   : > { %8448 = vmatmul.mubr.f32.gmra.mrb[46].mxu1 %v9593_v3  ;;  %v6283_v3 = vld [vmem:[%s10032_s10 + $0x60] sm:$0xff] }
 0x423   : > { %8482 = vmatprep.mubr.f32.mxu1 %v5801_v61  ;;  %v12775_v31 = vpop.f32.mrb[92].mxu0  ;;  %v6282_v61 = vld [vmem:[%s10032_s10 + $0x58] sm:$0xff] }
 0x424   : > { %v12777_v58 = vpop.f32.mrb[93].mxu0 }
 0x426   : > { %8483 = vmatmul.mubr.f32.vlgmr.msra.gmra.mrb[0].mxu1 %v5802_v45 }
 0x427   : > { %8485 = vmatprep.mubr.f32.mxu1 %v5803_v7  ;;  %v12779_v10 = vpop.f32.mrb[94].mxu0 }
 0x428   : > { %v12781_v51 = vpop.f32.mrb[95].mxu0 }
 0x42a   : > { %8486 = vmatmul.mubr.f32.gmra.mrb[2].mxu1 %v5804_v55 }
 0x42b   : > { %8488 = vmatprep.mubr.f32.mxu1 %v5805_v59 }
 0x42e   : > { %8489 = vmatmul.mubr.f32.gmra.mrb[4].mxu1 %v5806_v5 }
 0x42f   : > { %8491 = vmatprep.mubr.f32.mxu1 %v12503_v24  ;;  %v13601_v24 = vld [vmem:[#allocation27_spill] sm:$0xff] }
 0x432   : > { %8492 = vmatmul.mubr.f32.gmra.mrb[6].mxu1 %v12506_v8  ;;  %v5846_v8 = vld [vmem:[#allocation2 + $0x19a] sm:$0xff] }
 0x433   : > { %8494 = vmatprep.mubr.f32.mxu1 %v12509_v15  ;;  %v5847_v15 = vld [vmem:[#allocation2 + $0x1a2] sm:$0xff] }
 0x436   : > { %8495 = vmatmul.mubr.f32.gmra.mrb[8].mxu1 %v12512_v35  ;;  %v5848_v35 = vld [vmem:[#allocation2 + $0x1aa] sm:$0xff] }
 0x437   : > { %8497 = vmatprep.mubr.f32.mxu1 %v12515_v30 }
 0x43a   : > { %8498 = vmatmul.mubr.f32.gmra.mrb[10].mxu1 %v12520_v26  ;;  %v12826_v26 = vld [vmem:[%s13077_s4] ss:$0 sm:$0xff] }
 0x43b   : > { %8500 = vmatprep.mubr.f32.mxu1 %v12523_v44 }
 0x43e   : > { %8501 = vmatmul.mubr.f32.gmra.mrb[12].mxu1 %v12528_v48 }
 0x43f   : > { %8503 = vmatprep.mubr.f32.mxu1 %v12531_v46  ;;  %v6275_v46 = vld [vmem:[%s10032_s10 + $0x20] sm:$0xff] }
 0x442   : > { %8504 = vmatmul.mubr.f32.gmra.mrb[14].mxu1 %v12536_v56 }
 0x443   : > { %8506 = vmatprep.mubr.f32.mxu1 %v12541_v22 }
 0x446   : > { %8507 = vmatmul.mubr.f32.gmra.mrb[16].mxu1 %v12546_v41  ;;  %v6274_v41 = vld [vmem:[%s10032_s10 + $0x18] sm:$0xff] }
 0x447   : > { %8509 = vmatprep.mubr.f32.mxu1 %v12550_v62 }
 0x44a   : > { %8510 = vmatmul.mubr.f32.gmra.mrb[18].mxu1 %v12555_v25 }
 0x44b   : > { %8512 = vmatprep.mubr.f32.mxu1 %v12558_v63 }
 0x44e   : > { %8513 = vmatmul.mubr.f32.gmra.mrb[20].mxu1 %v12563_v52 }
 0x44f   : > { %8515 = vmatprep.mubr.f32.mxu1 %v12566_v32 }
 0x452   : > { %8516 = vmatmul.mubr.f32.gmra.mrb[22].mxu1 %v12571_v20 }
 0x453   : > { %8518 = vmatprep.mubr.f32.mxu1 %v12574_v33  ;;  %v6277_v33 = vld [vmem:[%s10032_s10 + $0x30] sm:$0xff] }
 0x456   : > { %8519 = vmatmul.mubr.f32.gmra.mrb[24].mxu1 %v12579_v42 }
 0x457   : > { %8521 = vmatprep.mubr.f32.mxu1 %v12582_v38 }
 0x45a   : > { %8522 = vmatmul.mubr.f32.gmra.mrb[26].mxu1 %v12587_v27  ;;  %v6276_v27 = vld [vmem:[%s10032_s10 + $0x28] sm:$0xff] }
 0x45b   : > { %8524 = vmatprep.mubr.f32.mxu1 %v12590_v2 }
 0x45e   : > { %8525 = vmatmul.mubr.f32.gmra.mrb[28].mxu1 %v12595_v21 }
 0x45f   : > { %8527 = vmatprep.mubr.f32.mxu1 %v12598_v12 }
 0x462   : > { %8528 = vmatmul.mubr.f32.gmra.mrb[30].mxu1 %v12603_v40 }
 0x463   : > { %8530 = vmatprep.mubr.f32.mxu1 %v12606_v28 }
 0x466   : > { %8531 = vmatmul.mubr.f32.gmra.mrb[32].mxu1 %v12611_v14 }
 0x467   : > { %8533 = vmatprep.mubr.f32.mxu1 %v12614_v18  ;;  %v6279_v18 = vld [vmem:[%s10032_s10 + $0x40] sm:$0xff] }
 0x46a   : > { %8534 = vmatmul.mubr.f32.gmra.mrb[34].mxu1 %v12619_v1 }
 0x46b   : > { %8536 = vmatprep.mubr.f32.mxu1 %v12622_v43 }
 0x46e   : > { %8537 = vmatmul.mubr.f32.gmra.mrb[36].mxu1 %v12627_v17  ;;  %v6278_v17 = vld [vmem:[%s10032_s10 + $0x38] sm:$0xff] }
 0x46f   : > { %8539 = vmatprep.mubr.f32.mxu1 %v12630_v34 }
 0x472   : > { %8540 = vmatmul.mubr.f32.gmra.mrb[38].mxu1 %v12635_v49 }
 0x473   : > { %8542 = vmatprep.mubr.f32.mxu1 %v12638_v37 }
 0x476   : > { %8543 = vmatmul.mubr.f32.gmra.mrb[40].mxu1 %v12643_v47 }
 0x477   : > { %8545 = vmatprep.mubr.f32.mxu1 %v12650_v54 }
 0x47a   : > { %8546 = vmatmul.mubr.f32.gmra.mrb[42].mxu1 %v13601_v24 }
 0x47b   : > { %8548 = vmatprep.mubr.f32.mxu1 %v12656_v4 }
 0x47e   : > { %8549 = vmatmul.mubr.f32.gmra.mrb[44].mxu1 %v5846_v8 }
 0x47f   : > { %8551 = vmatprep.mubr.f32.mxu1 %v5847_v15 }
 0x482   : > { %8552 = vmatmul.mubr.f32.gmra.mrb[46].mxu1 %v5848_v35 }
 0x4f9   : > { %v8484_v30 = vpop.f32.mrb[0].mxu1 }
 0x4fa   : > { %v8938_v44 = vadd.f32 %v8484_v30, %v12687_v11  ;;  %v5932_v48 = vpop.f32.mrb[1].mxu1  ;;  %v6281_v11 = vld [vmem:[%s10032_s10 + $0x50] sm:$0xff] }
 0x4fb   : > { %v8939_v56 = vadd.f32 %v5932_v48, %v12689_v39  ;;  %v6285_v30 = vld [vmem:[%s10032_s10 + $0x70] sm:$0xff]  ;;  %v6284_v48 = vld [vmem:[%s10032_s10 + $0x68] sm:$0xff] }
 0x4fc   : > { %v6227_v22 = vadd.f32 %v8938_v44, %v12826_v26 }
 0x4fd   : > { %v6226_v62 = vadd.f32 %v8939_v56, %v12826_v26  ;;  %v8487_v25 = vpop.f32.mrb[2].mxu1 }
 0x4fe   : > { %v6323_v63 = vadd.f32 %v6275_v46, %v6227_v22  ;;  %v8940_v52 = vadd.f32 %v8487_v25, %v12691_v57  ;;  %v5942_v32 = vpop.f32.mrb[3].mxu1  ;;  %v6287_v25 = vld [vmem:[%s10032_s10 + $0x80] sm:$0xff] }
 0x4ff   : > { %v6322_v20 = vadd.f32 %v6274_v41, %v6226_v62  ;;  %v8941_v42 = vadd.f32 %v5942_v32, %v12693_v6  ;;  %v6280_v6 = vld [vmem:[%s10032_s10 + $0x48] sm:$0xff] }
 0x500   : > { %6371 = vst [vmem:[%s12837_s30 + $0x8] sm:$0xff] %v6323_v63  ;;  %v6229_v38 = vadd.f32 %v8940_v52, %v12826_v26  ;;  %v6286_v52 = vld [vmem:[%s10032_s10 + $0x78] sm:$0xff] }
 0x501   : > { %6370 = vst [vmem:[%s12837_s30] sm:$0xff] %v6322_v20  ;;  %v6228_v2 = vadd.f32 %v8941_v42, %v12826_v26  ;;  %v8490_v21 = vpop.f32.mrb[4].mxu1 }
 0x502   : > { %v6325_v12 = vadd.f32 %v6277_v33, %v6229_v38  ;;  %v8942_v40 = vadd.f32 %v8490_v21, %v12695_v53  ;;  %v5952_v28 = vpop.f32.mrb[5].mxu1 }
 0x503   : > { %v6324_v14 = vadd.f32 %v6276_v27, %v6228_v2  ;;  %v8943_v1 = vadd.f32 %v5952_v28, %v12697_v16  ;;  %v6289_v27 = vld [vmem:[%s10032_s10 + $0x90] sm:$0xff]  ;;  %v13602_v2 = vld [vmem:[#allocation36_spill] sm:$0xff] }
 0x504   : > { %6373 = vst [vmem:[%s12837_s30 + $0x18] sm:$0xff] %v6325_v12  ;;  %v6231_v43 = vadd.f32 %v8942_v40, %v12826_v26  ;;  %v6288_v12 = vld [vmem:[%s10032_s10 + $0x88] sm:$0xff] }
 0x505   : > { %6372 = vst [vmem:[%s12837_s30 + $0x10] sm:$0xff] %v6324_v14  ;;  %v6230_v34 = vadd.f32 %v8943_v1, %v12826_v26  ;;  %v8493_v49 = vpop.f32.mrb[6].mxu1 }
 0x506   : > { %v6327_v37 = vadd.f32 %v6279_v18, %v6231_v43  ;;  %v8944_v47 = vadd.f32 %v8493_v49, %v12699_v9  ;;  %v5962_v54 = vpop.f32.mrb[7].mxu1  ;;  %v13603_v18 = vld [vmem:[#allocation29_spill] sm:$0xff] }
 0x507   : > { %v6326_v4 = vadd.f32 %v6278_v17, %v6230_v34  ;;  %v8945_v39 = vadd.f32 %v5962_v54, %v12701_v36  ;;  %v6291_v17 = vld [vmem:[%s10032_s10 + $0xa0] sm:$0xff] }
 0x508   : > { %6375 = vst [vmem:[%s12837_s30 + $0x28] sm:$0xff] %v6327_v37  ;;  %v6233_v57 = vadd.f32 %v8944_v47, %v12826_v26  ;;  %v13604_v34 = vld [vmem:[#allocation51_spill] sm:$0xff]  ;;  %v6290_v47 = vld [vmem:[%s10032_s10 + $0x98] sm:$0xff] }
 0x509   : > { %6374 = vst [vmem:[%s12837_s30 + $0x20] sm:$0xff] %v6326_v4  ;;  %v6232_v53 = vadd.f32 %v8945_v39, %v12826_v26  ;;  %v8496_v16 = vpop.f32.mrb[8].mxu1  ;;  %v13605_v39 = vld [vmem:[#allocation38_spill] sm:$0xff] }
 0x50a   : > { %v6329_v59 = vadd.f32 %v6281_v11, %v6233_v57  ;;  %v8946_v9 = vadd.f32 %v8496_v16, %v12703_v29  ;;  %v5972_v45 = vpop.f32.mrb[9].mxu1  ;;  %v6293_v16 = vld [vmem:[%s10032_s10 + $0xb0] sm:$0xff] }
 0x50b   : > { %v6328_v55 = vadd.f32 %v6280_v6, %v6232_v53  ;;  %v8947_v36 = vadd.f32 %v5972_v45, %v12705_v23 }
 0x50c   : > { %6377 = vst [vmem:[%s12837_s30 + $0x38] sm:$0xff] %v6329_v59  ;;  %v6235_v5 = vadd.f32 %v8946_v9, %v12826_v26  ;;  %v13606_v59 = vld [vmem:[#allocation37_spill] sm:$0xff] }
 0x50d   : > { %6376 = vst [vmem:[%s12837_s30 + $0x30] sm:$0xff] %v6328_v55  ;;  %v6234_v7 = vadd.f32 %v8947_v36, %v12826_v26  ;;  %v8499_v24 = vpop.f32.mrb[10].mxu1  ;;  %v6292_v55 = vld [vmem:[%s10032_s10 + $0xa8] sm:$0xff] }
 0x50e   : > { %v6331_v8 = vadd.f32 %v6283_v3, %v6235_v5  ;;  %v8948_v29 = vadd.f32 %v8499_v24, %v12707_v19  ;;  %v5982_v15 = vpop.f32.mrb[11].mxu1 }
 0x50f   : > { %v6330_v35 = vadd.f32 %v6282_v61, %v6234_v7  ;;  %v8949_v23 = vadd.f32 %v5982_v15, %v12709_v0  ;;  %v13607_v61 = vld [vmem:[#allocation30_spill] sm:$0xff] }
 0x510   : > { %6379 = vst [vmem:[%s12837_s30 + $0x48] sm:$0xff] %v6331_v8  ;;  %v6237_v44 = vadd.f32 %v8948_v29, %v12826_v26  ;;  %v6295_v29 = vld [vmem:[%s10032_s10 + $0xc0] sm:$0xff]  ;;  %v13608_v15 = vld [vmem:[#allocation42_spill] sm:$0xff] }
 0x511   : > { %6378 = vst [vmem:[%s12837_s30 + $0x40] sm:$0xff] %v6330_v35  ;;  %v6236_v46 = vadd.f32 %v8949_v23, %v12826_v26  ;;  %v8502_v56 = vpop.f32.mrb[12].mxu1  ;;  %v6294_v23 = vld [vmem:[%s10032_s10 + $0xb8] sm:$0xff] }
 0x512   : > { %v6333_v22 = vadd.f32 %v6285_v30, %v6237_v44  ;;  %v8950_v19 = vadd.f32 %v8502_v56, %v12711_v13  ;;  %v5992_v41 = vpop.f32.mrb[13].mxu1  ;;  %v13609_v56 = vld [vmem:[#allocation41_spill] sm:$0xff] }
 0x513   : > { %v6332_v62 = vadd.f32 %v6284_v48, %v6236_v46  ;;  %v8951_v0 = vadd.f32 %v5992_v41, %v12713_v60 }
 0x514   : > { %6381 = vst [vmem:[%s12837_s30 + $0x58] sm:$0xff] %v6333_v22  ;;  %v6239_v63 = vadd.f32 %v8950_v19, %v12826_v26 }
 0x515   : > { %6380 = vst [vmem:[%s12837_s30 + $0x50] sm:$0xff] %v6332_v62  ;;  %v6238_v32 = vadd.f32 %v8951_v0, %v12826_v26  ;;  %v8505_v20 = vpop.f32.mrb[14].mxu1  ;;  %v6297_v62 = vld [vmem:[%s10032_s10 + $0xd0] sm:$0xff] }
 0x516   : > { %v6335_v33 = vadd.f32 %v6287_v25, %v6239_v63  ;;  %v8952_v13 = vadd.f32 %v8505_v20, %v12715_v50  ;;  %v6002_v42 = vpop.f32.mrb[15].mxu1  ;;  %v13610_v25 = vld [vmem:[#allocation33_spill] sm:$0xff] }
 0x517   : > { %v6334_v38 = vadd.f32 %v6286_v52, %v6238_v32  ;;  %v8953_v60 = vadd.f32 %v6002_v42, %v13602_v2  ;;  %v6296_v52 = vld [vmem:[%s10032_s10 + $0xc8] sm:$0xff]  ;;  %v6299_v2 = vld [vmem:[%s10032_s10 + $0xe0] sm:$0xff] }
 0x518   : > { %6383 = vst [vmem:[%s12837_s30 + $0x68] sm:$0xff] %v6335_v33  ;;  %v6241_v21 = vadd.f32 %v8952_v13, %v12826_v26  ;;  %v13611_v13 = vld [vmem:[#allocation44_spill] sm:$0xff] }
 0x519   : > { %6382 = vst [vmem:[%s12837_s30 + $0x60] sm:$0xff] %v6334_v38  ;;  %v6240_v40 = vadd.f32 %v8953_v60, %v12826_v26  ;;  %v8508_v28 = vpop.f32.mrb[16].mxu1  ;;  %v13612_v60 = vld [vmem:[#allocation43_spill] sm:$0xff] }
 0x51a   : > { %v6337_v14 = vadd.f32 %v6289_v27, %v6241_v21  ;;  %v8954_v50 = vadd.f32 %v8508_v28, %v13603_v18  ;;  %v6012_v1 = vpop.f32.mrb[17].mxu1 }
 0x51b   : > { %v6336_v43 = vadd.f32 %v6288_v12, %v6240_v40  ;;  %v8955_v49 = vadd.f32 %v6012_v1, %v13604_v34  ;;  %v6298_v40 = vld [vmem:[%s10032_s10 + $0xd8] sm:$0xff]  ;;  %v6301_v34 = vld [vmem:[%s10032_s10 + $0xf0] sm:$0xff] }
 0x51c   : > { %6385 = vst [vmem:[%s12837_s30 + $0x78] sm:$0xff] %v6337_v14  ;;  %v6243_v37 = vadd.f32 %v8954_v50, %v12826_v26  ;;  %v13613_v50 = vld [vmem:[#allocation34_spill] sm:$0xff] }
 0x51d   : > { %6384 = vst [vmem:[%s12837_s30 + $0x70] sm:$0xff] %v6336_v43  ;;  %v6242_v54 = vadd.f32 %v8955_v49, %v12826_v26  ;;  %v8511_v4 = vpop.f32.mrb[18].mxu1  ;;  %v13614_v49 = vld [vmem:[#allocation46_spill] sm:$0xff] }
 0x51e   : > { %v6339_v11 = vadd.f32 %v6291_v17, %v6243_v37  ;;  %v8956_v57 = vadd.f32 %v8511_v4, %v13605_v39  ;;  %v6022_v6 = vpop.f32.mrb[19].mxu1 }
 0x51f   : > { %v6338_v53 = vadd.f32 %v6290_v47, %v6242_v54  ;;  %v8957_v9 = vadd.f32 %v6022_v6, %v13606_v59  ;;  %v6300_v54 = vld [vmem:[%s10032_s10 + $0xe8] sm:$0xff]  ;;  %v6303_v59 = vld [vmem:[%s10032_s10 + $0x100] sm:$0xff] }
 0x520   : > { %6387 = vst [vmem:[%s12837_s30 + $0x88] sm:$0xff] %v6339_v11  ;;  %v6245_v45 = vadd.f32 %v8956_v57, %v12826_v26  ;;  %v13615_v57 = vld [vmem:[#allocation45_spill] sm:$0xff] }
 0x521   : > { %6386 = vst [vmem:[%s12837_s30 + $0x80] sm:$0xff] %v6338_v53  ;;  %v6244_v3 = vadd.f32 %v8957_v9, %v12826_v26  ;;  %v8514_v36 = vpop.f32.mrb[20].mxu1  ;;  %v13616_v9 = vld [vmem:[#allocation35_spill] sm:$0xff] }
 0x522   : > { %v6341_v5 = vadd.f32 %v6293_v16, %v6245_v45  ;;  %v8958_v7 = vadd.f32 %v8514_v36, %v13607_v61  ;;  %v6032_v24 = vpop.f32.mrb[21].mxu1 }
 0x523   : > { %v6340_v8 = vadd.f32 %v6292_v55, %v6244_v3  ;;  %v8959_v35 = vadd.f32 %v6032_v24, %v13608_v15  ;;  %v6302_v3 = vld [vmem:[%s10032_s10 + $0xf8] sm:$0xff]  ;;  %v6305_v15 = vld [vmem:[%s10032_s10 + $0x110] sm:$0xff] }
 0x524   : > { %6389 = vst [vmem:[%s12837_s30 + $0x98] sm:$0xff] %v6341_v5  ;;  %v6247_v30 = vadd.f32 %v8958_v7, %v12826_v26  ;;  %v13617_v7 = vld [vmem:[#allocation48_spill] sm:$0xff] }
 0x525   : > { %6388 = vst [vmem:[%s12837_s30 + $0x90] sm:$0xff] %v6340_v8  ;;  %v6246_v44 = vadd.f32 %v8959_v35, %v12826_v26  ;;  %v8517_v48 = vpop.f32.mrb[22].mxu1  ;;  %v13618_v35 = vld [vmem:[#allocation47_spill] sm:$0xff] }
 0x526   : > { %v6343_v46 = vadd.f32 %v6295_v29, %v6247_v30  ;;  %v8960_v22 = vadd.f32 %v8517_v48, %v13609_v56  ;;  %v6042_v19 = vpop.f32.mrb[23].mxu1 }
 0x527   : > { %v6342_v41 = vadd.f32 %v6294_v23, %v6246_v44  ;;  %v8961_v0 = vadd.f32 %v6042_v19, %v13610_v25  ;;  %v6304_v44 = vld [vmem:[%s10032_s10 + $0x108] sm:$0xff]  ;;  %v6307_v25 = vld [vmem:[%s10032_s10 + $0x120] sm:$0xff] }
 0x528   : > { %6391 = vst [vmem:[%s12837_s30 + $0xa8] sm:$0xff] %v6343_v46  ;;  %v6249_v63 = vadd.f32 %v8960_v22, %v12826_v26  ;;  %v13619_v22 = vld [vmem:[#allocation39_spill] sm:$0xff] }
 0x529   : > { %6390 = vst [vmem:[%s12837_s30 + $0xa0] sm:$0xff] %v6342_v41  ;;  %v6248_v32 = vadd.f32 %v8961_v0, %v12826_v26  ;;  %v8520_v20 = vpop.f32.mrb[24].mxu1  ;;  %v13620_v0 = vld [vmem:[#allocation50_spill] sm:$0xff] }
 0x52a   : > { %v6345_v33 = vadd.f32 %v6297_v62, %v6249_v63  ;;  %v8962_v42 = vadd.f32 %v8520_v20, %v13611_v13  ;;  %v6052_v38 = vpop.f32.mrb[25].mxu1 }
 0x52b   : > { %v6344_v27 = vadd.f32 %v6296_v52, %v6248_v32  ;;  %v8963_v21 = vadd.f32 %v6052_v38, %v13612_v60  ;;  %v6306_v32 = vld [vmem:[%s10032_s10 + $0x118] sm:$0xff]  ;;  %v6309_v60 = vld [vmem:[%s10032_s10 + $0x130] sm:$0xff] }
 0x52c   : > { %6393 = vst [vmem:[%s12837_s30 + $0xb8] sm:$0xff] %v6345_v33  ;;  %v6251_v12 = vadd.f32 %v8962_v42, %v12826_v26  ;;  %v13621_v42 = vld [vmem:[#allocation49_spill] sm:$0xff] }
 0x52d   : > { %6392 = vst [vmem:[%s12837_s30 + $0xb0] sm:$0xff] %v6344_v27  ;;  %v6250_v28 = vadd.f32 %v8963_v21, %v12826_v26  ;;  %v8523_v14 = vpop.f32.mrb[26].mxu1  ;;  %v13622_v21 = vld [vmem:[#allocation40_spill] sm:$0xff] }
 0x52e   : > { %v6347_v18 = vadd.f32 %v6299_v2, %v6251_v12  ;;  %v8964_v1 = vadd.f32 %v8523_v14, %v13613_v50  ;;  %v6062_v43 = vpop.f32.mrb[27].mxu1 }
 0x52f   : > { %v6346_v17 = vadd.f32 %v6298_v40, %v6250_v28  ;;  %v8965_v37 = vadd.f32 %v6062_v43, %v13614_v49  ;;  %v6308_v28 = vld [vmem:[%s10032_s10 + $0x128] sm:$0xff]  ;;  %v6311_v49 = vld [vmem:[%s10032_s10 + $0x140] sm:$0xff] }
 0x530   : > { %6395 = vst [vmem:[%s12837_s30 + $0xc8] sm:$0xff] %v6347_v18  ;;  %v6253_v47 = vadd.f32 %v8964_v1, %v12826_v26  ;;  %v13623_v1 = vld [vmem:[#allocation16_spill] sm:$0xff] }
 0x531   : > { %6394 = vst [vmem:[%s12837_s30 + $0xc0] sm:$0xff] %v6346_v17  ;;  %v6252_v4 = vadd.f32 %v8965_v37, %v12826_v26  ;;  %v8526_v11 = vpop.f32.mrb[28].mxu1  ;;  %v13624_v37 = vld [vmem:[#allocation17_spill] sm:$0xff] }
 0x532   : > { %v6349_v39 = vadd.f32 %v6301_v34, %v6253_v47  ;;  %v8966_v6 = vadd.f32 %v8526_v11, %v13615_v57  ;;  %v6072_v53 = vpop.f32.mrb[29].mxu1 }
 0x533   : > { %v6348_v16 = vadd.f32 %v6300_v54, %v6252_v4  ;;  %v8967_v45 = vadd.f32 %v6072_v53, %v13616_v9  ;;  %v6310_v4 = vld [vmem:[%s10032_s10 + $0x138] sm:$0xff]  ;;  %v6313_v9 = vld [vmem:[%s10032_s10 + $0x150] sm:$0xff] }
 0x534   : > { %6397 = vst [vmem:[%s12837_s30 + $0xd8] sm:$0xff] %v6349_v39  ;;  %v6255_v55 = vadd.f32 %v8966_v6, %v12826_v26  ;;  %v13625_v6 = vld [vmem:[#allocation19_spill] sm:$0xff] }
 0x535   : > { %6396 = vst [vmem:[%s12837_s30 + $0xd0] sm:$0xff] %v6348_v16  ;;  %v6254_v36 = vadd.f32 %v8967_v45, %v12826_v26  ;;  %v8529_v5 = vpop.f32.mrb[30].mxu1  ;;  %v13626_v45 = vld [vmem:[#allocation14_spill] sm:$0xff] }
 0x536   : > { %v6351_v61 = vadd.f32 %v6303_v59, %v6255_v55  ;;  %v8968_v24 = vadd.f32 %v8529_v5, %v13617_v7  ;;  %v6082_v8 = vpop.f32.mrb[31].mxu1 }
 0x537   : > { %v6350_v29 = vadd.f32 %v6302_v3, %v6254_v36  ;;  %v8969_v30 = vadd.f32 %v6082_v8, %v13618_v35  ;;  %v6312_v36 = vld [vmem:[%s10032_s10 + $0x148] sm:$0xff]  ;;  %v6315_v35 = vld [vmem:[%s10032_s10 + $0x160] sm:$0xff] }
 0x538   : > { %6399 = vst [vmem:[%s12837_s30 + $0xe8] sm:$0xff] %v6351_v61  ;;  %v6257_v23 = vadd.f32 %v8968_v24, %v12826_v26  ;;  %v13627_v24 = vld [vmem:[#allocation21_spill] sm:$0xff] }
 0x539   : > { %6398 = vst [vmem:[%s12837_s30 + $0xe0] sm:$0xff] %v6350_v29  ;;  %v6256_v48 = vadd.f32 %v8969_v30, %v12826_v26  ;;  %v8532_v46 = vpop.f32.mrb[32].mxu1  ;;  %v13628_v30 = vld [vmem:[#allocation24_spill] sm:$0xff] }
 0x53a   : > { %v6353_v56 = vadd.f32 %v6305_v15, %v6257_v23  ;;  %v8970_v19 = vadd.f32 %v8532_v46, %v13619_v22  ;;  %v6092_v41 = vpop.f32.mrb[33].mxu1 }
 0x53b   : > { %v6352_v62 = vadd.f32 %v6304_v44, %v6256_v48  ;;  %v8971_v63 = vadd.f32 %v6092_v41, %v13620_v0  ;;  %v6314_v48 = vld [vmem:[%s10032_s10 + $0x158] sm:$0xff]  ;;  %v6317_v0 = vld [vmem:[%s10032_s10 + $0x170] sm:$0xff] }
 0x53c   : > { %6401 = vst [vmem:[%s12837_s30 + $0xf8] sm:$0xff] %v6353_v56  ;;  %v6259_v52 = vadd.f32 %v8970_v19, %v12826_v26  ;;  %v13629_v19 = vld [vmem:[#allocation15_spill] sm:$0xff] }
 0x53d   : > { %6400 = vst [vmem:[%s12837_s30 + $0xf0] sm:$0xff] %v6352_v62  ;;  %v6258_v20 = vadd.f32 %v8971_v63, %v12826_v26  ;;  %v8535_v33 = vpop.f32.mrb[34].mxu1  ;;  %v13630_v63 = vld [vmem:[#allocation18_spill] sm:$0xff] }
 0x53e   : > { %v6355_v13 = vadd.f32 %v6307_v25, %v6259_v52  ;;  %v8972_v38 = vadd.f32 %v8535_v33, %v13621_v42  ;;  %v6102_v27 = vpop.f32.mrb[35].mxu1 }
 0x53f   : > { %v6354_v2 = vadd.f32 %v6306_v32, %v6258_v20  ;;  %v8973_v12 = vadd.f32 %v6102_v27, %v13622_v21  ;;  %v6316_v20 = vld [vmem:[%s10032_s10 + $0x168] sm:$0xff] }
 0x540   : > { %6403 = vst [vmem:[%s12837_s30 + $0x108] sm:$0xff] %v6355_v13  ;;  %v6261_v40 = vadd.f32 %v8972_v38, %v12826_v26 }
 0x541   : > { %6402 = vst [vmem:[%s12837_s30 + $0x100] sm:$0xff] %v6354_v2  ;;  %v6260_v14 = vadd.f32 %v8973_v12, %v12826_v26  ;;  %v8538_v18 = vpop.f32.mrb[36].mxu1 }
 0x542   : > { %v6357_v50 = vadd.f32 %v6309_v60, %v6261_v40  ;;  %v8974_v43 = vadd.f32 %v8538_v18, %v13623_v1  ;;  %v6112_v17 = vpop.f32.mrb[37].mxu1  ;;  %v6319_v60 = vld [vmem:[%s10032_s10 + $0x180] sm:$0xff]  ;;  %v6318_v40 = vld [vmem:[%s10032_s10 + $0x178] sm:$0xff]  ;;  %v6321_v1 = vld [vmem:[%s10032_s10 + $0x190] sm:$0xff] }
 0x543   : > { %v6356_v34 = vadd.f32 %v6308_v28, %v6260_v14  ;;  %v8975_v47 = vadd.f32 %v6112_v17, %v13624_v37 }
 0x544   : > { %6405 = vst [vmem:[%s12837_s30 + $0x118] sm:$0xff] %v6357_v50  ;;  %v6263_v54 = vadd.f32 %v8974_v43, %v12826_v26 }
 0x545   : > { %6404 = vst [vmem:[%s12837_s30 + $0x110] sm:$0xff] %v6356_v34  ;;  %v6262_v11 = vadd.f32 %v8975_v47, %v12826_v26  ;;  %v8541_v39 = vpop.f32.mrb[38].mxu1  ;;  %v6320_v34 = vld [vmem:[%s10032_s10 + $0x188] sm:$0xff]  ;;  %s9814_s10 = smov [#allocation9]  }
 0x546   : > { %v6359_v57 = vadd.f32 %v6311_v49, %v6263_v54  ;;  %v8976_v53 = vadd.f32 %v8541_v39, %v13625_v6  ;;  %v6122_v16 = vpop.f32.mrb[39].mxu1  ;;  %s9740_s24 = sshll.u32 %s9814_s10, 4  ;;  %s9741_s24 = int_to_ptr.vmem [resolvable:$false] %s9740_s24 }
 0x547   : > { %v6358_v59 = vadd.f32 %v6310_v4, %v6262_v11  ;;  %v8977_v55 = vadd.f32 %v6122_v16, %v13626_v45  ;;  %s9742_s26 = scalar_lea.vmem %s9741_s24, 12288  ;;  %p9743_p7 = scmp.lt.s32.totalorder %s13027_s28, %s9741_s24 }
 0x548   : > { %6407 = vst [vmem:[%s12837_s30 + $0x128] sm:$0xff] %v6359_v57  ;;  %v6265_v3 = vadd.f32 %v8976_v53, %v12826_v26  ;;  %p9744_p9 = scmp.lt.s32.totalorder %s9742_s26, %s9736_s9 }
 0x549   : > { %6406 = vst [vmem:[%s12837_s30 + $0x120] sm:$0xff] %v6358_v59  ;;  %v6264_v5 = vadd.f32 %v8977_v55, %v12826_v26  ;;  %v8544_v61 = vpop.f32.mrb[40].mxu1 }
 0x54a   : > { %v6361_v7 = vadd.f32 %v6313_v9, %v6265_v3  ;;  %v8978_v8 = vadd.f32 %v8544_v61, %v13627_v24  ;;  %v6132_v29 = vpop.f32.mrb[41].mxu1  ;;  %p9745_p12 = por %p9744_p9, %p9743_p7 }
 0x54b   : > { %v6360_v15 = vadd.f32 %v6312_v36, %v6264_v5  ;;  %v8979_v23 = vadd.f32 %v6132_v29, %v13628_v30 }
 0x54c   : > { %6409 = vst [vmem:[%s12837_s30 + $0x138] sm:$0xff] %v6361_v7  ;;  %v6267_v44 = vadd.f32 %v8978_v8, %v12826_v26  ;;  %p9746_p1 = pnand %p9745_p12, %p9739_p3 }
 0x54d   : > { %6408 = vst [vmem:[%s12837_s30 + $0x130] sm:$0xff] %v6360_v15  ;;  %v6266_v46 = vadd.f32 %v8979_v23, %v12826_v26  ;;  %v8547_v56 = vpop.f32.mrb[42].mxu1 }
 0x54e   : > { %v6363_v22 = vadd.f32 %v6315_v35, %v6267_v44  ;;  %v8980_v41 = vadd.f32 %v8547_v56, %v13629_v19  ;;  %v6142_v62 = vpop.f32.mrb[43].mxu1 }
 0x54f   : > { %v6362_v25 = vadd.f32 %v6314_v48, %v6266_v46  ;;  %v8981_v52 = vadd.f32 %v6142_v62, %v13630_v63 }
 0x550   : > { %6411 = vst [vmem:[%s12837_s30 + $0x148] sm:$0xff] %v6363_v22  ;;  %v6269_v32 = vadd.f32 %v8980_v41, %v12826_v26 }
 0x551   : > { %6410 = vst [vmem:[%s12837_s30 + $0x140] sm:$0xff] %v6362_v25  ;;  %v6268_v33 = vadd.f32 %v8981_v52, %v12826_v26  ;;  %v8550_v13 = vpop.f32.mrb[44].mxu1 }
 0x552   : > { %v6365_v42 = vadd.f32 %v6317_v0, %v6269_v32  ;;  %v8982_v38 = vadd.f32 %v8550_v13, %v12775_v31  ;;  %v6152_v27 = vpop.f32.mrb[45].mxu1 }
 0x553   : > { %v6364_v2 = vadd.f32 %v6316_v20, %v6268_v33  ;;  %v8983_v21 = vadd.f32 %v6152_v27, %v12777_v58 }
 0x554   : > { %6413 = vst [vmem:[%s12837_s30 + $0x158] sm:$0xff] %v6365_v42  ;;  %v6271_v12 = vadd.f32 %v8982_v38, %v12826_v26 }
 0x555   : > { %6412 = vst [vmem:[%s12837_s30 + $0x150] sm:$0xff] %v6364_v2  ;;  %v6270_v28 = vadd.f32 %v8983_v21, %v12826_v26  ;;  %v8553_v14 = vpop.f32.mrb[46].mxu1 }
 0x556   : > { %v6367_v18 = vadd.f32 %v6319_v60, %v6271_v12  ;;  %v8984_v31 = vadd.f32 %v8553_v14, %v12779_v10  ;;  %v6162_v50 = vpop.f32.mrb[47].mxu1 }
 0x557   : > { %v6366_v58 = vadd.f32 %v6318_v40, %v6270_v28  ;;  %v8985_v43 = vadd.f32 %v6162_v50, %v12781_v51 }
 0x558   : > { %6415 = vst [vmem:[%s12837_s30 + $0x168] sm:$0xff] %v6367_v18  ;;  %v6273_v17 = vadd.f32 %v8984_v31, %v12826_v26 }
 0x559   : > { %6414 = vst [vmem:[%s12837_s30 + $0x160] sm:$0xff] %v6366_v58  ;;  %v6272_v49 = vadd.f32 %v8985_v43, %v12826_v26 }
 0x55a   : > { %v6369_v37 = vadd.f32 %v6321_v1, %v6273_v17 }
 0x55b   : > { %v6368_v10 = vadd.f32 %v6320_v34, %v6272_v49 }
 0x55c   : > { %6417 = vst [vmem:[%s12837_s30 + $0x178] sm:$0xff] %v6369_v37 }
 0x55d   : > { %6416 = vst [vmem:[%s12837_s30 + $0x170] sm:$0xff] %v6368_v10 }
 0x55e   : > { %9749 = shalt.err (!%p9746_p1)
}
 0x55f   : > { %s9750_s16 = scalar_lea.hbm %s13025_s6, 6144  ;;  %s9754_s12 = scalar_lea.hbm %s13078_s5, 12288 }
 0x560   : > { %p9751_p13 = scmp.ne.s32.totalorder %s13025_s6, %s9750_s16  ;;  %p9755_p4 = scmp.lt.u32.totalorder %s13025_s6, %s13078_s5 }
 0x561   : > { %p9756_p5 = scmp.lt.u32.totalorder %s9754_s12, %s9750_s16  ;;  %p9758_p11 = scmp.lt.u32.totalorder %s9750_s16, %s13025_s6 }
 0x562   : > { %p9752_p6 = pnand %p9751_p13, %p13631_p0 }
 0x563   : > { %p9757_p8 = por %p9756_p5, %p9755_p4 }
 0x564   : > { %p9753_p10 = pneg %p9752_p6 }
 0x565   : > { %p9759_p2 = por %p9758_p11, %p9757_p8 }
 0x567   : > { %p9760_p3 = pnand %p9759_p2, %p9753_p10 }
 0x569   : > { %9763 = shalt.err (!%p9760_p3)
}
 0x56a   : > { %s9815_s7 = smov 128   ;;  %s9816_s15 = smov 8  }
 0x56b   : > { %9529 = dma.vmem_to_hbm [thread:$0]  (%p13631_p0), %s13027_s28, 6144, %s13025_s6, %s6419_s22, %s9815_s7, %s9815_s7, %s9816_s15  }
 0x56c PF: > { %s6447_s14 = sand.u32 1, %s9794_s18   ;;  %p13632_p7 = scmp.ne.s32.totalorder %s13164_s25, 0 }
 0x56d   : > { %p13633_p9 = scmp.ge.s32.totalorder %s9806_s21, 2  ;;  %s6448_s9 = scalar_lea.sflag [#allocation5], %s6447_s14 }
 0x56f   : > { %p9543_p12 = pnand %p13633_p9, %p13632_p7 }
 0x571   : > { %9789 = dma.done.wait (!%p9543_p12), %s6448_s9, 6144  }
 0x572   : > { %9791 = vsyncadd (!%p9543_p12), %s6448_s9, 4294961152  ;;  %p19_p1 = scmp.ge.s32.totalorder %s9963_s29, 4   ;;  %s13634_s18 = smov %s9798_s19 }
 0x573   : > { %s13635_s19 = smov %s9802_s20  ;;  %s13636_s20 = smov %s9979_s27 }
 0x574   : > { %s13637_s21 = smov %s9963_s29  ;;  %21 = sbr.rel (!%p19_p1) target bundleno = 6 (0x6), region = 103 }
 0x57b   :  { %6453 = vsyncpa [#allocation4], 1 }
 0x57c   :  { %6455 = vsyncpa [#allocation4 + $0x1], 1 }
 0x57d   :  { %6456 = vsyncpa [#allocation7], 1 }
 0x57e   :  { %6457 = vsyncpa [#allocation5], 1 }
 0x57f   :  { %6459 = vsyncpa [#allocation5 + $0x1], 1 }

</bundles_post_ra>
